<compile_context>
chip_gen: v7x
topology: tpu7x:2x2x1
jax: 0.10.0
libtpu: 0.0.40
codegen_flags: <defaults>
</compile_context>

<pallas_src>
import functools

import jax
import jax.numpy as jnp
import numpy as np
from jax import lax
from jax.experimental import pallas as pl
from jax.experimental.pallas import tpu as pltpu

LEAKY_SLOPE = 0.1

_TAPS = [(dh, dw) for dh in range(3) for dw in range(3)]  # matches w.reshape(9*C, Cout)


def _zero_border(ref, H, W, C):
    """Zero only the 1-pixel halo of a (H+2, W+2, C) padded scratch buffer."""
    z_row = jnp.zeros((1, W + 2, C), jnp.float32)
    z_col = jnp.zeros((H + 2, 1, C), jnp.float32)
    ref[0:1, :, :] = z_row
    ref[H + 1:H + 2, :, :] = z_row
    ref[:, 0:1, :] = z_col
    ref[:, W + 1:W + 2, :] = z_col


def shortcut_block_kernel(x_ref, w1_ref, b1_ref, w2s_ref, b2s_ref, o_ref,
                          xpad_ref, hpad_ref, im_ref):
    H, W, Cin = x_ref.shape[1], x_ref.shape[2], x_ref.shape[3]
    Cmid = w1_ref.shape[1]
    KI1 = 9 * Cin            # contraction depth of conv1
    K2 = 9 * Cmid + Cin      # contraction depth of conv2 (+ fused 1x1 shortcut)

    x = x_ref[0]                                             # (H, W, Cin)

    # Halo-only zeroing (interior is fully overwritten below every step).
    _zero_border(xpad_ref, H, W, Cin)
    _zero_border(hpad_ref, H, W, Cmid)

    # ---- base conv1 (3x3, SAME) as a single K=9*Cin matmul ----
    xpad_ref[1:H + 1, 1:W + 1, :] = x
    xpad = xpad_ref[...]
    for t, (dh, dw) in enumerate(_TAPS):
        im_ref[:, :, t * Cin:(t + 1) * Cin] = xpad[dh:dh + H, dw:dw + W, :]
    p1 = im_ref[:, :, :KI1].reshape(H * W, KI1)
    # TODO(synk): on v6e/v7x cast the matmul operands to bf16 (keep f32 accum).
    h = jnp.dot(p1, w1_ref[...], preferred_element_type=jnp.float32) + b1_ref[...]
    h = jnp.where(h >= 0, h, LEAKY_SLOPE * h)                # LeakyReLU(0.1)

    # ---- base conv2 (3x3) fused with shortcut 1x1, `* factor` and the add ----
    hpad_ref[1:H + 1, 1:W + 1, :] = h.reshape(H, W, Cmid)
    hpad = hpad_ref[...]
    for t, (dh, dw) in enumerate(_TAPS):
        im_ref[:, :, t * Cmid:(t + 1) * Cmid] = hpad[dh:dh + H, dw:dw + W, :]
    im_ref[:, :, 9 * Cmid:K2] = x                            # shortcut channels
    k2 = im_ref[:, :, :K2].reshape(H * W, K2)
    out = jnp.dot(k2, w2s_ref[...], preferred_element_type=jnp.float32) + b2s_ref[...]

    # Lane-dense store, already in NCHW orientation: (Cout, H*W), last dim >=128.
    o_ref[0] = out.T.astype(o_ref.dtype)


def shortcut_block(x_nchw, params, factor):
    """Public entry point; takes NCHW like the PyTorch module, returns NCHW.

    TODO(synk): keep the surrounding network NHWC to also drop the input-side
    layout transpose (a full HBM round trip for this memory-bound op).
    """
    w1, b1, w2, b2, ws, bs = params
    x = jnp.transpose(x_nchw, (0, 2, 3, 1)).astype(jnp.float32)   # NHWC
    B, H, W, Cin = x.shape
    Cmid = w1.shape[3]
    Cout = w2.shape[3]
    factor = float(factor)

    # Pre-flatten the (tiny) weights; fold `factor`, the 1x1 shortcut and the
    # residual add into the second matmul's weights / bias.
    w1f = w1.reshape(9 * Cin, Cmid).astype(jnp.float32)
    w2s = jnp.concatenate(
        [w2.reshape(9 * Cmid, Cout).astype(jnp.float32) * factor,
         ws.astype(jnp.float32)], axis=0)                     # (9*Cmid+Cin, Cout)
    b1f = b1.astype(jnp.float32)                              # (1, Cmid)
    b2s = b2.astype(jnp.float32) * factor + bs.astype(jnp.float32)  # (1, Cout)

    Kmax = max(9 * Cin, 9 * Cmid + Cin)

    flops = 2 * B * H * W * (9 * Cin * Cmid + (9 * Cmid + Cin) * Cout)
    bytes_accessed = 4 * (B * H * W * (Cin + Cout)
                          + w1f.size + b1f.size + w2s.size + b2s.size)

    out = pl.pallas_call(
        shortcut_block_kernel,
        out_shape=jax.ShapeDtypeStruct((B, Cout, H * W), jnp.float32),
        grid_spec=pltpu.PrefetchScalarGridSpec(
            num_scalar_prefetch=0,
            grid=(B,),
            in_specs=[
                pl.BlockSpec((1, H, W, Cin), lambda b: (b, 0, 0, 0)),
                pl.BlockSpec((9 * Cin, Cmid), lambda b: (0, 0)),
                pl.BlockSpec((1, Cmid), lambda b: (0, 0)),
                pl.BlockSpec((9 * Cmid + Cin, Cout), lambda b: (0, 0)),
                pl.BlockSpec((1, Cout), lambda b: (0, 0)),
            ],
            out_specs=pl.BlockSpec((1, Cout, H * W), lambda b: (b, 0, 0)),
            scratch_shapes=[
                pltpu.VMEM((H + 2, W + 2, Cin), jnp.float32),   # padded input
                pltpu.VMEM((H + 2, W + 2, Cmid), jnp.float32),  # padded hidden
                pltpu.VMEM((H, W, Kmax), jnp.float32),          # im2col tile
            ],
        ),
        compiler_params=pltpu.CompilerParams(
            dimension_semantics=("parallel",)),
        cost_estimate=pl.CostEstimate(flops=flops, transcendentals=0,
                                      bytes_accessed=bytes_accessed),
    )(x, w1f, b1f, w2s, b2s)

    # (B, Cout, H*W) row-major == (B, Cout, H, W) row-major -> free reshape.
    return out.reshape(B, Cout, H, W)


def ref_shortcut_block(x_nchw, params, factor):
    """Pure-JAX reference mirroring the PyTorch forward."""
    w1, b1, w2, b2, ws, bs = params
    x = jnp.transpose(x_nchw, (0, 2, 3, 1)).astype(jnp.float32)
    dn = ('NHWC', 'HWIO', 'NHWC')
    h = lax.conv_general_dilated(x, w1, (1, 1), 'SAME',
                                 dimension_numbers=dn) + b1[0]
    h = jnp.where(h >= 0, h, LEAKY_SLOPE * h)
    y = lax.conv_general_dilated(h, w2, (1, 1), 'SAME',
                                 dimension_numbers=dn) + b2[0]
    sc = jnp.einsum('bhwc,cd->bhwd', x, ws) + bs[0]
    out = y * factor + sc
    return jnp.transpose(out, (0, 3, 1, 2))


if __name__ == "__main__":
    B, Cin, H, W = 2, 4, 16, 16
    Cmid, Cout = 4, 4
    factor = float(2.0 ** -0.5)

    key = jax.random.PRNGKey(0)
    keys = jax.random.split(key, 7)
    w1 = jax.random.normal(keys[0], (3, 3, Cin, Cmid), jnp.float32) * 0.1
    b1 = jax.random.normal(keys[1], (1, Cmid), jnp.float32) * 0.1
    w2 = jax.random.normal(keys[2], (3, 3, Cmid, Cout), jnp.float32) * 0.1
    b2 = jax.random.normal(keys[3], (1, Cout), jnp.float32) * 0.1
    ws = jax.random.normal(keys[4], (Cin, Cout), jnp.float32) * 0.1
    bs = jax.random.normal(keys[5], (1, Cout), jnp.float32) * 0.1
    x = jax.random.normal(keys[6], (B, Cin, H, W), jnp.float32)
    params = (w1, b1, w2, b2, ws, bs)

    out = shortcut_block(x, params, factor)
    out = jax.block_until_ready(out)

    ref = ref_shortcut_block(x, params, factor)
    assert out.shape == (B, Cout, H, W)
    np.testing.assert_allclose(np.asarray(out), np.asarray(ref),
                               atol=1e-4, rtol=1e-4)
    print("KERNEL_OK")
</pallas_src>

<mosaic_0001>
module attributes {stable_mosaic.version = 11 : i64} {
  func.func @shortcut_block_kernel(%arg0: i32, %arg1: memref<1x16x16x4xf32, #tpu.memory_space<vmem>>, %arg2: memref<36x4xf32, #tpu.memory_space<vmem>>, %arg3: memref<1x4xf32, #tpu.memory_space<vmem>>, %arg4: memref<40x4xf32, #tpu.memory_space<vmem>>, %arg5: memref<1x4xf32, #tpu.memory_space<vmem>>, %arg6: memref<1x4x256xf32, #tpu.memory_space<vmem>>, %arg7: memref<18x18x4xf32, #tpu.memory_space<vmem>>, %arg8: memref<18x18x4xf32, #tpu.memory_space<vmem>>, %arg9: memref<16x16x40xf32, #tpu.memory_space<vmem>>) attributes {dimension_semantics = [#tpu.dimension_semantics<parallel>], iteration_bounds = array<i64: 2>, scalar_prefetch = 0 : i64, scratch_operands = 3 : i64, tpu.core_type = #tpu.core_type<tc>, window_params = [{transform_indices = @transform_0, window_bounds = array<i64: 1, 16, 16, 4>}, {pipeline_mode = #tpu.pipeline_mode<synchronous>, transform_indices = @transform_1, window_bounds = array<i64: 36, 4>}, {pipeline_mode = #tpu.pipeline_mode<synchronous>, transform_indices = @transform_2, window_bounds = array<i64: 1, 4>}, {pipeline_mode = #tpu.pipeline_mode<synchronous>, transform_indices = @transform_3, window_bounds = array<i64: 40, 4>}, {pipeline_mode = #tpu.pipeline_mode<synchronous>, transform_indices = @transform_4, window_bounds = array<i64: 1, 4>}, {transform_indices = @transform_5, window_bounds = array<i64: 1, 4, 256>}]} {
    %c0 = arith.constant 0 : index
    %c0_0 = arith.constant 0 : index
    %c0_1 = arith.constant 0 : index
    %c0_2 = arith.constant 0 : index
    %0 = vector.load %arg1[%c0, %c0_0, %c0_1, %c0_2] : memref<1x16x16x4xf32, #tpu.memory_space<vmem>>, vector<1x16x16x4xf32>
    %1 = vector.shape_cast %0 : vector<1x16x16x4xf32> to vector<16x16x4xf32>
    %cst = arith.constant 0.000000e+00 : f32
    %2 = vector.broadcast %cst : f32 to vector<1x18x4xf32>
    %cst_3 = arith.constant 0.000000e+00 : f32
    %3 = vector.broadcast %cst_3 : f32 to vector<18x1x4xf32>
    %c0_4 = arith.constant 0 : index
    %c0_5 = arith.constant 0 : index
    %c0_6 = arith.constant 0 : index
    %4 = vector.load %arg7[%c0_4, %c0_5, %c0_6] : memref<18x18x4xf32, #tpu.memory_space<vmem>>, vector<1x18x4xf32>
    tpu.vector_store %arg7[%c0_4, %c0_5, %c0_6], %2 {strides = array<i32>} : memref<18x18x4xf32, #tpu.memory_space<vmem>>, vector<1x18x4xf32>,
    %c17 = arith.constant 17 : index
    %c0_7 = arith.constant 0 : index
    %c0_8 = arith.constant 0 : index
    %5 = vector.load %arg7[%c17, %c0_7, %c0_8] : memref<18x18x4xf32, #tpu.memory_space<vmem>>, vector<1x18x4xf32>
    tpu.vector_store %arg7[%c17, %c0_7, %c0_8], %2 {strides = array<i32>} : memref<18x18x4xf32, #tpu.memory_space<vmem>>, vector<1x18x4xf32>,
    %c0_9 = arith.constant 0 : index
    %c0_10 = arith.constant 0 : index
    %c0_11 = arith.constant 0 : index
    %6 = vector.load %arg7[%c0_9, %c0_10, %c0_11] : memref<18x18x4xf32, #tpu.memory_space<vmem>>, vector<18x1x4xf32>
    tpu.vector_store %arg7[%c0_9, %c0_10, %c0_11], %3 {strides = array<i32>} : memref<18x18x4xf32, #tpu.memory_space<vmem>>, vector<18x1x4xf32>,
    %c0_12 = arith.constant 0 : index
    %c17_13 = arith.constant 17 : index
    %c0_14 = arith.constant 0 : index
    %7 = vector.load %arg7[%c0_12, %c17_13, %c0_14] : memref<18x18x4xf32, #tpu.memory_space<vmem>>, vector<18x1x4xf32>
    tpu.vector_store %arg7[%c0_12, %c17_13, %c0_14], %3 {strides = array<i32>} : memref<18x18x4xf32, #tpu.memory_space<vmem>>, vector<18x1x4xf32>,
    %cst_15 = arith.constant 0.000000e+00 : f32
    %8 = vector.broadcast %cst_15 : f32 to vector<1x18x4xf32>
    %cst_16 = arith.constant 0.000000e+00 : f32
    %9 = vector.broadcast %cst_16 : f32 to vector<18x1x4xf32>
    %c0_17 = arith.constant 0 : index
    %c0_18 = arith.constant 0 : index
    %c0_19 = arith.constant 0 : index
    %10 = vector.load %arg8[%c0_17, %c0_18, %c0_19] : memref<18x18x4xf32, #tpu.memory_space<vmem>>, vector<1x18x4xf32>
    tpu.vector_store %arg8[%c0_17, %c0_18, %c0_19], %8 {strides = array<i32>} : memref<18x18x4xf32, #tpu.memory_space<vmem>>, vector<1x18x4xf32>,
    %c17_20 = arith.constant 17 : index
    %c0_21 = arith.constant 0 : index
    %c0_22 = arith.constant 0 : index
    %11 = vector.load %arg8[%c17_20, %c0_21, %c0_22] : memref<18x18x4xf32, #tpu.memory_space<vmem>>, vector<1x18x4xf32>
    tpu.vector_store %arg8[%c17_20, %c0_21, %c0_22], %8 {strides = array<i32>} : memref<18x18x4xf32, #tpu.memory_space<vmem>>, vector<1x18x4xf32>,
    %c0_23 = arith.constant 0 : index
    %c0_24 = arith.constant 0 : index
    %c0_25 = arith.constant 0 : index
    %12 = vector.load %arg8[%c0_23, %c0_24, %c0_25] : memref<18x18x4xf32, #tpu.memory_space<vmem>>, vector<18x1x4xf32>
    tpu.vector_store %arg8[%c0_23, %c0_24, %c0_25], %9 {strides = array<i32>} : memref<18x18x4xf32, #tpu.memory_space<vmem>>, vector<18x1x4xf32>,
    %c0_26 = arith.constant 0 : index
    %c17_27 = arith.constant 17 : index
    %c0_28 = arith.constant 0 : index
    %13 = vector.load %arg8[%c0_26, %c17_27, %c0_28] : memref<18x18x4xf32, #tpu.memory_space<vmem>>, vector<18x1x4xf32>
    tpu.vector_store %arg8[%c0_26, %c17_27, %c0_28], %9 {strides = array<i32>} : memref<18x18x4xf32, #tpu.memory_space<vmem>>, vector<18x1x4xf32>,
    %c1 = arith.constant 1 : index
    %c1_29 = arith.constant 1 : index
    %c0_30 = arith.constant 0 : index
    %14 = vector.load %arg7[%c1, %c1_29, %c0_30] : memref<18x18x4xf32, #tpu.memory_space<vmem>>, vector<16x16x4xf32>
    tpu.vector_store %arg7[%c1, %c1_29, %c0_30], %1 {strides = array<i32>} : memref<18x18x4xf32, #tpu.memory_space<vmem>>, vector<16x16x4xf32>,
    %c0_31 = arith.constant 0 : index
    %c0_32 = arith.constant 0 : index
    %c0_33 = arith.constant 0 : index
    %15 = vector.load %arg7[%c0_31, %c0_32, %c0_33] : memref<18x18x4xf32, #tpu.memory_space<vmem>>, vector<18x18x4xf32>
    %16 = vector.extract_strided_slice %15 {offsets = [0, 0, 0], sizes = [16, 16, 4], strides = [1, 1, 1]} : vector<18x18x4xf32> to vector<16x16x4xf32>
    %c0_34 = arith.constant 0 : index
    %c0_35 = arith.constant 0 : index
    %c0_36 = arith.constant 0 : index
    %17 = vector.load %arg9[%c0_34, %c0_35, %c0_36] : memref<16x16x40xf32, #tpu.memory_space<vmem>>, vector<16x16x4xf32>
    tpu.vector_store %arg9[%c0_34, %c0_35, %c0_36], %16 {strides = array<i32>} : memref<16x16x40xf32, #tpu.memory_space<vmem>>, vector<16x16x4xf32>,
    %18 = vector.extract_strided_slice %15 {offsets = [0, 1, 0], sizes = [16, 16, 4], strides = [1, 1, 1]} : vector<18x18x4xf32> to vector<16x16x4xf32>
    %c0_37 = arith.constant 0 : index
    %c0_38 = arith.constant 0 : index
    %c4 = arith.constant 4 : index
    %19 = vector.load %arg9[%c0_37, %c0_38, %c4] : memref<16x16x40xf32, #tpu.memory_space<vmem>>, vector<16x16x4xf32>
    tpu.vector_store %arg9[%c0_37, %c0_38, %c4], %18 {strides = array<i32>} : memref<16x16x40xf32, #tpu.memory_space<vmem>>, vector<16x16x4xf32>,
    %20 = vector.extract_strided_slice %15 {offsets = [0, 2, 0], sizes = [16, 16, 4], strides = [1, 1, 1]} : vector<18x18x4xf32> to vector<16x16x4xf32>
    %c0_39 = arith.constant 0 : index
    %c0_40 = arith.constant 0 : index
    %c8 = arith.constant 8 : index
    %21 = vector.load %arg9[%c0_39, %c0_40, %c8] : memref<16x16x40xf32, #tpu.memory_space<vmem>>, vector<16x16x4xf32>
    tpu.vector_store %arg9[%c0_39, %c0_40, %c8], %20 {strides = array<i32>} : memref<16x16x40xf32, #tpu.memory_space<vmem>>, vector<16x16x4xf32>,
    %22 = vector.extract_strided_slice %15 {offsets = [1, 0, 0], sizes = [16, 16, 4], strides = [1, 1, 1]} : vector<18x18x4xf32> to vector<16x16x4xf32>
    %c0_41 = arith.constant 0 : index
    %c0_42 = arith.constant 0 : index
    %c12 = arith.constant 12 : index
    %23 = vector.load %arg9[%c0_41, %c0_42, %c12] : memref<16x16x40xf32, #tpu.memory_space<vmem>>, vector<16x16x4xf32>
    tpu.vector_store %arg9[%c0_41, %c0_42, %c12], %22 {strides = array<i32>} : memref<16x16x40xf32, #tpu.memory_space<vmem>>, vector<16x16x4xf32>,
    %24 = vector.extract_strided_slice %15 {offsets = [1, 1, 0], sizes = [16, 16, 4], strides = [1, 1, 1]} : vector<18x18x4xf32> to vector<16x16x4xf32>
    %c0_43 = arith.constant 0 : index
    %c0_44 = arith.constant 0 : index
    %c16 = arith.constant 16 : index
    %25 = vector.load %arg9[%c0_43, %c0_44, %c16] : memref<16x16x40xf32, #tpu.memory_space<vmem>>, vector<16x16x4xf32>
    tpu.vector_store %arg9[%c0_43, %c0_44, %c16], %24 {strides = array<i32>} : memref<16x16x40xf32, #tpu.memory_space<vmem>>, vector<16x16x4xf32>,
    %26 = vector.extract_strided_slice %15 {offsets = [1, 2, 0], sizes = [16, 16, 4], strides = [1, 1, 1]} : vector<18x18x4xf32> to vector<16x16x4xf32>
    %c0_45 = arith.constant 0 : index
    %c0_46 = arith.constant 0 : index
    %c20 = arith.constant 20 : index
    %27 = vector.load %arg9[%c0_45, %c0_46, %c20] : memref<16x16x40xf32, #tpu.memory_space<vmem>>, vector<16x16x4xf32>
    tpu.vector_store %arg9[%c0_45, %c0_46, %c20], %26 {strides = array<i32>} : memref<16x16x40xf32, #tpu.memory_space<vmem>>, vector<16x16x4xf32>,
    %28 = vector.extract_strided_slice %15 {offsets = [2, 0, 0], sizes = [16, 16, 4], strides = [1, 1, 1]} : vector<18x18x4xf32> to vector<16x16x4xf32>
    %c0_47 = arith.constant 0 : index
    %c0_48 = arith.constant 0 : index
    %c24 = arith.constant 24 : index
    %29 = vector.load %arg9[%c0_47, %c0_48, %c24] : memref<16x16x40xf32, #tpu.memory_space<vmem>>, vector<16x16x4xf32>
    tpu.vector_store %arg9[%c0_47, %c0_48, %c24], %28 {strides = array<i32>} : memref<16x16x40xf32, #tpu.memory_space<vmem>>, vector<16x16x4xf32>,
    %30 = vector.extract_strided_slice %15 {offsets = [2, 1, 0], sizes = [16, 16, 4], strides = [1, 1, 1]} : vector<18x18x4xf32> to vector<16x16x4xf32>
    %c0_49 = arith.constant 0 : index
    %c0_50 = arith.constant 0 : index
    %c28 = arith.constant 28 : index
    %31 = vector.load %arg9[%c0_49, %c0_50, %c28] : memref<16x16x40xf32, #tpu.memory_space<vmem>>, vector<16x16x4xf32>
    tpu.vector_store %arg9[%c0_49, %c0_50, %c28], %30 {strides = array<i32>} : memref<16x16x40xf32, #tpu.memory_space<vmem>>, vector<16x16x4xf32>,
    %32 = vector.extract_strided_slice %15 {offsets = [2, 2, 0], sizes = [16, 16, 4], strides = [1, 1, 1]} : vector<18x18x4xf32> to vector<16x16x4xf32>
    %c0_51 = arith.constant 0 : index
    %c0_52 = arith.constant 0 : index
    %c32 = arith.constant 32 : index
    %33 = vector.load %arg9[%c0_51, %c0_52, %c32] : memref<16x16x40xf32, #tpu.memory_space<vmem>>, vector<16x16x4xf32>
    tpu.vector_store %arg9[%c0_51, %c0_52, %c32], %32 {strides = array<i32>} : memref<16x16x40xf32, #tpu.memory_space<vmem>>, vector<16x16x4xf32>,
    %c0_53 = arith.constant 0 : index
    %c0_54 = arith.constant 0 : index
    %c0_55 = arith.constant 0 : index
    %34 = vector.load %arg9[%c0_53, %c0_54, %c0_55] : memref<16x16x40xf32, #tpu.memory_space<vmem>>, vector<16x16x36xf32>
    %35 = vector.shape_cast %34 : vector<16x16x36xf32> to vector<256x36xf32>
    %c0_56 = arith.constant 0 : index
    %c0_57 = arith.constant 0 : index
    %36 = vector.load %arg2[%c0_56, %c0_57] : memref<36x4xf32, #tpu.memory_space<vmem>>, vector<36x4xf32>
    %cst_58 = arith.constant dense<0.000000e+00> : vector<256x4xf32>
    %37 = tpu.matmul %35, %36, %cst_58 {dimension_numbers = #tpu.dot_dimension_numbers<[1], [0], [0], [1], [0, 0, 1, 1], [], []>} : vector<256x36xf32>, vector<36x4xf32>, vector<256x4xf32> -> vector<256x4xf32>
    %c0_59 = arith.constant 0 : index
    %c0_60 = arith.constant 0 : index
    %38 = vector.load %arg3[%c0_59, %c0_60] : memref<1x4xf32, #tpu.memory_space<vmem>>, vector<1x4xf32>
    %39 = vector.broadcast %38 : vector<1x4xf32> to vector<256x4xf32>
    %40 = arith.addf %37, %39 : vector<256x4xf32>
    %cst_61 = arith.constant 0.000000e+00 : f32
    %41 = vector.broadcast %cst_61 : f32 to vector<256x4xf32>
    %42 = arith.cmpf oge, %40, %41 : vector<256x4xf32>
    %cst_62 = arith.constant 1.000000e-01 : f32
    %43 = vector.broadcast %cst_62 : f32 to vector<256x4xf32>
    %44 = arith.mulf %43, %40 : vector<256x4xf32>
    %45 = arith.select %42, %40, %44 : vector<256x4xi1>, vector<256x4xf32>
    %46 = vector.shape_cast %45 : vector<256x4xf32> to vector<16x16x4xf32>
    %c1_63 = arith.constant 1 : index
    %c1_64 = arith.constant 1 : index
    %c0_65 = arith.constant 0 : index
    %47 = vector.load %arg8[%c1_63, %c1_64, %c0_65] : memref<18x18x4xf32, #tpu.memory_space<vmem>>, vector<16x16x4xf32>
    tpu.vector_store %arg8[%c1_63, %c1_64, %c0_65], %46 {strides = array<i32>} : memref<18x18x4xf32, #tpu.memory_space<vmem>>, vector<16x16x4xf32>,
    %c0_66 = arith.constant 0 : index
    %c0_67 = arith.constant 0 : index
    %c0_68 = arith.constant 0 : index
    %48 = vector.load %arg8[%c0_66, %c0_67, %c0_68] : memref<18x18x4xf32, #tpu.memory_space<vmem>>, vector<18x18x4xf32>
    %49 = vector.extract_strided_slice %48 {offsets = [0, 0, 0], sizes = [16, 16, 4], strides = [1, 1, 1]} : vector<18x18x4xf32> to vector<16x16x4xf32>
    %c0_69 = arith.constant 0 : index
    %c0_70 = arith.constant 0 : index
    %c0_71 = arith.constant 0 : index
    %50 = vector.load %arg9[%c0_69, %c0_70, %c0_71] : memref<16x16x40xf32, #tpu.memory_space<vmem>>, vector<16x16x4xf32>
    tpu.vector_store %arg9[%c0_69, %c0_70, %c0_71], %49 {strides = array<i32>} : memref<16x16x40xf32, #tpu.memory_space<vmem>>, vector<16x16x4xf32>,
    %51 = vector.extract_strided_slice %48 {offsets = [0, 1, 0], sizes = [16, 16, 4], strides = [1, 1, 1]} : vector<18x18x4xf32> to vector<16x16x4xf32>
    %c0_72 = arith.constant 0 : index
    %c0_73 = arith.constant 0 : index
    %c4_74 = arith.constant 4 : index
    %52 = vector.load %arg9[%c0_72, %c0_73, %c4_74] : memref<16x16x40xf32, #tpu.memory_space<vmem>>, vector<16x16x4xf32>
    tpu.vector_store %arg9[%c0_72, %c0_73, %c4_74], %51 {strides = array<i32>} : memref<16x16x40xf32, #tpu.memory_space<vmem>>, vector<16x16x4xf32>,
    %53 = vector.extract_strided_slice %48 {offsets = [0, 2, 0], sizes = [16, 16, 4], strides = [1, 1, 1]} : vector<18x18x4xf32> to vector<16x16x4xf32>
    %c0_75 = arith.constant 0 : index
    %c0_76 = arith.constant 0 : index
    %c8_77 = arith.constant 8 : index
    %54 = vector.load %arg9[%c0_75, %c0_76, %c8_77] : memref<16x16x40xf32, #tpu.memory_space<vmem>>, vector<16x16x4xf32>
    tpu.vector_store %arg9[%c0_75, %c0_76, %c8_77], %53 {strides = array<i32>} : memref<16x16x40xf32, #tpu.memory_space<vmem>>, vector<16x16x4xf32>,
    %55 = vector.extract_strided_slice %48 {offsets = [1, 0, 0], sizes = [16, 16, 4], strides = [1, 1, 1]} : vector<18x18x4xf32> to vector<16x16x4xf32>
    %c0_78 = arith.constant 0 : index
    %c0_79 = arith.constant 0 : index
    %c12_80 = arith.constant 12 : index
    %56 = vector.load %arg9[%c0_78, %c0_79, %c12_80] : memref<16x16x40xf32, #tpu.memory_space<vmem>>, vector<16x16x4xf32>
    tpu.vector_store %arg9[%c0_78, %c0_79, %c12_80], %55 {strides = array<i32>} : memref<16x16x40xf32, #tpu.memory_space<vmem>>, vector<16x16x4xf32>,
    %57 = vector.extract_strided_slice %48 {offsets = [1, 1, 0], sizes = [16, 16, 4], strides = [1, 1, 1]} : vector<18x18x4xf32> to vector<16x16x4xf32>
    %c0_81 = arith.constant 0 : index
    %c0_82 = arith.constant 0 : index
    %c16_83 = arith.constant 16 : index
    %58 = vector.load %arg9[%c0_81, %c0_82, %c16_83] : memref<16x16x40xf32, #tpu.memory_space<vmem>>, vector<16x16x4xf32>
    tpu.vector_store %arg9[%c0_81, %c0_82, %c16_83], %57 {strides = array<i32>} : memref<16x16x40xf32, #tpu.memory_space<vmem>>, vector<16x16x4xf32>,
    %59 = vector.extract_strided_slice %48 {offsets = [1, 2, 0], sizes = [16, 16, 4], strides = [1, 1, 1]} : vector<18x18x4xf32> to vector<16x16x4xf32>
    %c0_84 = arith.constant 0 : index
    %c0_85 = arith.constant 0 : index
    %c20_86 = arith.constant 20 : index
    %60 = vector.load %arg9[%c0_84, %c0_85, %c20_86] : memref<16x16x40xf32, #tpu.memory_space<vmem>>, vector<16x16x4xf32>
    tpu.vector_store %arg9[%c0_84, %c0_85, %c20_86], %59 {strides = array<i32>} : memref<16x16x40xf32, #tpu.memory_space<vmem>>, vector<16x16x4xf32>,
    %61 = vector.extract_strided_slice %48 {offsets = [2, 0, 0], sizes = [16, 16, 4], strides = [1, 1, 1]} : vector<18x18x4xf32> to vector<16x16x4xf32>
    %c0_87 = arith.constant 0 : index
    %c0_88 = arith.constant 0 : index
    %c24_89 = arith.constant 24 : index
    %62 = vector.load %arg9[%c0_87, %c0_88, %c24_89] : memref<16x16x40xf32, #tpu.memory_space<vmem>>, vector<16x16x4xf32>
    tpu.vector_store %arg9[%c0_87, %c0_88, %c24_89], %61 {strides = array<i32>} : memref<16x16x40xf32, #tpu.memory_space<vmem>>, vector<16x16x4xf32>,
    %63 = vector.extract_strided_slice %48 {offsets = [2, 1, 0], sizes = [16, 16, 4], strides = [1, 1, 1]} : vector<18x18x4xf32> to vector<16x16x4xf32>
    %c0_90 = arith.constant 0 : index
    %c0_91 = arith.constant 0 : index
    %c28_92 = arith.constant 28 : index
    %64 = vector.load %arg9[%c0_90, %c0_91, %c28_92] : memref<16x16x40xf32, #tpu.memory_space<vmem>>, vector<16x16x4xf32>
    tpu.vector_store %arg9[%c0_90, %c0_91, %c28_92], %63 {strides = array<i32>} : memref<16x16x40xf32, #tpu.memory_space<vmem>>, vector<16x16x4xf32>,
    %65 = vector.extract_strided_slice %48 {offsets = [2, 2, 0], sizes = [16, 16, 4], strides = [1, 1, 1]} : vector<18x18x4xf32> to vector<16x16x4xf32>
    %c0_93 = arith.constant 0 : index
    %c0_94 = arith.constant 0 : index
    %c32_95 = arith.constant 32 : index
    %66 = vector.load %arg9[%c0_93, %c0_94, %c32_95] : memref<16x16x40xf32, #tpu.memory_space<vmem>>, vector<16x16x4xf32>
    tpu.vector_store %arg9[%c0_93, %c0_94, %c32_95], %65 {strides = array<i32>} : memref<16x16x40xf32, #tpu.memory_space<vmem>>, vector<16x16x4xf32>,
    %c0_96 = arith.constant 0 : index
    %c0_97 = arith.constant 0 : index
    %c36 = arith.constant 36 : index
    %67 = vector.load %arg9[%c0_96, %c0_97, %c36] : memref<16x16x40xf32, #tpu.memory_space<vmem>>, vector<16x16x4xf32>
    tpu.vector_store %arg9[%c0_96, %c0_97, %c36], %1 {strides = array<i32>} : memref<16x16x40xf32, #tpu.memory_space<vmem>>, vector<16x16x4xf32>,
    %c0_98 = arith.constant 0 : index
    %c0_99 = arith.constant 0 : index
    %c0_100 = arith.constant 0 : index
    %68 = vector.load %arg9[%c0_98, %c0_99, %c0_100] : memref<16x16x40xf32, #tpu.memory_space<vmem>>, vector<16x16x40xf32>
    %69 = vector.shape_cast %68 : vector<16x16x40xf32> to vector<256x40xf32>
    %c0_101 = arith.constant 0 : index
    %c0_102 = arith.constant 0 : index
    %70 = vector.load %arg4[%c0_101, %c0_102] : memref<40x4xf32, #tpu.memory_space<vmem>>, vector<40x4xf32>
    %cst_103 = arith.constant dense<0.000000e+00> : vector<256x4xf32>
    %71 = tpu.matmul %69, %70, %cst_103 {dimension_numbers = #tpu.dot_dimension_numbers<[1], [0], [0], [1], [0, 0, 1, 1], [], []>} : vector<256x40xf32>, vector<40x4xf32>, vector<256x4xf32> -> vector<256x4xf32>
    %c0_104 = arith.constant 0 : index
    %c0_105 = arith.constant 0 : index
    %72 = vector.load %arg5[%c0_104, %c0_105] : memref<1x4xf32, #tpu.memory_space<vmem>>, vector<1x4xf32>
    %73 = vector.broadcast %72 : vector<1x4xf32> to vector<256x4xf32>
    %74 = arith.addf %71, %73 : vector<256x4xf32>
    %75 = tpu.transpose %74, [1, 0] : vector<256x4xf32> -> vector<4x256xf32>
    %c0_106 = arith.constant 0 : index
    %c0_107 = arith.constant 0 : index
    %c0_108 = arith.constant 0 : index
    %76 = vector.load %arg6[%c0_106, %c0_107, %c0_108] : memref<1x4x256xf32, #tpu.memory_space<vmem>>, vector<1x4x256xf32>
    %77 = vector.shape_cast %76 : vector<1x4x256xf32> to vector<4x256xf32>
    %78 = vector.shape_cast %75 : vector<4x256xf32> to vector<1x4x256xf32>
    tpu.vector_store %arg6[%c0_106, %c0_107, %c0_108], %78 {strides = array<i32>} : memref<1x4x256xf32, #tpu.memory_space<vmem>>, vector<1x4x256xf32>,
    return
  }
  func.func @transform_0(%arg0: i32) -> (i32, i32, i32, i32) {
    %c0_i32 = arith.constant 0 : i32
    %c0_i32_0 = arith.constant 0 : i32
    %c0_i32_1 = arith.constant 0 : i32
    %c0_i32_2 = arith.constant 0 : i32
    return %arg0, %c0_i32, %c0_i32_0, %c0_i32_1 : i32, i32, i32, i32
  }
  func.func @transform_1(%arg0: i32) -> (i32, i32) {
    %c0_i32 = arith.constant 0 : i32
    %c0_i32_0 = arith.constant 0 : i32
    %c0_i32_1 = arith.constant 0 : i32
    return %c0_i32, %c0_i32_0 : i32, i32
  }
  func.func @transform_2(%arg0: i32) -> (i32, i32) {
    %c0_i32 = arith.constant 0 : i32
    %c0_i32_0 = arith.constant 0 : i32
    %c0_i32_1 = arith.constant 0 : i32
    return %c0_i32, %c0_i32_0 : i32, i32
  }
  func.func @transform_3(%arg0: i32) -> (i32, i32) {
    %c0_i32 = arith.constant 0 : i32
    %c0_i32_0 = arith.constant 0 : i32
    %c0_i32_1 = arith.constant 0 : i32
    return %c0_i32, %c0_i32_0 : i32, i32
  }
  func.func @transform_4(%arg0: i32) -> (i32, i32) {
    %c0_i32 = arith.constant 0 : i32
    %c0_i32_0 = arith.constant 0 : i32
    %c0_i32_1 = arith.constant 0 : i32
    return %c0_i32, %c0_i32_0 : i32, i32
  }
  func.func @transform_5(%arg0: i32) -> (i32, i32, i32) {
    %c0_i32 = arith.constant 0 : i32
    %c0_i32_0 = arith.constant 0 : i32
    %c0_i32_1 = arith.constant 0 : i32
    return %arg0, %c0_i32, %c0_i32_0 : i32, i32, i32
  }
}

</mosaic_0001>

<bundles_post_ra>
// kernel: tpu_custom_call.1
= control target key start
LH: loop header
LB: loop body
LE: loop exit
PB: predicated region body
PF: predicated region fallthrough
CT: control target
= control target key end

     0   :  { %10 = vsyncpa [#allocation6], 0  ;;  %s8346_s0 = inlined_call_operand.vmem [shape: f32[2,16,16,4], index: 0, kind: input, shape index: {}]   ;;  %s8347_s1 = inlined_call_operand.vmem [shape: f32[36,4], index: 1, kind: input, shape index: {}]   ;;  %s8348_s2 = inlined_call_operand.vmem [shape: f32[1,4], index: 2, kind: input, shape index: {}]   ;;  %s8349_s3 = inlined_call_operand.vmem [shape: f32[40,4], index: 3, kind: input, shape index: {}]   ;;  %s8350_s4 = inlined_call_operand.vmem [shape: f32[1,4], index: 4, kind: input, shape index: {}]   ;;  %s8351_s5 = inlined_call_operand.hbm [shape: f32[2,4,256], index: 5, kind: output, shape index: {}]  }
   0x1   :  { %12 = vsyncpa [#allocation6 + $0x1], 0  ;;  %s5139_s18 = smov 0   ;;  %s5141_s19 = smov 0  }
   0x2   :  { %s5143_s20 = smov 0   ;;  %s5145_s21 = smov 0  }
   0x3 LB: > { %s5160_s22 = sadd.s32 4294967295, %s5096_s21   ;;  %s4662_s23 = sadd.s32 4294967294, %s5096_s21   ;;  %s5096_s21 = sphi %s5145_s21, %s8565_s21   ;;  %s5092_s20 = sphi %s5143_s20, %s8564_s20   ;;  %s5088_s19 = sphi %s5141_s19, %s8563_s19   ;;  %s5084_s18 = sphi %s5139_s18, %s8562_s18  }
   0x4   : > { %s5164_s24 = sadd.s32 1, %s5096_s21   ;;  %s135_s25 = sadd.s32 1, %s5092_s20 }
   0x5   : > { %s132_s26 = ssub.s32 %s5096_s21, %s5164_s24  ;;  %p145_p0 = scmp.ne.s32.totalorder %s5092_s20, %s5088_s19 }
   0x6   : > { %p133_p1 = scmp.eq.s32.totalorder %s132_s26, 0  ;;  %p146_p2 = scmp.eq.s32.totalorder %s5160_s22, 1 }
   0x7   : > { %p151_p3 = scmp.ne.s32.totalorder %s5088_s19, %s5084_s18  ;;  %p152_p4 = scmp.eq.s32.totalorder %s4662_s23, 1 }
   0x8   : > { %s5175_s27 = scalar_select %p133_p1, %s5092_s20, %s135_s25  }
   0x9   : > { %p5177_p5 = por %p146_p2, %p145_p0  ;;  %p5181_p6 = por %p152_p4, %p151_p3 }
   0xa   : > { %p4665_p7 = scmp.ge.s32.totalorder %s5096_s21, 1  ;;  %p190_p8 = scmp.lt.s32.totalorder %s5096_s21, 3 }
   0xc   : > { %p191_p9 = pnand %p4665_p7, %p190_p8 }
   0xe   : > { %194 = sbr.rel (%p191_p9) target bundleno = 2213 (0x8a5), region = 40 }
  0x15   : > { %vm255_vm0 = vcmask 31744   ;;  %vm258_vm1 = vcmask 25600   ;;  %vm264_vm2 = vcmask 24576   ;;  %p218_p10 = scmp.lt.s32.totalorder %s5160_s22, 1  ;;  %v5098_v0 = vmov 0.0   ;;  %s5099_s10 = smov 4  }
  0x16   : > { %257 = vst.msk [vmem:[#allocation2 + $0x8] sm:$0xff] %vm255_vm0, %v5098_v0  ;;  %256 = vst.msk [vmem:[#allocation2] sm:$0xff] %vm255_vm0, %v5098_v0  ;;  %s5100_s11 = smov 8   ;;  %vm657_vm3 = vcmask 64544   ;;  %vm659_vm4 = vcmask 57376   ;;  %vm655_vm5 = vcmask 64545  }
  0x17   : > { %261 = vst.msk [vmem:[#allocation2 + $0x198] sm:$0xff] %vm255_vm0, %v5098_v0  ;;  %262 = vst.msk [vmem:[#allocation2 + $0x1a0] sm:$0xff] %vm255_vm0, %v5098_v0  ;;  %s219_s30 = scalar_select %p218_p10, %s5160_s22, 1  ;;  %vm850_vm6 = vcmask 97346   ;;  %vm852_vm7 = vcmask 97344   ;;  %vm854_vm8 = vcmask 91200  }
  0x18   : > { %301 = vst.msk [vmem:[#allocation3] sm:$0xff] %vm255_vm0, %v5098_v0  ;;  %302 = vst.msk [vmem:[#allocation3 + $0x8] sm:$0xff] %vm255_vm0, %v5098_v0  ;;  %s5101_s12 = smov 12   ;;  %s5102_s13 = smov 16   ;;  %vm999_vm9 = vcmask 130144   ;;  %vm1177_vm10 = vcmask 162945  }
  0x19   : > { %305 = vst.msk [vmem:[#allocation3 + $0x198] sm:$0xff] %vm255_vm0, %v5098_v0  ;;  %306 = vst.msk [vmem:[#allocation3 + $0x1a0] sm:$0xff] %vm255_vm0, %v5098_v0  ;;  %s4741_s6 = sshll.u32 %s219_s30, 8  ;;  %s5103_s14 = smov 20   ;;  %vm1179_vm11 = vcmask 162944   ;;  %vm8378_vm12 = vcmask 155776  }
  0x1a   : > { %259 = vst.msk [vmem:[#allocation2 + $0x10] sm:$0x3] %vm258_vm1, %v5098_v0  ;;  %263 = vst.msk [vmem:[#allocation2 + $0x1a8] sm:$0x3] %vm258_vm1, %v5098_v0  ;;  %s5362_s9 = scalar_lea.vmem %s8346_s0, %s4741_s6  ;;  %s5104_s15 = smov 24   ;;  %vm8377_vm13 = vcmask 195746  }
  0x1b   : > { %266 = vst.msk [vmem:[#allocation2 + $0x18] sm:$0x1] %vm264_vm2, %v5098_v0  ;;  %267 = vst.msk [vmem:[#allocation2 + $0x30] sm:$0x1] %vm264_vm2, %v5098_v0  ;;  %v5365_v1 = vld [vmem:[%s5362_s9] sm:$0xff]  ;;  %v5368_v2 = vld [vmem:[%s5362_s9 + $0x8] sm:$0xff] }
  0x1c   : > { %268 = vst.msk [vmem:[#allocation2 + $0x48] sm:$0x1] %vm264_vm2, %v5098_v0  ;;  %269 = vst.msk [vmem:[#allocation2 + $0x60] sm:$0x1] %vm264_vm2, %v5098_v0  ;;  %v5371_v3 = vld [vmem:[%s5362_s9 + $0x10] sm:$0xff]  ;;  %v5380_v4 = vld [vmem:[%s5362_s9 + $0x18] sm:$0xff] }
  0x1d   : > { %270 = vst.msk [vmem:[#allocation2 + $0x78] sm:$0x1] %vm264_vm2, %v5098_v0  ;;  %271 = vst.msk [vmem:[#allocation2 + $0x90] sm:$0x1] %vm264_vm2, %v5098_v0  ;;  %v5383_v5 = vld [vmem:[%s5362_s9 + $0x20] sm:$0xff]  ;;  %v5386_v6 = vld [vmem:[%s5362_s9 + $0x28] sm:$0xff] }
  0x1e   : > { %272 = vst.msk [vmem:[#allocation2 + $0xa8] sm:$0x1] %vm264_vm2, %v5098_v0  ;;  %273 = vst.msk [vmem:[#allocation2 + $0xc0] sm:$0x1] %vm264_vm2, %v5098_v0  ;;  %v5388_v7 = vld [vmem:[#allocation2 + $0x8] sm:$0xff]  ;;  %v5397_v8 = vld [vmem:[%s5362_s9 + $0x30] sm:$0xff] }
  0x1f   : > { %274 = vst.msk [vmem:[#allocation2 + $0xd8] sm:$0x1] %vm264_vm2, %v5098_v0  ;;  %275 = vst.msk [vmem:[#allocation2 + $0xf0] sm:$0x1] %vm264_vm2, %v5098_v0  ;;  %v5400_v9 = vld [vmem:[%s5362_s9 + $0x38] sm:$0xff]  ;;  %513 = vrot.lane.b32.xlu0 %v5388_v7, %s5099_s10  ;;  %v5415_v12 = vld [vmem:[%s5362_s9 + $0x40] sm:$0xff] }
  0x20   : > { %276 = vst.msk [vmem:[#allocation2 + $0x108] sm:$0x1] %vm264_vm2, %v5098_v0  ;;  %277 = vst.msk [vmem:[#allocation2 + $0x120] sm:$0x1] %vm264_vm2, %v5098_v0  ;;  %v5424_v13 = vld [vmem:[%s5362_s9 + $0x48] sm:$0xff]  ;;  %v5427_v14 = vld [vmem:[%s5362_s9 + $0x50] sm:$0xff] }
  0x21   : > { %278 = vst.msk [vmem:[#allocation2 + $0x138] sm:$0x1] %vm264_vm2, %v5098_v0  ;;  %279 = vst.msk [vmem:[#allocation2 + $0x150] sm:$0x1] %vm264_vm2, %v5098_v0  ;;  %v5430_v15 = vld [vmem:[%s5362_s9 + $0x58] sm:$0xff]  ;;  %v5439_v16 = vld [vmem:[%s5362_s9 + $0x60] sm:$0xff] }
  0x22   : > { %280 = vst.msk [vmem:[#allocation2 + $0x168] sm:$0x1] %vm264_vm2, %v5098_v0  ;;  %281 = vst.msk [vmem:[#allocation2 + $0x180] sm:$0x1] %vm264_vm2, %v5098_v0  ;;  %v5442_v17 = vld [vmem:[%s5362_s9 + $0x68] sm:$0xff]  ;;  %v5445_v18 = vld [vmem:[%s5362_s9 + $0x70] sm:$0xff] }
  0x23   : > { %284 = vst.msk [vmem:[#allocation2 + $0x29] sm:$0x1] %vm264_vm2, %v5098_v0  ;;  %285 = vst.msk [vmem:[#allocation2 + $0x41] sm:$0x1] %vm264_vm2, %v5098_v0  ;;  %v5454_v19 = vld [vmem:[%s5362_s9 + $0x78] sm:$0xff]  ;;  %v5457_v20 = vld [vmem:[%s5362_s9 + $0x80] sm:$0xff] }
  0x24   : > { %286 = vst.msk [vmem:[#allocation2 + $0x59] sm:$0x1] %vm264_vm2, %v5098_v0  ;;  %287 = vst.msk [vmem:[#allocation2 + $0x71] sm:$0x1] %vm264_vm2, %v5098_v0  ;;  %v5460_v21 = vld [vmem:[%s5362_s9 + $0x88] sm:$0xff]  ;;  %v5471_v22 = vld [vmem:[%s5362_s9 + $0x90] sm:$0xff] }
  0x25   : > { %288 = vst.msk [vmem:[#allocation2 + $0x89] sm:$0x1] %vm264_vm2, %v5098_v0  ;;  %289 = vst.msk [vmem:[#allocation2 + $0xa1] sm:$0x1] %vm264_vm2, %v5098_v0  ;;  %v5474_v23 = vld [vmem:[%s5362_s9 + $0x98] sm:$0xff]  ;;  %v5477_v24 = vld [vmem:[%s5362_s9 + $0xa0] sm:$0xff] }
  0x26   : > { %290 = vst.msk [vmem:[#allocation2 + $0xb9] sm:$0x1] %vm264_vm2, %v5098_v0  ;;  %291 = vst.msk [vmem:[#allocation2 + $0xd1] sm:$0x1] %vm264_vm2, %v5098_v0  ;;  %v5582_v48 = vld [vmem:[%s5362_s9 + $0xa8] sm:$0xff]  ;;  %v5585_v49 = vld [vmem:[%s5362_s9 + $0xb0] sm:$0xff] }
  0x27   : > { %292 = vst.msk [vmem:[#allocation2 + $0xe9] sm:$0x1] %vm264_vm2, %v5098_v0  ;;  %293 = vst.msk [vmem:[#allocation2 + $0x101] sm:$0x1] %vm264_vm2, %v5098_v0  ;;  %v5596_v50 = vld [vmem:[%s5362_s9 + $0xb8] sm:$0xff]  ;;  %v5599_v51 = vld [vmem:[%s5362_s9 + $0xc0] sm:$0xff] }
  0x28   : > { %294 = vst.msk [vmem:[#allocation2 + $0x119] sm:$0x1] %vm264_vm2, %v5098_v0  ;;  %295 = vst.msk [vmem:[#allocation2 + $0x131] sm:$0x1] %vm264_vm2, %v5098_v0  ;;  %v5602_v52 = vld [vmem:[%s5362_s9 + $0xc8] sm:$0xff]  ;;  %v5611_v53 = vld [vmem:[%s5362_s9 + $0xd0] sm:$0xff] }
  0x29   : > { %296 = vst.msk [vmem:[#allocation2 + $0x149] sm:$0x1] %vm264_vm2, %v5098_v0  ;;  %297 = vst.msk [vmem:[#allocation2 + $0x161] sm:$0x1] %vm264_vm2, %v5098_v0  ;;  %v5614_v54 = vld [vmem:[%s5362_s9 + $0xd8] sm:$0xff]  ;;  %v5617_v55 = vld [vmem:[%s5362_s9 + $0xe0] sm:$0xff] }
  0x2a   : > { %298 = vst.msk [vmem:[#allocation2 + $0x179] sm:$0x1] %vm264_vm2, %v5098_v0  ;;  %299 = vst.msk [vmem:[#allocation2 + $0x191] sm:$0x1] %vm264_vm2, %v5098_v0  ;;  %v5628_v56 = vld [vmem:[%s5362_s9 + $0xe8] sm:$0xff]  ;;  %vm8375_vm14 = vcmask 195744  }
  0x2b   : > { %303 = vst.msk [vmem:[#allocation3 + $0x10] sm:$0x3] %vm258_vm1, %v5098_v0  ;;  %307 = vst.msk [vmem:[#allocation3 + $0x1a8] sm:$0x3] %vm258_vm1, %v5098_v0  ;;  %vm8374_vm15 = vcmask 189600   ;;  %s5105_s16 = smov 28  }
  0x2c   : > { %309 = vst.msk [vmem:[#allocation3 + $0x18] sm:$0x1] %vm264_vm2, %v5098_v0  ;;  %310 = vst.msk [vmem:[#allocation3 + $0x30] sm:$0x1] %vm264_vm2, %v5098_v0  ;;  %vm8376_vm1 = vcmask 228544   ;;  %s5106_s23 = smov 32  }
  0x2d   : > { %311 = vst.msk [vmem:[#allocation3 + $0x48] sm:$0x1] %vm264_vm2, %v5098_v0  ;;  %312 = vst.msk [vmem:[#allocation3 + $0x60] sm:$0x1] %vm264_vm2, %v5098_v0  ;;  %s5107_s17 = smov 36   ;;  %s4742_s26 = sshll.u32 %s5160_s22, 7 }
  0x2e   : > { %313 = vst.msk [vmem:[#allocation3 + $0x78] sm:$0x1] %vm264_vm2, %v5098_v0  ;;  %314 = vst.msk [vmem:[#allocation3 + $0x90] sm:$0x1] %vm264_vm2, %v5098_v0  ;;  %s5108_s22 = smov [#allocation5]  }
  0x2f   : > { %315 = vst.msk [vmem:[#allocation3 + $0xa8] sm:$0x1] %vm264_vm2, %v5098_v0  ;;  %316 = vst.msk [vmem:[#allocation3 + $0xc0] sm:$0x1] %vm264_vm2, %v5098_v0  ;;  %s5038_s7 = sshll.u32 %s5108_s22, 4  ;;  %s5039_s7 = int_to_ptr.vmem [resolvable:$false] %s5038_s7 }
  0x30   : > { %317 = vst.msk [vmem:[#allocation3 + $0xd8] sm:$0x1] %vm264_vm2, %v5098_v0  ;;  %318 = vst.msk [vmem:[#allocation3 + $0xf0] sm:$0x1] %vm264_vm2, %v5098_v0  ;;  %s5040_s8 = scalar_lea.vmem %s5039_s7, 256 }
  0x31   : > { %319 = vst.msk [vmem:[#allocation3 + $0x108] sm:$0x1] %vm264_vm2, %v5098_v0  ;;  %320 = vst.msk [vmem:[#allocation3 + $0x120] sm:$0x1] %vm264_vm2, %v5098_v0 }
  0x32   : > { %321 = vst.msk [vmem:[#allocation3 + $0x138] sm:$0x1] %vm264_vm2, %v5098_v0  ;;  %322 = vst.msk [vmem:[#allocation3 + $0x150] sm:$0x1] %vm264_vm2, %v5098_v0 }
  0x33   : > { %323 = vst.msk [vmem:[#allocation3 + $0x168] sm:$0x1] %vm264_vm2, %v5098_v0  ;;  %324 = vst.msk [vmem:[#allocation3 + $0x180] sm:$0x1] %vm264_vm2, %v5098_v0 }
  0x34   : > { %327 = vst.msk [vmem:[#allocation3 + $0x29] sm:$0x1] %vm264_vm2, %v5098_v0  ;;  %328 = vst.msk [vmem:[#allocation3 + $0x41] sm:$0x1] %vm264_vm2, %v5098_v0 }
  0x35   : > { %329 = vst.msk [vmem:[#allocation3 + $0x59] sm:$0x1] %vm264_vm2, %v5098_v0  ;;  %330 = vst.msk [vmem:[#allocation3 + $0x71] sm:$0x1] %vm264_vm2, %v5098_v0 }
  0x36   : > { %331 = vst.msk [vmem:[#allocation3 + $0x89] sm:$0x1] %vm264_vm2, %v5098_v0  ;;  %332 = vst.msk [vmem:[#allocation3 + $0xa1] sm:$0x1] %vm264_vm2, %v5098_v0 }
  0x37   : > { %333 = vst.msk [vmem:[#allocation3 + $0xb9] sm:$0x1] %vm264_vm2, %v5098_v0  ;;  %334 = vst.msk [vmem:[#allocation3 + $0xd1] sm:$0x1] %vm264_vm2, %v5098_v0 }
  0x38   : > { %335 = vst.msk [vmem:[#allocation3 + $0xe9] sm:$0x1] %vm264_vm2, %v5098_v0  ;;  %336 = vst.msk [vmem:[#allocation3 + $0x101] sm:$0x1] %vm264_vm2, %v5098_v0 }
  0x39   : > { %337 = vst.msk [vmem:[#allocation3 + $0x119] sm:$0x1] %vm264_vm2, %v5098_v0  ;;  %338 = vst.msk [vmem:[#allocation3 + $0x131] sm:$0x1] %vm264_vm2, %v5098_v0 }
  0x3a   : > { %339 = vst.msk [vmem:[#allocation3 + $0x149] sm:$0x1] %vm264_vm2, %v5098_v0  ;;  %340 = vst.msk [vmem:[#allocation3 + $0x161] sm:$0x1] %vm264_vm2, %v5098_v0 }
  0x3b   : > { %341 = vst.msk [vmem:[#allocation3 + $0x179] sm:$0x1] %vm264_vm2, %v5098_v0  ;;  %342 = vst.msk [vmem:[#allocation3 + $0x191] sm:$0x1] %vm264_vm2, %v5098_v0 }
  0x3c   : > { %283 = vst.msk [vmem:[#allocation2 + $0x11] sm:$0x1] %vm264_vm2, %v5098_v0  ;;  %265 = vst.msk [vmem:[#allocation2] sm:$0x1] %vm264_vm2, %v5098_v0 }
  0x3d   : > { %282 = vst.msk [vmem:[#allocation2 + $0x198] sm:$0x1] %vm264_vm2, %v5098_v0  ;;  %308 = vst.msk [vmem:[#allocation3] sm:$0x1] %vm264_vm2, %v5098_v0 }
  0x3e   : > { %325 = vst.msk [vmem:[#allocation3 + $0x198] sm:$0x1] %vm264_vm2, %v5098_v0  ;;  %300 = vst.msk [vmem:[#allocation2 + $0x1a9] sm:$0x1] %vm264_vm2, %v5098_v0 }
  0x3f   : > { %326 = vst.msk [vmem:[#allocation3 + $0x11] sm:$0x1] %vm264_vm2, %v5098_v0  ;;  %343 = vst.msk [vmem:[#allocation3 + $0x1a9] sm:$0x1] %vm264_vm2, %v5098_v0  ;;  %vm2086_vm2 = vcmask 1043456  }
  0x40   : > { %345 = vst.msk [vmem:[#allocation2 + $0x19] sm:$0xff] %vm255_vm0, %v5365_v1  ;;  %346 = vst.msk [vmem:[#allocation2 + $0x21] sm:$0xff] %vm255_vm0, %v5368_v2 }
  0x41   : > { %347 = vst.msk [vmem:[#allocation2 + $0x31] sm:$0xff] %vm255_vm0, %v5371_v3  ;;  %348 = vst.msk [vmem:[#allocation2 + $0x39] sm:$0xff] %vm255_vm0, %v5380_v4 }
  0x42   : > { %349 = vst.msk [vmem:[#allocation2 + $0x49] sm:$0xff] %vm255_vm0, %v5383_v5  ;;  %350 = vst.msk [vmem:[#allocation2 + $0x51] sm:$0xff] %vm255_vm0, %v5386_v6 }
  0x43   : > { %432 = vst.msk [vmem:[#allocation4 + $0x8] sm:$0xff] %vm255_vm0, %v5388_v7  ;;  %v5406_v10 = vld [vmem:[#allocation2 + $0x10] sm:$0x3]  ;;  %v5408_v11 = vld [vmem:[#allocation2] sm:$0xff]  ;;  %351 = vst.msk [vmem:[#allocation2 + $0x61] sm:$0xff] %vm255_vm0, %v5397_v8 }
  0x44   : > { %352 = vst.msk [vmem:[#allocation2 + $0x69] sm:$0xff] %vm255_vm0, %v5400_v9  ;;  %515 = vrot.lane.b32.xlu1 %v5406_v10, %s5099_s10  ;;  %431 = vst.msk [vmem:[#allocation4] sm:$0xff] %vm255_vm0, %v5408_v11  ;;  %511 = vrot.lane.b32.xlu0 %v5408_v11, %s5099_s10 }
  0x45   : > { %353 = vst.msk [vmem:[#allocation2 + $0x79] sm:$0xff] %vm255_vm0, %v5415_v12  ;;  %8385 = vst [vmem:[#allocation8_spill] sm:$0xff] %v5427_v14 }
  0x46   : > { %8386 = vst [vmem:[#allocation9_spill] sm:$0xff] %v5430_v15  ;;  %354 = vst.msk [vmem:[#allocation2 + $0x81] sm:$0xff] %vm255_vm0, %v5424_v13 }
  0x47   : > { %355 = vst.msk [vmem:[#allocation2 + $0x91] sm:$0xff] %vm255_vm0, %v5427_v14  ;;  %356 = vst.msk [vmem:[#allocation2 + $0x99] sm:$0xff] %vm255_vm0, %v5430_v15  ;;  %v5479_v25 = vld [vmem:[#allocation2 + $0x18] sm:$0xff]  ;;  %v5481_v26 = vld [vmem:[#allocation2 + $0x20] sm:$0xff] }
  0x48   : > { %8387 = vst [vmem:[#allocation10_spill] sm:$0xff] %v5439_v16  ;;  %8388 = vst [vmem:[#allocation11_spill] sm:$0xff] %v5442_v17  ;;  %517 = vrot.lane.b32.xlu1 %v5479_v25, %s5099_s10  ;;  %v5495_v27 = vld [vmem:[#allocation2 + $0x30] sm:$0xff]  ;;  %v5497_v28 = vld [vmem:[#allocation2 + $0x38] sm:$0xff]  ;;  %519 = vrot.lane.b32.xlu0 %v5481_v26, %s5099_s10 }
  0x49   : > { %8389 = vst [vmem:[#allocation12_spill] sm:$0xff] %v5445_v18  ;;  %357 = vst.msk [vmem:[#allocation2 + $0xa9] sm:$0xff] %vm255_vm0, %v5439_v16  ;;  %v5499_v29 = vld [vmem:[#allocation2 + $0x28] sm:$0x3]  ;;  %v5507_v31 = vld [vmem:[#allocation2 + $0x50] sm:$0xff] }
  0x4a   : > { %358 = vst.msk [vmem:[#allocation2 + $0xb1] sm:$0xff] %vm255_vm0, %v5442_v17  ;;  %359 = vst.msk [vmem:[#allocation2 + $0xc1] sm:$0xff] %vm255_vm0, %v5445_v18  ;;  %v5505_v30 = vld [vmem:[#allocation2 + $0x48] sm:$0xff]  ;;  %v5515_v32 = vld [vmem:[#allocation2 + $0x60] sm:$0xff] }
  0x4b   : > { %8390 = vst [vmem:[#allocation13_spill] sm:$0xff] %v5454_v19  ;;  %8391 = vst [vmem:[#allocation14_spill] sm:$0xff] %v5457_v20  ;;  %v5517_v33 = vld [vmem:[#allocation2 + $0x68] sm:$0xff]  ;;  %v5555_v42 = vld [vmem:[#allocation2 + $0x40] sm:$0x3] }
  0x4c   : > { %8392 = vst [vmem:[#allocation15_spill] sm:$0xff] %v5460_v21  ;;  %360 = vst.msk [vmem:[#allocation2 + $0xc9] sm:$0xff] %vm255_vm0, %v5454_v19  ;;  %v5523_v34 = vld [vmem:[#allocation2 + $0x78] sm:$0xff]  ;;  %521 = vrot.lane.b32.xlu1 %v5499_v29, %s5099_s10  ;;  %523 = vrot.lane.b32.xlu0 %v5495_v27, %s5099_s10  ;;  %v5652_v62 = vld [vmem:[#allocation2 + $0x70] sm:$0x3] }
  0x4d   : > { %361 = vst.msk [vmem:[#allocation2 + $0xd9] sm:$0xff] %vm255_vm0, %v5457_v20  ;;  %362 = vst.msk [vmem:[#allocation2 + $0xe1] sm:$0xff] %vm255_vm0, %v5460_v21  ;;  %v5525_v35 = vld [vmem:[#allocation2 + $0x80] sm:$0xff]  ;;  %v5630_v57 = vld [vmem:[#allocation2 + $0x58] sm:$0x3] }
  0x4e   : > { %8393 = vst [vmem:[#allocation16_spill] sm:$0xff] %v5471_v22  ;;  %8394 = vst [vmem:[#allocation17_spill] sm:$0xff] %v5474_v23  ;;  %v5533_v36 = vld [vmem:[#allocation2 + $0x90] sm:$0xff]  ;;  %v5535_v37 = vld [vmem:[#allocation2 + $0x98] sm:$0xff] }
  0x4f   : > { %8395 = vst [vmem:[#allocation18_spill] sm:$0xff] %v5477_v24  ;;  %363 = vst.msk [vmem:[#allocation2 + $0xf1] sm:$0xff] %vm255_vm0, %v5471_v22  ;;  %v5800_v19 = vld [vmem:[%s5362_s9 + $0xf8] sm:$0xff] }
  0x50   : > { %364 = vst.msk [vmem:[#allocation2 + $0xf9] sm:$0xff] %vm255_vm0, %v5474_v23  ;;  %365 = vst.msk [vmem:[#allocation2 + $0x109] sm:$0xff] %vm255_vm0, %v5477_v24  ;;  %v5541_v38 = vld [vmem:[#allocation2 + $0xa8] sm:$0xff]  ;;  %525 = vrot.lane.b32.xlu1 %v5497_v28, %s5099_s10  ;;  %527 = vrot.lane.b32.xlu0 %v5555_v42, %s5099_s10 }
  0x51   : > { %433 = vst.msk [vmem:[#allocation4 + $0x10] sm:$0xff] %vm255_vm0, %v5479_v25  ;;  %434 = vst.msk [vmem:[#allocation4 + $0x18] sm:$0xff] %vm255_vm0, %v5481_v26  ;;  %v5543_v39 = vld [vmem:[#allocation2 + $0xb0] sm:$0xff]  ;;  %v5551_v40 = vld [vmem:[#allocation2 + $0xc0] sm:$0xff] }
  0x52   : > { %435 = vst.msk [vmem:[#allocation4 + $0x20] sm:$0xff] %vm255_vm0, %v5495_v27  ;;  %436 = vst.msk [vmem:[#allocation4 + $0x28] sm:$0xff] %vm255_vm0, %v5497_v28 }
  0x53   : > { %437 = vst.msk [vmem:[#allocation4 + $0x30] sm:$0xff] %vm255_vm0, %v5505_v30  ;;  %438 = vst.msk [vmem:[#allocation4 + $0x38] sm:$0xff] %vm255_vm0, %v5507_v31  ;;  %v5553_v41 = vld [vmem:[#allocation2 + $0xc8] sm:$0xff] }
  0x54   : > { %439 = vst.msk [vmem:[#allocation4 + $0x40] sm:$0xff] %vm255_vm0, %v5515_v32  ;;  %440 = vst.msk [vmem:[#allocation4 + $0x48] sm:$0xff] %vm255_vm0, %v5517_v33  ;;  %v5561_v43 = vld [vmem:[#allocation2 + $0xd8] sm:$0xff]  ;;  %v5563_v44 = vld [vmem:[#allocation2 + $0xe0] sm:$0xff]  ;;  %529 = vrot.lane.b32.xlu1 %v5505_v30, %s5099_s10  ;;  %531 = vrot.lane.b32.xlu0 %v5507_v31, %s5099_s10 }
  0x55   : > { %441 = vst.msk [vmem:[#allocation4 + $0x50] sm:$0xff] %vm255_vm0, %v5523_v34  ;;  %442 = vst.msk [vmem:[#allocation4 + $0x58] sm:$0xff] %vm255_vm0, %v5525_v35 }
  0x56   : > { %443 = vst.msk [vmem:[#allocation4 + $0x60] sm:$0xff] %vm255_vm0, %v5533_v36  ;;  %444 = vst.msk [vmem:[#allocation4 + $0x68] sm:$0xff] %vm255_vm0, %v5535_v37  ;;  %v5571_v45 = vld [vmem:[#allocation2 + $0xf0] sm:$0xff] }
  0x57   : > { %445 = vst.msk [vmem:[#allocation4 + $0x70] sm:$0xff] %vm255_vm0, %v5541_v38  ;;  %446 = vst.msk [vmem:[#allocation4 + $0x78] sm:$0xff] %vm255_vm0, %v5543_v39  ;;  %v5573_v46 = vld [vmem:[#allocation2 + $0xf8] sm:$0xff]  ;;  %v5579_v47 = vld [vmem:[#allocation2 + $0x108] sm:$0xff] }
  0x58   : > { %447 = vst.msk [vmem:[#allocation4 + $0x80] sm:$0xff] %vm255_vm0, %v5551_v40  ;;  %448 = vst.msk [vmem:[#allocation4 + $0x88] sm:$0xff] %vm255_vm0, %v5553_v41  ;;  %533 = vrot.lane.b32.xlu1 %v5630_v57, %s5099_s10  ;;  %535 = vrot.lane.b32.xlu0 %v5515_v32, %s5099_s10 }
  0x59   : > { %449 = vst.msk [vmem:[#allocation4 + $0x90] sm:$0xff] %vm255_vm0, %v5561_v43  ;;  %450 = vst.msk [vmem:[#allocation4 + $0x98] sm:$0xff] %vm255_vm0, %v5563_v44 }
  0x5a   : > { %451 = vst.msk [vmem:[#allocation4 + $0xa0] sm:$0xff] %vm255_vm0, %v5571_v45  ;;  %452 = vst.msk [vmem:[#allocation4 + $0xa8] sm:$0xff] %vm255_vm0, %v5573_v46 }
  0x5b   : > { %8396 = vst [vmem:[#allocation19_spill] sm:$0xff] %v5582_v48  ;;  %8397 = vst [vmem:[#allocation20_spill] sm:$0xff] %v5585_v49 }
  0x5c   : > { %453 = vst.msk [vmem:[#allocation4 + $0xb0] sm:$0xff] %vm255_vm0, %v5579_v47  ;;  %366 = vst.msk [vmem:[#allocation2 + $0x111] sm:$0xff] %vm255_vm0, %v5582_v48  ;;  %537 = vrot.lane.b32.xlu1 %v5517_v33, %s5099_s10  ;;  %539 = vrot.lane.b32.xlu0 %v5652_v62, %s5099_s10  ;;  %v5724_v48 = vld [vmem:[#allocation2 + $0x100] sm:$0x3] }
  0x5d   : > { %367 = vst.msk [vmem:[#allocation2 + $0x121] sm:$0xff] %vm255_vm0, %v5585_v49  ;;  %8398 = vst [vmem:[#allocation21_spill] sm:$0xff] %v5596_v50  ;;  %v5716_v49 = vld [vmem:[#allocation2 + $0xe8] sm:$0x3] }
  0x5e   : > { %8399 = vst [vmem:[#allocation22_spill] sm:$0xff] %v5599_v51  ;;  %8400 = vst [vmem:[#allocation23_spill] sm:$0xff] %v5602_v52 }
  0x5f   : > { %368 = vst.msk [vmem:[#allocation2 + $0x129] sm:$0xff] %vm255_vm0, %v5596_v50  ;;  %369 = vst.msk [vmem:[#allocation2 + $0x139] sm:$0xff] %vm255_vm0, %v5599_v51  ;;  %v5700_v51 = vld [vmem:[#allocation2 + $0xb8] sm:$0x3]  ;;  %v5708_v50 = vld [vmem:[#allocation2 + $0xd0] sm:$0x3] }
  0x60   : > { %370 = vst.msk [vmem:[#allocation2 + $0x141] sm:$0xff] %vm255_vm0, %v5602_v52  ;;  %8401 = vst [vmem:[#allocation24_spill] sm:$0xff] %v5611_v53  ;;  %541 = vrot.lane.b32.xlu1 %v5523_v34, %s5099_s10  ;;  %543 = vrot.lane.b32.xlu0 %v5525_v35, %s5099_s10  ;;  %v5692_v52 = vld [vmem:[#allocation2 + $0xa0] sm:$0x3] }
  0x61   : > { %8402 = vst [vmem:[#allocation25_spill] sm:$0xff] %v5614_v54  ;;  %8403 = vst [vmem:[#allocation26_spill] sm:$0xff] %v5617_v55 }
  0x62   : > { %371 = vst.msk [vmem:[#allocation2 + $0x151] sm:$0xff] %vm255_vm0, %v5611_v53  ;;  %372 = vst.msk [vmem:[#allocation2 + $0x159] sm:$0xff] %vm255_vm0, %v5614_v54  ;;  %v5684_v53 = vld [vmem:[#allocation2 + $0x88] sm:$0x3] }
  0x63   : > { %373 = vst.msk [vmem:[#allocation2 + $0x169] sm:$0xff] %vm255_vm0, %v5617_v55  ;;  %8404 = vst [vmem:[#allocation27_spill] sm:$0xff] %v5628_v56  ;;  %v5638_v58 = vld [vmem:[#allocation2 + $0x110] sm:$0xff]  ;;  %v5732_v24 = vld [vmem:[#allocation2 + $0x118] sm:$0x3] }
  0x64   : > { %374 = vst.msk [vmem:[#allocation2 + $0x171] sm:$0xff] %vm255_vm0, %v5628_v56  ;;  %v5640_v59 = vld [vmem:[#allocation2 + $0x120] sm:$0xff]  ;;  %454 = vst.msk [vmem:[#allocation4 + $0xb8] sm:$0xff] %vm255_vm0, %v5638_v58  ;;  %545 = vrot.lane.b32.xlu1 %v5684_v53, %s5099_s10  ;;  %547 = vrot.lane.b32.xlu0 %v5533_v36, %s5099_s10 }
  0x65   : > { %455 = vst.msk [vmem:[#allocation4 + $0xc0] sm:$0xff] %vm255_vm0, %v5640_v59  ;;  %8406 = vst [vmem:[#allocation29_spill] sm:$0xff] %v5800_v19 }
  0x66   : > { %v5648_v60 = vld [vmem:[#allocation2 + $0x128] sm:$0xff]  ;;  %v5650_v61 = vld [vmem:[#allocation2 + $0x138] sm:$0xff]  ;;  %v5740_v23 = vld [vmem:[#allocation2 + $0x130] sm:$0x3]  ;;  %376 = vst.msk [vmem:[#allocation2 + $0x189] sm:$0xff] %vm255_vm0, %v5800_v19 }
  0x67   : > { %456 = vst.msk [vmem:[#allocation4 + $0xc8] sm:$0xff] %vm255_vm0, %v5648_v60  ;;  %457 = vst.msk [vmem:[#allocation4 + $0xd0] sm:$0xff] %vm255_vm0, %v5650_v61  ;;  %v5658_v63 = vld [vmem:[#allocation2 + $0x140] sm:$0xff]  ;;  %v5748_v22 = vld [vmem:[#allocation2 + $0x148] sm:$0x3] }
  0x68   : > { %458 = vst.msk [vmem:[#allocation4 + $0xd8] sm:$0xff] %vm255_vm0, %v5658_v63  ;;  %549 = vrot.lane.b32.xlu1 %v5535_v37, %s5099_s10  ;;  %551 = vrot.lane.b32.xlu0 %v5692_v52, %s5099_s10 }
  0x69   : > { %v5660_v0 = vld [vmem:[#allocation2 + $0x150] sm:$0xff]  ;;  %v5668_v56 = vld [vmem:[#allocation2 + $0x158] sm:$0xff]  ;;  %v5756_v21 = vld [vmem:[#allocation2 + $0x160] sm:$0x3] }
  0x6a   : > { %459 = vst.msk [vmem:[#allocation4 + $0xe0] sm:$0xff] %vm255_vm0, %v5660_v0  ;;  %v5670_v55 = vld [vmem:[#allocation2 + $0x168] sm:$0xff]  ;;  %460 = vst.msk [vmem:[#allocation4 + $0xe8] sm:$0xff] %vm255_vm0, %v5668_v56 }
  0x6b   : > { %461 = vst.msk [vmem:[#allocation4 + $0xf0] sm:$0xff] %vm255_vm0, %v5670_v55  ;;  %v5676_v54 = vld [vmem:[#allocation2 + $0x170] sm:$0xff]  ;;  %v5764_v20 = vld [vmem:[#allocation2 + $0x178] sm:$0x3] }
  0x6c   : > { %462 = vst.msk [vmem:[#allocation4 + $0xf8] sm:$0xff] %vm255_vm0, %v5676_v54  ;;  %553 = vrot.lane.b32.xlu1 %v5541_v38, %s5099_s10  ;;  %555 = vrot.lane.b32.xlu0 %v5543_v39, %s5099_s10 }
  0x70   : > { %557 = vrot.lane.b32.xlu1 %v5700_v51, %s5099_s10  ;;  %559 = vrot.lane.b32.xlu0 %v5551_v40, %s5099_s10 }
  0x74   : > { %561 = vrot.lane.b32.xlu1 %v5553_v41, %s5099_s10  ;;  %563 = vrot.lane.b32.xlu0 %v5708_v50, %s5099_s10 }
  0x78   : > { %565 = vrot.lane.b32.xlu1 %v5561_v43, %s5099_s10  ;;  %567 = vrot.lane.b32.xlu0 %v5563_v44, %s5099_s10 }
  0x7c   : > { %569 = vrot.lane.b32.xlu1 %v5716_v49, %s5099_s10  ;;  %571 = vrot.lane.b32.xlu0 %v5571_v45, %s5099_s10 }
  0x80   : > { %573 = vrot.lane.b32.xlu1 %v5573_v46, %s5099_s10  ;;  %575 = vrot.lane.b32.xlu0 %v5724_v48, %s5099_s10 }
  0x84   : > { %577 = vrot.lane.b32.xlu1 %v5579_v47, %s5099_s10  ;;  %579 = vrot.lane.b32.xlu0 %v5638_v58, %s5099_s10 }
  0x88   : > { %581 = vrot.lane.b32.xlu1 %v5732_v24, %s5099_s10  ;;  %583 = vrot.lane.b32.xlu0 %v5640_v59, %s5099_s10 }
  0x8c   : > { %585 = vrot.lane.b32.xlu1 %v5648_v60, %s5099_s10  ;;  %587 = vrot.lane.b32.xlu0 %v5740_v23, %s5099_s10 }
  0x90   : > { %589 = vrot.lane.b32.xlu1 %v5650_v61, %s5099_s10  ;;  %591 = vrot.lane.b32.xlu0 %v5658_v63, %s5099_s10 }
  0x94   : > { %593 = vrot.lane.b32.xlu1 %v5748_v22, %s5099_s10  ;;  %595 = vrot.lane.b32.xlu0 %v5660_v0, %s5099_s10 }
  0x98   : > { %597 = vrot.lane.b32.xlu1 %v5668_v56, %s5099_s10  ;;  %599 = vrot.lane.b32.xlu0 %v5756_v21, %s5099_s10 }
  0x9c   : > { %601 = vrot.lane.b32.xlu1 %v5670_v55, %s5099_s10  ;;  %603 = vrot.lane.b32.xlu0 %v5676_v54, %s5099_s10 }
  0xa0   : > { %605 = vrot.lane.b32.xlu1 %v5764_v20, %s5099_s10  ;;  %706 = vrot.lane.b32.xlu0 %v5408_v11, %s5100_s11  ;;  %v5792_v11 = vld [vmem:[%s5362_s9 + $0xf0] sm:$0xff] }
  0xa1   : > { %8405 = vst [vmem:[#allocation28_spill] sm:$0xff] %v5792_v11  ;;  %375 = vst.msk [vmem:[#allocation2 + $0x181] sm:$0xff] %vm255_vm0, %v5792_v11 }
  0xa4   : > { %708 = vrot.lane.b32.xlu1 %v5388_v7, %s5100_s11  ;;  %710 = vrot.lane.b32.xlu0 %v5406_v10, %s5100_s11  ;;  %v514_v7 = vpop.permute.xlu0 %513 }
  0xa5   : > { %658 = vst.msk [vmem:[#allocation4 + $0x7] sm:$0xff] %vm657_vm3, %v514_v7 }
  0xa8   : > { %712 = vrot.lane.b32.xlu1 %v5479_v25, %s5100_s11  ;;  %714 = vrot.lane.b32.xlu0 %v5481_v26, %s5100_s11  ;;  %v6569_v15 = vld [vmem:[#allocation2 + $0x188] sm:$0xff] }
  0xac   : > { %716 = vrot.lane.b32.xlu1 %v5499_v29, %s5100_s11  ;;  %718 = vrot.lane.b32.xlu0 %v5495_v27, %s5100_s11 }
  0xb0   : > { %720 = vrot.lane.b32.xlu1 %v5497_v28, %s5100_s11  ;;  %722 = vrot.lane.b32.xlu0 %v5555_v42, %s5100_s11 }
  0xb4   : > { %724 = vrot.lane.b32.xlu1 %v5505_v30, %s5100_s11  ;;  %726 = vrot.lane.b32.xlu0 %v5507_v31, %s5100_s11 }
  0xb6   : > { %v516_v10 = vpop.permute.xlu1 %515  ;;  %v512_v18 = vpop.permute.xlu0 %511 }
  0xb7   : > { %660 = vst.msk [vmem:[#allocation4 + $0xf] sm:$0x1] %vm659_vm4, %v516_v10 }
  0xb8   : > { %728 = vrot.lane.b32.xlu1 %v5630_v57, %s5100_s11  ;;  %656 = vst.msk [vmem:[#allocation4 - $0x1] sm:$0xfe] %vm655_vm5, %v512_v18  ;;  %730 = vrot.lane.b32.xlu0 %v5515_v32, %s5100_s11 }
  0xba   : > { %v518_v7 = vpop.permute.xlu1 %517  ;;  %v520_v10 = vpop.permute.xlu0 %519 }
  0xbb   : > { %661 = vst.msk [vmem:[#allocation4 + $0xf] sm:$0xfe] %vm655_vm5, %v518_v7 }
  0xbc   : > { %732 = vrot.lane.b32.xlu1 %v5517_v33, %s5100_s11  ;;  %662 = vst.msk [vmem:[#allocation4 + $0x17] sm:$0xff] %vm657_vm3, %v520_v10  ;;  %734 = vrot.lane.b32.xlu0 %v5652_v62, %s5100_s11 }
  0xbe   : > { %v522_v11 = vpop.permute.xlu1 %521  ;;  %v524_v19 = vpop.permute.xlu0 %523 }
  0xbf   : > { %663 = vst.msk [vmem:[#allocation4 + $0x1f] sm:$0x1] %vm659_vm4, %v522_v11 }
  0xc0   : > { %736 = vrot.lane.b32.xlu1 %v5523_v34, %s5100_s11  ;;  %664 = vst.msk [vmem:[#allocation4 + $0x1f] sm:$0xfe] %vm655_vm5, %v524_v19  ;;  %738 = vrot.lane.b32.xlu0 %v5525_v35, %s5100_s11 }
  0xc2   : > { %v526_v18 = vpop.permute.xlu1 %525  ;;  %v528_v7 = vpop.permute.xlu0 %527 }
  0xc3   : > { %665 = vst.msk [vmem:[#allocation4 + $0x27] sm:$0xff] %vm657_vm3, %v526_v18 }
  0xc4   : > { %740 = vrot.lane.b32.xlu1 %v5684_v53, %s5100_s11  ;;  %666 = vst.msk [vmem:[#allocation4 + $0x2f] sm:$0x1] %vm659_vm4, %v528_v7  ;;  %742 = vrot.lane.b32.xlu0 %v5533_v36, %s5100_s11 }
  0xc6   : > { %v530_v11 = vpop.permute.xlu1 %529  ;;  %v532_v10 = vpop.permute.xlu0 %531 }
  0xc7   : > { %667 = vst.msk [vmem:[#allocation4 + $0x2f] sm:$0xfe] %vm655_vm5, %v530_v11 }
  0xc8   : > { %744 = vrot.lane.b32.xlu1 %v5535_v37, %s5100_s11  ;;  %668 = vst.msk [vmem:[#allocation4 + $0x37] sm:$0xff] %vm657_vm3, %v532_v10  ;;  %746 = vrot.lane.b32.xlu0 %v5692_v52, %s5100_s11 }
  0xca   : > { %v534_v19 = vpop.permute.xlu1 %533  ;;  %v536_v18 = vpop.permute.xlu0 %535 }
  0xcb   : > { %669 = vst.msk [vmem:[#allocation4 + $0x3f] sm:$0x1] %vm659_vm4, %v534_v19 }
  0xcc   : > { %748 = vrot.lane.b32.xlu1 %v5541_v38, %s5100_s11  ;;  %670 = vst.msk [vmem:[#allocation4 + $0x3f] sm:$0xfe] %vm655_vm5, %v536_v18  ;;  %750 = vrot.lane.b32.xlu0 %v5543_v39, %s5100_s11 }
  0xce   : > { %v538_v7 = vpop.permute.xlu1 %537  ;;  %v540_v11 = vpop.permute.xlu0 %539 }
  0xcf   : > { %671 = vst.msk [vmem:[#allocation4 + $0x47] sm:$0xff] %vm657_vm3, %v538_v7 }
  0xd0   : > { %752 = vrot.lane.b32.xlu1 %v5700_v51, %s5100_s11  ;;  %672 = vst.msk [vmem:[#allocation4 + $0x4f] sm:$0x1] %vm659_vm4, %v540_v11  ;;  %754 = vrot.lane.b32.xlu0 %v5551_v40, %s5100_s11 }
  0xd2   : > { %v542_v10 = vpop.permute.xlu1 %541  ;;  %v544_v19 = vpop.permute.xlu0 %543 }
  0xd3   : > { %673 = vst.msk [vmem:[#allocation4 + $0x4f] sm:$0xfe] %vm655_vm5, %v542_v10 }
  0xd4   : > { %756 = vrot.lane.b32.xlu1 %v5553_v41, %s5100_s11  ;;  %674 = vst.msk [vmem:[#allocation4 + $0x57] sm:$0xff] %vm657_vm3, %v544_v19  ;;  %758 = vrot.lane.b32.xlu0 %v5708_v50, %s5100_s11 }
  0xd6   : > { %v546_v18 = vpop.permute.xlu1 %545  ;;  %v548_v7 = vpop.permute.xlu0 %547 }
  0xd7   : > { %675 = vst.msk [vmem:[#allocation4 + $0x5f] sm:$0x1] %vm659_vm4, %v546_v18 }
  0xd8   : > { %760 = vrot.lane.b32.xlu1 %v5561_v43, %s5100_s11  ;;  %676 = vst.msk [vmem:[#allocation4 + $0x5f] sm:$0xfe] %vm655_vm5, %v548_v7  ;;  %762 = vrot.lane.b32.xlu0 %v5563_v44, %s5100_s11 }
  0xda   : > { %v550_v11 = vpop.permute.xlu1 %549  ;;  %v552_v10 = vpop.permute.xlu0 %551 }
  0xdb   : > { %677 = vst.msk [vmem:[#allocation4 + $0x67] sm:$0xff] %vm657_vm3, %v550_v11 }
  0xdc   : > { %764 = vrot.lane.b32.xlu1 %v5716_v49, %s5100_s11  ;;  %678 = vst.msk [vmem:[#allocation4 + $0x6f] sm:$0x1] %vm659_vm4, %v552_v10  ;;  %766 = vrot.lane.b32.xlu0 %v5571_v45, %s5100_s11 }
  0xde   : > { %v554_v19 = vpop.permute.xlu1 %553  ;;  %v556_v18 = vpop.permute.xlu0 %555 }
  0xdf   : > { %679 = vst.msk [vmem:[#allocation4 + $0x6f] sm:$0xfe] %vm655_vm5, %v554_v19 }
  0xe0   : > { %768 = vrot.lane.b32.xlu1 %v5573_v46, %s5100_s11  ;;  %680 = vst.msk [vmem:[#allocation4 + $0x77] sm:$0xff] %vm657_vm3, %v556_v18  ;;  %770 = vrot.lane.b32.xlu0 %v5724_v48, %s5100_s11 }
  0xe2   : > { %v558_v7 = vpop.permute.xlu1 %557  ;;  %v560_v11 = vpop.permute.xlu0 %559 }
  0xe3   : > { %681 = vst.msk [vmem:[#allocation4 + $0x7f] sm:$0x1] %vm659_vm4, %v558_v7 }
  0xe4   : > { %772 = vrot.lane.b32.xlu1 %v5579_v47, %s5100_s11  ;;  %682 = vst.msk [vmem:[#allocation4 + $0x7f] sm:$0xfe] %vm655_vm5, %v560_v11  ;;  %774 = vrot.lane.b32.xlu0 %v5638_v58, %s5100_s11 }
  0xe6   : > { %v562_v10 = vpop.permute.xlu1 %561  ;;  %v564_v19 = vpop.permute.xlu0 %563 }
  0xe7   : > { %683 = vst.msk [vmem:[#allocation4 + $0x87] sm:$0xff] %vm657_vm3, %v562_v10 }
  0xe8   : > { %776 = vrot.lane.b32.xlu1 %v5732_v24, %s5100_s11  ;;  %684 = vst.msk [vmem:[#allocation4 + $0x8f] sm:$0x1] %vm659_vm4, %v564_v19  ;;  %778 = vrot.lane.b32.xlu0 %v5640_v59, %s5100_s11 }
  0xea   : > { %v566_v18 = vpop.permute.xlu1 %565  ;;  %v568_v7 = vpop.permute.xlu0 %567 }
  0xeb   : > { %685 = vst.msk [vmem:[#allocation4 + $0x8f] sm:$0xfe] %vm655_vm5, %v566_v18 }
  0xec   : > { %780 = vrot.lane.b32.xlu1 %v5648_v60, %s5100_s11  ;;  %686 = vst.msk [vmem:[#allocation4 + $0x97] sm:$0xff] %vm657_vm3, %v568_v7  ;;  %782 = vrot.lane.b32.xlu0 %v5740_v23, %s5100_s11 }
  0xee   : > { %v570_v11 = vpop.permute.xlu1 %569  ;;  %v572_v10 = vpop.permute.xlu0 %571 }
  0xef   : > { %687 = vst.msk [vmem:[#allocation4 + $0x9f] sm:$0x1] %vm659_vm4, %v570_v11 }
  0xf0   : > { %784 = vrot.lane.b32.xlu1 %v5650_v61, %s5100_s11  ;;  %688 = vst.msk [vmem:[#allocation4 + $0x9f] sm:$0xfe] %vm655_vm5, %v572_v10  ;;  %786 = vrot.lane.b32.xlu0 %v5658_v63, %s5100_s11 }
  0xf2   : > { %v574_v19 = vpop.permute.xlu1 %573  ;;  %v576_v18 = vpop.permute.xlu0 %575 }
  0xf3   : > { %689 = vst.msk [vmem:[#allocation4 + $0xa7] sm:$0xff] %vm657_vm3, %v574_v19 }
  0xf4   : > { %788 = vrot.lane.b32.xlu1 %v5748_v22, %s5100_s11  ;;  %690 = vst.msk [vmem:[#allocation4 + $0xaf] sm:$0x1] %vm659_vm4, %v576_v18  ;;  %790 = vrot.lane.b32.xlu0 %v5660_v0, %s5100_s11 }
  0xf6   : > { %v578_v7 = vpop.permute.xlu1 %577  ;;  %v580_v11 = vpop.permute.xlu0 %579 }
  0xf7   : > { %691 = vst.msk [vmem:[#allocation4 + $0xaf] sm:$0xfe] %vm655_vm5, %v578_v7 }
  0xf8   : > { %792 = vrot.lane.b32.xlu1 %v5668_v56, %s5100_s11  ;;  %692 = vst.msk [vmem:[#allocation4 + $0xb7] sm:$0xff] %vm657_vm3, %v580_v11  ;;  %794 = vrot.lane.b32.xlu0 %v5756_v21, %s5100_s11 }
  0xfa   : > { %v582_v10 = vpop.permute.xlu1 %581  ;;  %v584_v19 = vpop.permute.xlu0 %583 }
  0xfb   : > { %693 = vst.msk [vmem:[#allocation4 + $0xbf] sm:$0x1] %vm659_vm4, %v582_v10 }
  0xfc   : > { %796 = vrot.lane.b32.xlu1 %v5670_v55, %s5100_s11  ;;  %694 = vst.msk [vmem:[#allocation4 + $0xbf] sm:$0xfe] %vm655_vm5, %v584_v19  ;;  %798 = vrot.lane.b32.xlu0 %v5676_v54, %s5100_s11 }
  0xfe   : > { %v586_v18 = vpop.permute.xlu1 %585  ;;  %v588_v7 = vpop.permute.xlu0 %587 }
  0xff   : > { %695 = vst.msk [vmem:[#allocation4 + $0xc7] sm:$0xff] %vm657_vm3, %v586_v18 }
 0x100   : > { %800 = vrot.lane.b32.xlu1 %v5764_v20, %s5100_s11  ;;  %696 = vst.msk [vmem:[#allocation4 + $0xcf] sm:$0x1] %vm659_vm4, %v588_v7  ;;  %903 = vrot.lane.b32.xlu0 %v5479_v25, %s5101_s12 }
 0x102   : > { %v590_v11 = vpop.permute.xlu1 %589  ;;  %v592_v10 = vpop.permute.xlu0 %591 }
 0x103   : > { %697 = vst.msk [vmem:[#allocation4 + $0xcf] sm:$0xfe] %vm655_vm5, %v590_v11 }
 0x104   : > { %905 = vrot.lane.b32.xlu1 %v5481_v26, %s5101_s12  ;;  %698 = vst.msk [vmem:[#allocation4 + $0xd7] sm:$0xff] %vm657_vm3, %v592_v10  ;;  %907 = vrot.lane.b32.xlu0 %v5495_v27, %s5101_s12 }
 0x106   : > { %v594_v19 = vpop.permute.xlu1 %593  ;;  %v596_v18 = vpop.permute.xlu0 %595 }
 0x107   : > { %699 = vst.msk [vmem:[#allocation4 + $0xdf] sm:$0x1] %vm659_vm4, %v594_v19 }
 0x108   : > { %909 = vrot.lane.b32.xlu1 %v5497_v28, %s5101_s12  ;;  %700 = vst.msk [vmem:[#allocation4 + $0xdf] sm:$0xfe] %vm655_vm5, %v596_v18  ;;  %911 = vrot.lane.b32.xlu0 %v5505_v30, %s5101_s12 }
 0x10a   : > { %v598_v7 = vpop.permute.xlu1 %597  ;;  %v600_v11 = vpop.permute.xlu0 %599 }
 0x10b   : > { %701 = vst.msk [vmem:[#allocation4 + $0xe7] sm:$0xff] %vm657_vm3, %v598_v7 }
 0x10c   : > { %913 = vrot.lane.b32.xlu1 %v5507_v31, %s5101_s12  ;;  %702 = vst.msk [vmem:[#allocation4 + $0xef] sm:$0x1] %vm659_vm4, %v600_v11  ;;  %915 = vrot.lane.b32.xlu0 %v5515_v32, %s5101_s12 }
 0x10e   : > { %v602_v10 = vpop.permute.xlu1 %601  ;;  %v604_v19 = vpop.permute.xlu0 %603 }
 0x10f   : > { %703 = vst.msk [vmem:[#allocation4 + $0xef] sm:$0xfe] %vm655_vm5, %v602_v10 }
 0x110   : > { %917 = vrot.lane.b32.xlu1 %v5517_v33, %s5101_s12  ;;  %704 = vst.msk [vmem:[#allocation4 + $0xf7] sm:$0xff] %vm657_vm3, %v604_v19  ;;  %919 = vrot.lane.b32.xlu0 %v5523_v34, %s5101_s12 }
 0x112   : > { %v606_v18 = vpop.permute.xlu1 %605  ;;  %v707_v7 = vpop.permute.xlu0 %706 }
 0x113   : > { %705 = vst.msk [vmem:[#allocation4 + $0xff] sm:$0x1] %vm659_vm4, %v606_v18 }
 0x114   : > { %921 = vrot.lane.b32.xlu1 %v5525_v35, %s5101_s12  ;;  %851 = vst.msk [vmem:[#allocation4 - $0x2] sm:$0xfc] %vm850_vm6, %v707_v7  ;;  %923 = vrot.lane.b32.xlu0 %v5533_v36, %s5101_s12 }
 0x116   : > { %v709_v11 = vpop.permute.xlu1 %708  ;;  %v711_v10 = vpop.permute.xlu0 %710 }
 0x117   : > { %853 = vst.msk [vmem:[#allocation4 + $0x6] sm:$0xff] %vm852_vm7, %v709_v11 }
 0x118   : > { %925 = vrot.lane.b32.xlu1 %v5535_v37, %s5101_s12  ;;  %855 = vst.msk [vmem:[#allocation4 + $0xe] sm:$0x3] %vm854_vm8, %v711_v10  ;;  %927 = vrot.lane.b32.xlu0 %v5541_v38, %s5101_s12 }
 0x11a   : > { %v713_v19 = vpop.permute.xlu1 %712  ;;  %v715_v18 = vpop.permute.xlu0 %714 }
 0x11b   : > { %856 = vst.msk [vmem:[#allocation4 + $0xe] sm:$0xfc] %vm850_vm6, %v713_v19 }
 0x11c   : > { %929 = vrot.lane.b32.xlu1 %v5543_v39, %s5101_s12  ;;  %857 = vst.msk [vmem:[#allocation4 + $0x16] sm:$0xff] %vm852_vm7, %v715_v18  ;;  %931 = vrot.lane.b32.xlu0 %v5551_v40, %s5101_s12 }
 0x11e   : > { %v717_v7 = vpop.permute.xlu1 %716  ;;  %v719_v11 = vpop.permute.xlu0 %718 }
 0x11f   : > { %858 = vst.msk [vmem:[#allocation4 + $0x1e] sm:$0x3] %vm854_vm8, %v717_v7 }
 0x120   : > { %933 = vrot.lane.b32.xlu1 %v5553_v41, %s5101_s12  ;;  %859 = vst.msk [vmem:[#allocation4 + $0x1e] sm:$0xfc] %vm850_vm6, %v719_v11  ;;  %935 = vrot.lane.b32.xlu0 %v5561_v43, %s5101_s12 }
 0x122   : > { %v721_v10 = vpop.permute.xlu1 %720  ;;  %v723_v19 = vpop.permute.xlu0 %722 }
 0x123   : > { %860 = vst.msk [vmem:[#allocation4 + $0x26] sm:$0xff] %vm852_vm7, %v721_v10 }
 0x124   : > { %937 = vrot.lane.b32.xlu1 %v5563_v44, %s5101_s12  ;;  %861 = vst.msk [vmem:[#allocation4 + $0x2e] sm:$0x3] %vm854_vm8, %v723_v19  ;;  %939 = vrot.lane.b32.xlu0 %v5571_v45, %s5101_s12 }
 0x126   : > { %v725_v18 = vpop.permute.xlu1 %724  ;;  %v727_v7 = vpop.permute.xlu0 %726 }
 0x127   : > { %862 = vst.msk [vmem:[#allocation4 + $0x2e] sm:$0xfc] %vm850_vm6, %v725_v18 }
 0x128   : > { %941 = vrot.lane.b32.xlu1 %v5573_v46, %s5101_s12  ;;  %863 = vst.msk [vmem:[#allocation4 + $0x36] sm:$0xff] %vm852_vm7, %v727_v7  ;;  %943 = vrot.lane.b32.xlu0 %v5579_v47, %s5101_s12 }
 0x12a   : > { %v729_v11 = vpop.permute.xlu1 %728  ;;  %v731_v10 = vpop.permute.xlu0 %730 }
 0x12b   : > { %864 = vst.msk [vmem:[#allocation4 + $0x3e] sm:$0x3] %vm854_vm8, %v729_v11 }
 0x12c   : > { %945 = vrot.lane.b32.xlu1 %v5638_v58, %s5101_s12  ;;  %865 = vst.msk [vmem:[#allocation4 + $0x3e] sm:$0xfc] %vm850_vm6, %v731_v10  ;;  %947 = vrot.lane.b32.xlu0 %v5640_v59, %s5101_s12 }
 0x12e   : > { %v733_v19 = vpop.permute.xlu1 %732  ;;  %v735_v18 = vpop.permute.xlu0 %734 }
 0x12f   : > { %866 = vst.msk [vmem:[#allocation4 + $0x46] sm:$0xff] %vm852_vm7, %v733_v19 }
 0x130   : > { %949 = vrot.lane.b32.xlu1 %v5648_v60, %s5101_s12  ;;  %867 = vst.msk [vmem:[#allocation4 + $0x4e] sm:$0x3] %vm854_vm8, %v735_v18  ;;  %951 = vrot.lane.b32.xlu0 %v5650_v61, %s5101_s12 }
 0x132   : > { %v737_v7 = vpop.permute.xlu1 %736  ;;  %v739_v11 = vpop.permute.xlu0 %738 }
 0x133   : > { %868 = vst.msk [vmem:[#allocation4 + $0x4e] sm:$0xfc] %vm850_vm6, %v737_v7  ;;  %v6002_v7 = vld [vmem:[#allocation2 + $0x180] sm:$0xff] }
 0x134   : > { %953 = vrot.lane.b32.xlu1 %v5658_v63, %s5101_s12  ;;  %869 = vst.msk [vmem:[#allocation4 + $0x56] sm:$0xff] %vm852_vm7, %v739_v11  ;;  %955 = vrot.lane.b32.xlu0 %v5660_v0, %s5101_s12 }
 0x136   : > { %v741_v10 = vpop.permute.xlu1 %740  ;;  %v743_v19 = vpop.permute.xlu0 %742 }
 0x137   : > { %870 = vst.msk [vmem:[#allocation4 + $0x5e] sm:$0x3] %vm854_vm8, %v741_v10  ;;  %v6007_v10 = vld [vmem:[#allocation2 + $0x188] sm:$0xff] }
 0x138   : > { %957 = vrot.lane.b32.xlu1 %v5668_v56, %s5101_s12  ;;  %871 = vst.msk [vmem:[#allocation4 + $0x5e] sm:$0xfc] %vm850_vm6, %v743_v19  ;;  %959 = vrot.lane.b32.xlu0 %v5670_v55, %s5101_s12 }
 0x13a   : > { %v745_v18 = vpop.permute.xlu1 %744  ;;  %v747_v11 = vpop.permute.xlu0 %746 }
 0x13b   : > { %872 = vst.msk [vmem:[#allocation4 + $0x66] sm:$0xff] %vm852_vm7, %v745_v18 }
 0x13c   : > { %961 = vrot.lane.b32.xlu1 %v5676_v54, %s5101_s12  ;;  %873 = vst.msk [vmem:[#allocation4 + $0x6e] sm:$0x3] %vm854_vm8, %v747_v11  ;;  %963 = vrot.lane.b32.xlu0 %v6002_v7, %s5101_s12 }
 0x13e   : > { %v749_v19 = vpop.permute.xlu1 %748  ;;  %v751_v17 = vpop.permute.xlu0 %750 }
 0x13f   : > { %874 = vst.msk [vmem:[#allocation4 + $0x6e] sm:$0xfc] %vm850_vm6, %v749_v19 }
 0x140   : > { %965 = vrot.lane.b32.xlu1 %v6007_v10, %s5101_s12  ;;  %875 = vst.msk [vmem:[#allocation4 + $0x76] sm:$0xff] %vm852_vm7, %v751_v17  ;;  %1033 = vrot.lane.b32.xlu0 %v5479_v25, %s5102_s13 }
 0x142   : > { %v753_v18 = vpop.permute.xlu1 %752  ;;  %v755_v11 = vpop.permute.xlu0 %754 }
 0x143   : > { %876 = vst.msk [vmem:[#allocation4 + $0x7e] sm:$0x3] %vm854_vm8, %v753_v18 }
 0x144   : > { %1035 = vrot.lane.b32.xlu1 %v5481_v26, %s5102_s13  ;;  %877 = vst.msk [vmem:[#allocation4 + $0x7e] sm:$0xfc] %vm850_vm6, %v755_v11  ;;  %1037 = vrot.lane.b32.xlu0 %v5499_v29, %s5102_s13 }
 0x146   : > { %v757_v19 = vpop.permute.xlu1 %756  ;;  %v759_v17 = vpop.permute.xlu0 %758 }
 0x147   : > { %878 = vst.msk [vmem:[#allocation4 + $0x86] sm:$0xff] %vm852_vm7, %v757_v19 }
 0x148   : > { %1039 = vrot.lane.b32.xlu1 %v5495_v27, %s5102_s13  ;;  %879 = vst.msk [vmem:[#allocation4 + $0x8e] sm:$0x3] %vm854_vm8, %v759_v17  ;;  %1041 = vrot.lane.b32.xlu0 %v5497_v28, %s5102_s13 }
 0x14a   : > { %v761_v18 = vpop.permute.xlu1 %760  ;;  %v763_v16 = vpop.permute.xlu0 %762 }
 0x14b   : > { %880 = vst.msk [vmem:[#allocation4 + $0x8e] sm:$0xfc] %vm850_vm6, %v761_v18 }
 0x14c   : > { %1043 = vrot.lane.b32.xlu1 %v5555_v42, %s5102_s13  ;;  %881 = vst.msk [vmem:[#allocation4 + $0x96] sm:$0xff] %vm852_vm7, %v763_v16  ;;  %1045 = vrot.lane.b32.xlu0 %v5505_v30, %s5102_s13 }
 0x14e   : > { %v765_v29 = vpop.permute.xlu1 %764  ;;  %v767_v11 = vpop.permute.xlu0 %766 }
 0x14f   : > { %882 = vst.msk [vmem:[#allocation4 + $0x9e] sm:$0x3] %vm854_vm8, %v765_v29 }
 0x150   : > { %1047 = vrot.lane.b32.xlu1 %v5507_v31, %s5102_s13  ;;  %883 = vst.msk [vmem:[#allocation4 + $0x9e] sm:$0xfc] %vm850_vm6, %v767_v11  ;;  %1049 = vrot.lane.b32.xlu0 %v5630_v57, %s5102_s13 }
 0x152   : > { %v769_v19 = vpop.permute.xlu1 %768  ;;  %v771_v17 = vpop.permute.xlu0 %770 }
 0x153   : > { %884 = vst.msk [vmem:[#allocation4 + $0xa6] sm:$0xff] %vm852_vm7, %v769_v19 }
 0x154   : > { %1051 = vrot.lane.b32.xlu1 %v5515_v32, %s5102_s13  ;;  %885 = vst.msk [vmem:[#allocation4 + $0xae] sm:$0x3] %vm854_vm8, %v771_v17  ;;  %1053 = vrot.lane.b32.xlu0 %v5517_v33, %s5102_s13 }
 0x156   : > { %v773_v16 = vpop.permute.xlu1 %772  ;;  %v775_v18 = vpop.permute.xlu0 %774 }
 0x157   : > { %886 = vst.msk [vmem:[#allocation4 + $0xae] sm:$0xfc] %vm850_vm6, %v773_v16 }
 0x158   : > { %1055 = vrot.lane.b32.xlu1 %v5652_v62, %s5102_s13  ;;  %887 = vst.msk [vmem:[#allocation4 + $0xb6] sm:$0xff] %vm852_vm7, %v775_v18  ;;  %1057 = vrot.lane.b32.xlu0 %v5523_v34, %s5102_s13 }
 0x15a   : > { %v777_v29 = vpop.permute.xlu1 %776  ;;  %v779_v11 = vpop.permute.xlu0 %778 }
 0x15b   : > { %888 = vst.msk [vmem:[#allocation4 + $0xbe] sm:$0x3] %vm854_vm8, %v777_v29 }
 0x15c   : > { %1059 = vrot.lane.b32.xlu1 %v5525_v35, %s5102_s13  ;;  %889 = vst.msk [vmem:[#allocation4 + $0xbe] sm:$0xfc] %vm850_vm6, %v779_v11  ;;  %1061 = vrot.lane.b32.xlu0 %v5684_v53, %s5102_s13 }
 0x15e   : > { %v781_v19 = vpop.permute.xlu1 %780  ;;  %v783_v17 = vpop.permute.xlu0 %782 }
 0x15f   : > { %890 = vst.msk [vmem:[#allocation4 + $0xc6] sm:$0xff] %vm852_vm7, %v781_v19 }
 0x160   : > { %1063 = vrot.lane.b32.xlu1 %v5533_v36, %s5102_s13  ;;  %891 = vst.msk [vmem:[#allocation4 + $0xce] sm:$0x3] %vm854_vm8, %v783_v17  ;;  %1065 = vrot.lane.b32.xlu0 %v5535_v37, %s5102_s13 }
 0x162   : > { %v785_v16 = vpop.permute.xlu1 %784  ;;  %v787_v18 = vpop.permute.xlu0 %786 }
 0x163   : > { %892 = vst.msk [vmem:[#allocation4 + $0xce] sm:$0xfc] %vm850_vm6, %v785_v16 }
 0x164   : > { %1067 = vrot.lane.b32.xlu1 %v5692_v52, %s5102_s13  ;;  %893 = vst.msk [vmem:[#allocation4 + $0xd6] sm:$0xff] %vm852_vm7, %v787_v18  ;;  %1069 = vrot.lane.b32.xlu0 %v5541_v38, %s5102_s13 }
 0x166   : > { %v789_v29 = vpop.permute.xlu1 %788  ;;  %v791_v11 = vpop.permute.xlu0 %790 }
 0x167   : > { %894 = vst.msk [vmem:[#allocation4 + $0xde] sm:$0x3] %vm854_vm8, %v789_v29 }
 0x168   : > { %1071 = vrot.lane.b32.xlu1 %v5543_v39, %s5102_s13  ;;  %895 = vst.msk [vmem:[#allocation4 + $0xde] sm:$0xfc] %vm850_vm6, %v791_v11  ;;  %1073 = vrot.lane.b32.xlu0 %v5700_v51, %s5102_s13 }
 0x16a   : > { %v793_v19 = vpop.permute.xlu1 %792  ;;  %v795_v17 = vpop.permute.xlu0 %794 }
 0x16b   : > { %896 = vst.msk [vmem:[#allocation4 + $0xe6] sm:$0xff] %vm852_vm7, %v793_v19 }
 0x16c   : > { %1075 = vrot.lane.b32.xlu1 %v5551_v40, %s5102_s13  ;;  %897 = vst.msk [vmem:[#allocation4 + $0xee] sm:$0x3] %vm854_vm8, %v795_v17  ;;  %1077 = vrot.lane.b32.xlu0 %v5553_v41, %s5102_s13 }
 0x16e   : > { %v797_v16 = vpop.permute.xlu1 %796  ;;  %v799_v18 = vpop.permute.xlu0 %798 }
 0x16f   : > { %898 = vst.msk [vmem:[#allocation4 + $0xee] sm:$0xfc] %vm850_vm6, %v797_v16 }
 0x170   : > { %1079 = vrot.lane.b32.xlu1 %v5708_v50, %s5102_s13  ;;  %899 = vst.msk [vmem:[#allocation4 + $0xf6] sm:$0xff] %vm852_vm7, %v799_v18  ;;  %1081 = vrot.lane.b32.xlu0 %v5561_v43, %s5102_s13 }
 0x172   : > { %v801_v29 = vpop.permute.xlu1 %800  ;;  %v904_v11 = vpop.permute.xlu0 %903 }
 0x173   : > { %900 = vst.msk [vmem:[#allocation4 + $0xfe] sm:$0x3] %vm854_vm8, %v801_v29 }
 0x174   : > { %1083 = vrot.lane.b32.xlu1 %v5563_v44, %s5102_s13  ;;  %1000 = vst.msk [vmem:[#allocation4] sm:$0xff] %vm999_vm9, %v904_v11  ;;  %1085 = vrot.lane.b32.xlu0 %v5716_v49, %s5102_s13 }
 0x176   : > { %v906_v19 = vpop.permute.xlu1 %905  ;;  %v908_v17 = vpop.permute.xlu0 %907 }
 0x177   : > { %1001 = vst.msk [vmem:[#allocation4 + $0x8] sm:$0xff] %vm999_vm9, %v906_v19  ;;  %1002 = vst.msk [vmem:[#allocation4 + $0x10] sm:$0xff] %vm999_vm9, %v908_v17 }
 0x178   : > { %1087 = vrot.lane.b32.xlu1 %v5571_v45, %s5102_s13  ;;  %1089 = vrot.lane.b32.xlu0 %v5573_v46, %s5102_s13 }
 0x17a   : > { %v910_v16 = vpop.permute.xlu1 %909  ;;  %v912_v18 = vpop.permute.xlu0 %911 }
 0x17b   : > { %1003 = vst.msk [vmem:[#allocation4 + $0x18] sm:$0xff] %vm999_vm9, %v910_v16  ;;  %1004 = vst.msk [vmem:[#allocation4 + $0x20] sm:$0xff] %vm999_vm9, %v912_v18 }
 0x17c   : > { %1091 = vrot.lane.b32.xlu1 %v5724_v48, %s5102_s13  ;;  %1093 = vrot.lane.b32.xlu0 %v5579_v47, %s5102_s13 }
 0x17e   : > { %v914_v29 = vpop.permute.xlu1 %913  ;;  %v916_v11 = vpop.permute.xlu0 %915 }
 0x17f   : > { %1005 = vst.msk [vmem:[#allocation4 + $0x28] sm:$0xff] %vm999_vm9, %v914_v29  ;;  %1006 = vst.msk [vmem:[#allocation4 + $0x30] sm:$0xff] %vm999_vm9, %v916_v11 }
 0x180   : > { %1095 = vrot.lane.b32.xlu1 %v5638_v58, %s5102_s13  ;;  %1097 = vrot.lane.b32.xlu0 %v5732_v24, %s5102_s13 }
 0x182   : > { %v918_v19 = vpop.permute.xlu1 %917  ;;  %v920_v17 = vpop.permute.xlu0 %919 }
 0x183   : > { %1007 = vst.msk [vmem:[#allocation4 + $0x38] sm:$0xff] %vm999_vm9, %v918_v19  ;;  %1008 = vst.msk [vmem:[#allocation4 + $0x40] sm:$0xff] %vm999_vm9, %v920_v17 }
 0x184   : > { %1099 = vrot.lane.b32.xlu1 %v5640_v59, %s5102_s13  ;;  %1101 = vrot.lane.b32.xlu0 %v5648_v60, %s5102_s13 }
 0x186   : > { %v922_v16 = vpop.permute.xlu1 %921  ;;  %v924_v18 = vpop.permute.xlu0 %923 }
 0x187   : > { %1009 = vst.msk [vmem:[#allocation4 + $0x48] sm:$0xff] %vm999_vm9, %v922_v16  ;;  %1010 = vst.msk [vmem:[#allocation4 + $0x50] sm:$0xff] %vm999_vm9, %v924_v18 }
 0x188   : > { %1103 = vrot.lane.b32.xlu1 %v5740_v23, %s5102_s13  ;;  %1105 = vrot.lane.b32.xlu0 %v5650_v61, %s5102_s13 }
 0x18a   : > { %v926_v29 = vpop.permute.xlu1 %925  ;;  %v928_v11 = vpop.permute.xlu0 %927 }
 0x18b   : > { %1011 = vst.msk [vmem:[#allocation4 + $0x58] sm:$0xff] %vm999_vm9, %v926_v29  ;;  %1012 = vst.msk [vmem:[#allocation4 + $0x60] sm:$0xff] %vm999_vm9, %v928_v11 }
 0x18c   : > { %1107 = vrot.lane.b32.xlu1 %v5658_v63, %s5102_s13  ;;  %1109 = vrot.lane.b32.xlu0 %v5748_v22, %s5102_s13 }
 0x18e   : > { %v930_v19 = vpop.permute.xlu1 %929  ;;  %v932_v17 = vpop.permute.xlu0 %931 }
 0x18f   : > { %1013 = vst.msk [vmem:[#allocation4 + $0x68] sm:$0xff] %vm999_vm9, %v930_v19  ;;  %1014 = vst.msk [vmem:[#allocation4 + $0x70] sm:$0xff] %vm999_vm9, %v932_v17  ;;  %v6153_v19 = vld [vmem:[#allocation2 + $0x190] sm:$0x3] }
 0x190   : > { %1111 = vrot.lane.b32.xlu1 %v5660_v0, %s5102_s13  ;;  %1113 = vrot.lane.b32.xlu0 %v5668_v56, %s5102_s13 }
 0x192   : > { %v934_v16 = vpop.permute.xlu1 %933  ;;  %v936_v18 = vpop.permute.xlu0 %935 }
 0x193   : > { %1015 = vst.msk [vmem:[#allocation4 + $0x78] sm:$0xff] %vm999_vm9, %v934_v16  ;;  %1016 = vst.msk [vmem:[#allocation4 + $0x80] sm:$0xff] %vm999_vm9, %v936_v18 }
 0x194   : > { %1115 = vrot.lane.b32.xlu1 %v5756_v21, %s5102_s13  ;;  %1117 = vrot.lane.b32.xlu0 %v5670_v55, %s5102_s13 }
 0x196   : > { %v938_v22 = vpop.permute.xlu1 %937  ;;  %v940_v29 = vpop.permute.xlu0 %939 }
 0x197   : > { %1017 = vst.msk [vmem:[#allocation4 + $0x88] sm:$0xff] %vm999_vm9, %v938_v22  ;;  %1018 = vst.msk [vmem:[#allocation4 + $0x90] sm:$0xff] %vm999_vm9, %v940_v29  ;;  %v4998_v22 = vld [vmem:[#allocation2 + $0x28] sm:$0x3] }
 0x198   : > { %1119 = vrot.lane.b32.xlu1 %v5676_v54, %s5102_s13  ;;  %1121 = vrot.lane.b32.xlu0 %v5764_v20, %s5102_s13 }
 0x19a   : > { %v942_v11 = vpop.permute.xlu1 %941  ;;  %v944_v21 = vpop.permute.xlu0 %943 }
 0x19b   : > { %1019 = vst.msk [vmem:[#allocation4 + $0x98] sm:$0xff] %vm999_vm9, %v942_v11  ;;  %1020 = vst.msk [vmem:[#allocation4 + $0xa0] sm:$0xff] %vm999_vm9, %v944_v21 }
 0x19c   : > { %1123 = vrot.lane.b32.xlu1 %v6002_v7, %s5102_s13  ;;  %1125 = vrot.lane.b32.xlu0 %v6007_v10, %s5102_s13 }
 0x19e   : > { %v946_v17 = vpop.permute.xlu1 %945  ;;  %v948_v16 = vpop.permute.xlu0 %947 }
 0x19f   : > { %1021 = vst.msk [vmem:[#allocation4 + $0xa8] sm:$0xff] %vm999_vm9, %v946_v17  ;;  %1022 = vst.msk [vmem:[#allocation4 + $0xb0] sm:$0xff] %vm999_vm9, %v948_v16 }
 0x1a0   : > { %1127 = vrot.lane.b32.xlu1 %v6153_v19, %s5102_s13  ;;  %1228 = vrot.lane.b32.xlu0 %v5479_v25, %s5103_s14 }
 0x1a2   : > { %v950_v20 = vpop.permute.xlu1 %949  ;;  %v952_v18 = vpop.permute.xlu0 %951 }
 0x1a3   : > { %1023 = vst.msk [vmem:[#allocation4 + $0xb8] sm:$0xff] %vm999_vm9, %v950_v20  ;;  %1024 = vst.msk [vmem:[#allocation4 + $0xc0] sm:$0xff] %vm999_vm9, %v952_v18 }
 0x1a4   : > { %1230 = vrot.lane.b32.xlu1 %v5481_v26, %s5103_s14  ;;  %1232 = vrot.lane.b32.xlu0 %v4998_v22, %s5103_s14 }
 0x1a6   : > { %v954_v29 = vpop.permute.xlu1 %953  ;;  %v956_v11 = vpop.permute.xlu0 %955 }
 0x1a7   : > { %1025 = vst.msk [vmem:[#allocation4 + $0xc8] sm:$0xff] %vm999_vm9, %v954_v29  ;;  %1026 = vst.msk [vmem:[#allocation4 + $0xd0] sm:$0xff] %vm999_vm9, %v956_v11 }
 0x1a8   : > { %1234 = vrot.lane.b32.xlu1 %v5495_v27, %s5103_s14  ;;  %1236 = vrot.lane.b32.xlu0 %v5497_v28, %s5103_s14 }
 0x1aa   : > { %v958_v25 = vpop.permute.xlu1 %957  ;;  %v960_v26 = vpop.permute.xlu0 %959 }
 0x1ab   : > { %1027 = vst.msk [vmem:[#allocation4 + $0xd8] sm:$0xff] %vm999_vm9, %v958_v25  ;;  %1028 = vst.msk [vmem:[#allocation4 + $0xe0] sm:$0xff] %vm999_vm9, %v960_v26 }
 0x1ac   : > { %1238 = vrot.lane.b32.xlu1 %v5555_v42, %s5103_s14  ;;  %1240 = vrot.lane.b32.xlu0 %v5505_v30, %s5103_s14 }
 0x1ae   : > { %v962_v21 = vpop.permute.xlu1 %961  ;;  %v964_v17 = vpop.permute.xlu0 %963 }
 0x1af   : > { %1029 = vst.msk [vmem:[#allocation4 + $0xe8] sm:$0xff] %vm999_vm9, %v962_v21  ;;  %1030 = vst.msk [vmem:[#allocation4 + $0xf0] sm:$0xff] %vm999_vm9, %v964_v17 }
 0x1b0   : > { %1242 = vrot.lane.b32.xlu1 %v5507_v31, %s5103_s14  ;;  %1244 = vrot.lane.b32.xlu0 %v5630_v57, %s5103_s14 }
 0x1b2   : > { %v966_v16 = vpop.permute.xlu1 %965  ;;  %v1034_v42 = vpop.permute.xlu0 %1033 }
 0x1b3   : > { %1031 = vst.msk [vmem:[#allocation4 + $0xf8] sm:$0xff] %vm999_vm9, %v966_v16 }
 0x1b4   : > { %1246 = vrot.lane.b32.xlu1 %v5515_v32, %s5103_s14  ;;  %1178 = vst.msk [vmem:[#allocation4 - $0x1] sm:$0xfe] %vm1177_vm10, %v1034_v42  ;;  %1248 = vrot.lane.b32.xlu0 %v5517_v33, %s5103_s14 }
 0x1b6   : > { %v1036_v20 = vpop.permute.xlu1 %1035  ;;  %v1038_v18 = vpop.permute.xlu0 %1037 }
 0x1b7   : > { %1180 = vst.msk [vmem:[#allocation4 + $0x7] sm:$0xff] %vm1179_vm11, %v1036_v20 }
 0x1b8   : > { %1250 = vrot.lane.b32.xlu1 %v5652_v62, %s5103_s14  ;;  %1182 = vst.msk [vmem:[#allocation4 + $0xf] sm:$0x1] %vm8378_vm12, %v1038_v18  ;;  %1252 = vrot.lane.b32.xlu0 %v5523_v34, %s5103_s14 }
 0x1ba   : > { %v1040_v57 = vpop.permute.xlu1 %1039  ;;  %v1042_v22 = vpop.permute.xlu0 %1041 }
 0x1bb   : > { %1183 = vst.msk [vmem:[#allocation4 + $0xf] sm:$0xfe] %vm1177_vm10, %v1040_v57 }
 0x1bc   : > { %1254 = vrot.lane.b32.xlu1 %v5525_v35, %s5103_s14  ;;  %1184 = vst.msk [vmem:[#allocation4 + $0x17] sm:$0xff] %vm1179_vm11, %v1042_v22  ;;  %1256 = vrot.lane.b32.xlu0 %v5684_v53, %s5103_s14 }
 0x1be   : > { %v1044_v29 = vpop.permute.xlu1 %1043  ;;  %v1046_v62 = vpop.permute.xlu0 %1045 }
 0x1bf   : > { %1185 = vst.msk [vmem:[#allocation4 + $0x1f] sm:$0x1] %vm8378_vm12, %v1044_v29 }
 0x1c0   : > { %1258 = vrot.lane.b32.xlu1 %v5533_v36, %s5103_s14  ;;  %1186 = vst.msk [vmem:[#allocation4 + $0x1f] sm:$0xfe] %vm1177_vm10, %v1046_v62  ;;  %1260 = vrot.lane.b32.xlu0 %v5535_v37, %s5103_s14 }
 0x1c2   : > { %v1048_v11 = vpop.permute.xlu1 %1047  ;;  %v1050_v25 = vpop.permute.xlu0 %1049 }
 0x1c3   : > { %1187 = vst.msk [vmem:[#allocation4 + $0x27] sm:$0xff] %vm1179_vm11, %v1048_v11 }
 0x1c4   : > { %1262 = vrot.lane.b32.xlu1 %v5692_v52, %s5103_s14  ;;  %1188 = vst.msk [vmem:[#allocation4 + $0x2f] sm:$0x1] %vm8378_vm12, %v1050_v25  ;;  %1264 = vrot.lane.b32.xlu0 %v5541_v38, %s5103_s14 }
 0x1c6   : > { %v1052_v53 = vpop.permute.xlu1 %1051  ;;  %v1054_v26 = vpop.permute.xlu0 %1053 }
 0x1c7   : > { %1189 = vst.msk [vmem:[#allocation4 + $0x2f] sm:$0xfe] %vm1177_vm10, %v1052_v53  ;;  %v6274_v53 = vld [vmem:[#allocation2 + $0x148] sm:$0x3] }
 0x1c8   : > { %1266 = vrot.lane.b32.xlu1 %v5543_v39, %s5103_s14  ;;  %1190 = vst.msk [vmem:[#allocation4 + $0x37] sm:$0xff] %vm1179_vm11, %v1054_v26  ;;  %1268 = vrot.lane.b32.xlu0 %v5700_v51, %s5103_s14 }
 0x1ca   : > { %v1056_v21 = vpop.permute.xlu1 %1055  ;;  %v1058_v52 = vpop.permute.xlu0 %1057 }
 0x1cb   : > { %1191 = vst.msk [vmem:[#allocation4 + $0x3f] sm:$0x1] %vm8378_vm12, %v1056_v21 }
 0x1cc   : > { %1270 = vrot.lane.b32.xlu1 %v5551_v40, %s5103_s14  ;;  %1192 = vst.msk [vmem:[#allocation4 + $0x3f] sm:$0xfe] %vm1177_vm10, %v1058_v52  ;;  %1272 = vrot.lane.b32.xlu0 %v5553_v41, %s5103_s14 }
 0x1ce   : > { %v1060_v17 = vpop.permute.xlu1 %1059  ;;  %v1062_v16 = vpop.permute.xlu0 %1061 }
 0x1cf   : > { %1193 = vst.msk [vmem:[#allocation4 + $0x47] sm:$0xff] %vm1179_vm11, %v1060_v17  ;;  %v6285_v17 = vld [vmem:[#allocation2 + $0x160] sm:$0x3] }
 0x1d0   : > { %1274 = vrot.lane.b32.xlu1 %v5708_v50, %s5103_s14  ;;  %1194 = vst.msk [vmem:[#allocation4 + $0x4f] sm:$0x1] %vm8378_vm12, %v1062_v16  ;;  %1276 = vrot.lane.b32.xlu0 %v5561_v43, %s5103_s14 }
 0x1d2   : > { %v1064_v51 = vpop.permute.xlu1 %1063  ;;  %v1066_v42 = vpop.permute.xlu0 %1065 }
 0x1d3   : > { %1195 = vst.msk [vmem:[#allocation4 + $0x4f] sm:$0xfe] %vm1177_vm10, %v1064_v51 }
 0x1d4   : > { %1278 = vrot.lane.b32.xlu1 %v5563_v44, %s5103_s14  ;;  %1196 = vst.msk [vmem:[#allocation4 + $0x57] sm:$0xff] %vm1179_vm11, %v1066_v42  ;;  %1280 = vrot.lane.b32.xlu0 %v5716_v49, %s5103_s14  ;;  %v6296_v42 = vld [vmem:[#allocation2 + $0x178] sm:$0x3] }
 0x1d6   : > { %v1068_v20 = vpop.permute.xlu1 %1067  ;;  %v1070_v50 = vpop.permute.xlu0 %1069 }
 0x1d7   : > { %1197 = vst.msk [vmem:[#allocation4 + $0x5f] sm:$0x1] %vm8378_vm12, %v1068_v20 }
 0x1d8   : > { %1282 = vrot.lane.b32.xlu1 %v5571_v45, %s5103_s14  ;;  %1198 = vst.msk [vmem:[#allocation4 + $0x5f] sm:$0xfe] %vm1177_vm10, %v1070_v50  ;;  %1284 = vrot.lane.b32.xlu0 %v5573_v46, %s5103_s14 }
 0x1da   : > { %v1072_v18 = vpop.permute.xlu1 %1071  ;;  %v1074_v57 = vpop.permute.xlu0 %1073 }
 0x1db   : > { %1199 = vst.msk [vmem:[#allocation4 + $0x67] sm:$0xff] %vm1179_vm11, %v1072_v18 }
 0x1dc   : > { %1286 = vrot.lane.b32.xlu1 %v5724_v48, %s5103_s14  ;;  %1200 = vst.msk [vmem:[#allocation4 + $0x6f] sm:$0x1] %vm8378_vm12, %v1074_v57  ;;  %1288 = vrot.lane.b32.xlu0 %v5579_v47, %s5103_s14 }
 0x1de   : > { %v1076_v49 = vpop.permute.xlu1 %1075  ;;  %v1078_v22 = vpop.permute.xlu0 %1077 }
 0x1df   : > { %1201 = vst.msk [vmem:[#allocation4 + $0x6f] sm:$0xfe] %vm1177_vm10, %v1076_v49 }
 0x1e0   : > { %1290 = vrot.lane.b32.xlu1 %v5638_v58, %s5103_s14  ;;  %1202 = vst.msk [vmem:[#allocation4 + $0x77] sm:$0xff] %vm1179_vm11, %v1078_v22  ;;  %1292 = vrot.lane.b32.xlu0 %v5732_v24, %s5103_s14 }
 0x1e2   : > { %v1080_v29 = vpop.permute.xlu1 %1079  ;;  %v1082_v48 = vpop.permute.xlu0 %1081 }
 0x1e3   : > { %1203 = vst.msk [vmem:[#allocation4 + $0x7f] sm:$0x1] %vm8378_vm12, %v1080_v29 }
 0x1e4   : > { %1294 = vrot.lane.b32.xlu1 %v5640_v59, %s5103_s14  ;;  %1204 = vst.msk [vmem:[#allocation4 + $0x7f] sm:$0xfe] %vm1177_vm10, %v1082_v48  ;;  %1296 = vrot.lane.b32.xlu0 %v5648_v60, %s5103_s14 }
 0x1e6   : > { %v1084_v62 = vpop.permute.xlu1 %1083  ;;  %v1086_v11 = vpop.permute.xlu0 %1085 }
 0x1e7   : > { %1205 = vst.msk [vmem:[#allocation4 + $0x87] sm:$0xff] %vm1179_vm11, %v1084_v62 }
 0x1e8   : > { %1298 = vrot.lane.b32.xlu1 %v5740_v23, %s5103_s14  ;;  %1206 = vst.msk [vmem:[#allocation4 + $0x8f] sm:$0x1] %vm8378_vm12, %v1086_v11  ;;  %1300 = vrot.lane.b32.xlu0 %v5650_v61, %s5103_s14 }
 0x1ea   : > { %v1088_v24 = vpop.permute.xlu1 %1087  ;;  %v1090_v25 = vpop.permute.xlu0 %1089 }
 0x1eb   : > { %1207 = vst.msk [vmem:[#allocation4 + $0x8f] sm:$0xfe] %vm1177_vm10, %v1088_v24 }
 0x1ec   : > { %1302 = vrot.lane.b32.xlu1 %v5658_v63, %s5103_s14  ;;  %1208 = vst.msk [vmem:[#allocation4 + $0x97] sm:$0xff] %vm1179_vm11, %v1090_v25  ;;  %1304 = vrot.lane.b32.xlu0 %v6274_v53, %s5103_s14 }
 0x1ee   : > { %v1092_v23 = vpop.permute.xlu1 %1091  ;;  %v1094_v26 = vpop.permute.xlu0 %1093 }
 0x1ef   : > { %1209 = vst.msk [vmem:[#allocation4 + $0x9f] sm:$0x1] %vm8378_vm12, %v1092_v23 }
 0x1f0   : > { %1306 = vrot.lane.b32.xlu1 %v5660_v0, %s5103_s14  ;;  %1210 = vst.msk [vmem:[#allocation4 + $0x9f] sm:$0xfe] %vm1177_vm10, %v1094_v26  ;;  %1308 = vrot.lane.b32.xlu0 %v5668_v56, %s5103_s14 }
 0x1f2   : > { %v1096_v21 = vpop.permute.xlu1 %1095  ;;  %v1098_v52 = vpop.permute.xlu0 %1097 }
 0x1f3   : > { %1211 = vst.msk [vmem:[#allocation4 + $0xa7] sm:$0xff] %vm1179_vm11, %v1096_v21 }
 0x1f4   : > { %1310 = vrot.lane.b32.xlu1 %v6285_v17, %s5103_s14  ;;  %1212 = vst.msk [vmem:[#allocation4 + $0xaf] sm:$0x1] %vm8378_vm12, %v1098_v52  ;;  %1312 = vrot.lane.b32.xlu0 %v5670_v55, %s5103_s14 }
 0x1f6   : > { %v1100_v16 = vpop.permute.xlu1 %1099  ;;  %v1102_v51 = vpop.permute.xlu0 %1101 }
 0x1f7   : > { %1213 = vst.msk [vmem:[#allocation4 + $0xaf] sm:$0xfe] %vm1177_vm10, %v1100_v16 }
 0x1f8   : > { %1314 = vrot.lane.b32.xlu1 %v5676_v54, %s5103_s14  ;;  %1214 = vst.msk [vmem:[#allocation4 + $0xb7] sm:$0xff] %vm1179_vm11, %v1102_v51  ;;  %1316 = vrot.lane.b32.xlu0 %v6296_v42, %s5103_s14 }
 0x1fa   : > { %v1104_v20 = vpop.permute.xlu1 %1103  ;;  %v1106_v50 = vpop.permute.xlu0 %1105 }
 0x1fb   : > { %1215 = vst.msk [vmem:[#allocation4 + $0xbf] sm:$0x1] %vm8378_vm12, %v1104_v20 }
 0x1fc   : > { %1318 = vrot.lane.b32.xlu1 %v6002_v7, %s5103_s14  ;;  %1216 = vst.msk [vmem:[#allocation4 + $0xbf] sm:$0xfe] %vm1177_vm10, %v1106_v50  ;;  %1320 = vrot.lane.b32.xlu0 %v6007_v10, %s5103_s14 }
 0x1fe   : > { %v1108_v18 = vpop.permute.xlu1 %1107  ;;  %v1110_v57 = vpop.permute.xlu0 %1109 }
 0x1ff   : > { %1217 = vst.msk [vmem:[#allocation4 + $0xc7] sm:$0xff] %vm1179_vm11, %v1108_v18 }
 0x200   : > { %1322 = vrot.lane.b32.xlu1 %v6153_v19, %s5103_s14  ;;  %1218 = vst.msk [vmem:[#allocation4 + $0xcf] sm:$0x1] %vm8378_vm12, %v1110_v57  ;;  %1425 = vrot.lane.b32.xlu0 %v5495_v27, %s5104_s15 }
 0x202   : > { %v1112_v49 = vpop.permute.xlu1 %1111  ;;  %v1114_v22 = vpop.permute.xlu0 %1113 }
 0x203   : > { %1219 = vst.msk [vmem:[#allocation4 + $0xcf] sm:$0xfe] %vm1177_vm10, %v1112_v49 }
 0x204   : > { %1427 = vrot.lane.b32.xlu1 %v5497_v28, %s5104_s15  ;;  %1220 = vst.msk [vmem:[#allocation4 + $0xd7] sm:$0xff] %vm1179_vm11, %v1114_v22  ;;  %1429 = vrot.lane.b32.xlu0 %v5505_v30, %s5104_s15 }
 0x206   : > { %v1116_v29 = vpop.permute.xlu1 %1115  ;;  %v1118_v48 = vpop.permute.xlu0 %1117 }
 0x207   : > { %1221 = vst.msk [vmem:[#allocation4 + $0xdf] sm:$0x1] %vm8378_vm12, %v1116_v29 }
 0x208   : > { %1431 = vrot.lane.b32.xlu1 %v5507_v31, %s5104_s15  ;;  %1222 = vst.msk [vmem:[#allocation4 + $0xdf] sm:$0xfe] %vm1177_vm10, %v1118_v48  ;;  %1433 = vrot.lane.b32.xlu0 %v5515_v32, %s5104_s15 }
 0x20a   : > { %v1120_v62 = vpop.permute.xlu1 %1119  ;;  %v1122_v11 = vpop.permute.xlu0 %1121 }
 0x20b   : > { %1223 = vst.msk [vmem:[#allocation4 + $0xe7] sm:$0xff] %vm1179_vm11, %v1120_v62 }
 0x20c   : > { %1435 = vrot.lane.b32.xlu1 %v5517_v33, %s5104_s15  ;;  %1224 = vst.msk [vmem:[#allocation4 + $0xef] sm:$0x1] %vm8378_vm12, %v1122_v11  ;;  %1437 = vrot.lane.b32.xlu0 %v5523_v34, %s5104_s15 }
 0x20e   : > { %v1124_v24 = vpop.permute.xlu1 %1123  ;;  %v1126_v25 = vpop.permute.xlu0 %1125 }
 0x20f   : > { %1225 = vst.msk [vmem:[#allocation4 + $0xef] sm:$0xfe] %vm1177_vm10, %v1124_v24 }
 0x210   : > { %1439 = vrot.lane.b32.xlu1 %v5525_v35, %s5104_s15  ;;  %1226 = vst.msk [vmem:[#allocation4 + $0xf7] sm:$0xff] %vm1179_vm11, %v1126_v25  ;;  %1441 = vrot.lane.b32.xlu0 %v5533_v36, %s5104_s15 }
 0x212   : > { %v1128_v23 = vpop.permute.xlu1 %1127  ;;  %v1229_v26 = vpop.permute.xlu0 %1228 }
 0x213   : > { %1227 = vst.msk [vmem:[#allocation4 + $0xff] sm:$0x1] %vm8378_vm12, %v1128_v23  ;;  %vm8380_vm12 = vcmask 288000  }
 0x214   : > { %1443 = vrot.lane.b32.xlu1 %v5535_v37, %s5104_s15  ;;  %1373 = vst.msk [vmem:[#allocation4 - $0x2] sm:$0xfc] %vm8377_vm13, %v1229_v26  ;;  %1445 = vrot.lane.b32.xlu0 %v5541_v38, %s5104_s15 }
 0x216   : > { %v1231_v21 = vpop.permute.xlu1 %1230  ;;  %v1233_v52 = vpop.permute.xlu0 %1232 }
 0x217   : > { %1375 = vst.msk [vmem:[#allocation4 + $0x6] sm:$0xff] %vm8375_vm14, %v1231_v21 }
 0x218   : > { %1447 = vrot.lane.b32.xlu1 %v5543_v39, %s5104_s15  ;;  %1377 = vst.msk [vmem:[#allocation4 + $0xe] sm:$0x3] %vm8374_vm15, %v1233_v52  ;;  %1449 = vrot.lane.b32.xlu0 %v5551_v40, %s5104_s15  ;;  %v6397_v52 = vld [vmem:[#allocation2 + $0x198] sm:$0xff] }
 0x21a   : > { %v1235_v16 = vpop.permute.xlu1 %1234  ;;  %v1237_v51 = vpop.permute.xlu0 %1236 }
 0x21b   : > { %1378 = vst.msk [vmem:[#allocation4 + $0xe] sm:$0xfc] %vm8377_vm13, %v1235_v16 }
 0x21c   : > { %1451 = vrot.lane.b32.xlu1 %v5553_v41, %s5104_s15  ;;  %1379 = vst.msk [vmem:[#allocation4 + $0x16] sm:$0xff] %vm8375_vm14, %v1237_v51  ;;  %1453 = vrot.lane.b32.xlu0 %v5561_v43, %s5104_s15  ;;  %v6402_v51 = vld [vmem:[#allocation2 + $0x1a0] sm:$0xff] }
 0x21e   : > { %v1239_v20 = vpop.permute.xlu1 %1238  ;;  %v1241_v50 = vpop.permute.xlu0 %1240 }
 0x21f   : > { %1380 = vst.msk [vmem:[#allocation4 + $0x1e] sm:$0x3] %vm8374_vm15, %v1239_v20 }
 0x220   : > { %1455 = vrot.lane.b32.xlu1 %v5563_v44, %s5104_s15  ;;  %1381 = vst.msk [vmem:[#allocation4 + $0x1e] sm:$0xfc] %vm8377_vm13, %v1241_v50  ;;  %1457 = vrot.lane.b32.xlu0 %v5571_v45, %s5104_s15 }
 0x222   : > { %v1243_v18 = vpop.permute.xlu1 %1242  ;;  %v1245_v57 = vpop.permute.xlu0 %1244 }
 0x223   : > { %1382 = vst.msk [vmem:[#allocation4 + $0x26] sm:$0xff] %vm8375_vm14, %v1243_v18  ;;  %v6416_v18 = vld [vmem:[#allocation2 + $0x40] sm:$0x3] }
 0x224   : > { %1459 = vrot.lane.b32.xlu1 %v5573_v46, %s5104_s15  ;;  %1383 = vst.msk [vmem:[#allocation4 + $0x2e] sm:$0x3] %vm8374_vm15, %v1245_v57  ;;  %1461 = vrot.lane.b32.xlu0 %v5579_v47, %s5104_s15 }
 0x226   : > { %v1247_v49 = vpop.permute.xlu1 %1246  ;;  %v1249_v22 = vpop.permute.xlu0 %1248 }
 0x227   : > { %1384 = vst.msk [vmem:[#allocation4 + $0x2e] sm:$0xfc] %vm8377_vm13, %v1247_v49 }
 0x228   : > { %1463 = vrot.lane.b32.xlu1 %v5638_v58, %s5104_s15  ;;  %1385 = vst.msk [vmem:[#allocation4 + $0x36] sm:$0xff] %vm8375_vm14, %v1249_v22  ;;  %1465 = vrot.lane.b32.xlu0 %v5640_v59, %s5104_s15 }
 0x22a   : > { %v1251_v29 = vpop.permute.xlu1 %1250  ;;  %v1253_v48 = vpop.permute.xlu0 %1252 }
 0x22b   : > { %1386 = vst.msk [vmem:[#allocation4 + $0x3e] sm:$0x3] %vm8374_vm15, %v1251_v29 }
 0x22c   : > { %1467 = vrot.lane.b32.xlu1 %v5648_v60, %s5104_s15  ;;  %1387 = vst.msk [vmem:[#allocation4 + $0x3e] sm:$0xfc] %vm8377_vm13, %v1253_v48  ;;  %1469 = vrot.lane.b32.xlu0 %v5650_v61, %s5104_s15  ;;  %v6427_v48 = vld [vmem:[#allocation2 + $0x58] sm:$0x3] }
 0x22e   : > { %v1255_v62 = vpop.permute.xlu1 %1254  ;;  %v1257_v11 = vpop.permute.xlu0 %1256 }
 0x22f   : > { %1388 = vst.msk [vmem:[#allocation4 + $0x46] sm:$0xff] %vm8375_vm14, %v1255_v62 }
 0x230   : > { %1471 = vrot.lane.b32.xlu1 %v5658_v63, %s5104_s15  ;;  %1389 = vst.msk [vmem:[#allocation4 + $0x4e] sm:$0x3] %vm8374_vm15, %v1257_v11  ;;  %1473 = vrot.lane.b32.xlu0 %v5660_v0, %s5104_s15 }
 0x232   : > { %v1259_v24 = vpop.permute.xlu1 %1258  ;;  %v1261_v25 = vpop.permute.xlu0 %1260 }
 0x233   : > { %1390 = vst.msk [vmem:[#allocation4 + $0x4e] sm:$0xfc] %vm8377_vm13, %v1259_v24  ;;  %v6438_v24 = vld [vmem:[#allocation2 + $0x70] sm:$0x3] }
 0x234   : > { %1475 = vrot.lane.b32.xlu1 %v5668_v56, %s5104_s15  ;;  %1391 = vst.msk [vmem:[#allocation4 + $0x56] sm:$0xff] %vm8375_vm14, %v1261_v25  ;;  %1477 = vrot.lane.b32.xlu0 %v5670_v55, %s5104_s15 }
 0x236   : > { %v1263_v23 = vpop.permute.xlu1 %1262  ;;  %v1265_v26 = vpop.permute.xlu0 %1264 }
 0x237   : > { %1392 = vst.msk [vmem:[#allocation4 + $0x5e] sm:$0x3] %vm8374_vm15, %v1263_v23 }
 0x238   : > { %1479 = vrot.lane.b32.xlu1 %v5676_v54, %s5104_s15  ;;  %1393 = vst.msk [vmem:[#allocation4 + $0x5e] sm:$0xfc] %vm8377_vm13, %v1265_v26  ;;  %1481 = vrot.lane.b32.xlu0 %v6002_v7, %s5104_s15 }
 0x23a   : > { %v1267_v21 = vpop.permute.xlu1 %1266  ;;  %v1269_v16 = vpop.permute.xlu0 %1268 }
 0x23b   : > { %1394 = vst.msk [vmem:[#allocation4 + $0x66] sm:$0xff] %vm8375_vm14, %v1267_v21 }
 0x23c   : > { %1483 = vrot.lane.b32.xlu1 %v6007_v10, %s5104_s15  ;;  %1395 = vst.msk [vmem:[#allocation4 + $0x6e] sm:$0x3] %vm8374_vm15, %v1269_v16  ;;  %1485 = vrot.lane.b32.xlu0 %v6397_v52, %s5104_s15  ;;  %v6449_v16 = vld [vmem:[#allocation2 + $0x88] sm:$0x3] }
 0x23e   : > { %v1271_v20 = vpop.permute.xlu1 %1270  ;;  %v1273_v7 = vpop.permute.xlu0 %1272 }
 0x23f   : > { %1396 = vst.msk [vmem:[#allocation4 + $0x6e] sm:$0xfc] %vm8377_vm13, %v1271_v20 }
 0x240   : > { %1487 = vrot.lane.b32.xlu1 %v6402_v51, %s5104_s15  ;;  %1397 = vst.msk [vmem:[#allocation4 + $0x76] sm:$0xff] %vm8375_vm14, %v1273_v7  ;;  %1555 = vrot.lane.b32.xlu0 %v5495_v27, %s5105_s16 }
 0x242   : > { %v1275_v10 = vpop.permute.xlu1 %1274  ;;  %v1277_v50 = vpop.permute.xlu0 %1276 }
 0x243   : > { %1398 = vst.msk [vmem:[#allocation4 + $0x7e] sm:$0x3] %vm8374_vm15, %v1275_v10  ;;  %v6460_v10 = vld [vmem:[#allocation2 + $0xa0] sm:$0x3] }
 0x244   : > { %1557 = vrot.lane.b32.xlu1 %v5497_v28, %s5105_s16  ;;  %1399 = vst.msk [vmem:[#allocation4 + $0x7e] sm:$0xfc] %vm8377_vm13, %v1277_v50  ;;  %1559 = vrot.lane.b32.xlu0 %v6416_v18, %s5105_s16 }
 0x246   : > { %v1279_v57 = vpop.permute.xlu1 %1278  ;;  %v1281_v49 = vpop.permute.xlu0 %1280 }
 0x247   : > { %1400 = vst.msk [vmem:[#allocation4 + $0x86] sm:$0xff] %vm8375_vm14, %v1279_v57 }
 0x248   : > { %1561 = vrot.lane.b32.xlu1 %v5505_v30, %s5105_s16  ;;  %1401 = vst.msk [vmem:[#allocation4 + $0x8e] sm:$0x3] %vm8374_vm15, %v1281_v49  ;;  %1563 = vrot.lane.b32.xlu0 %v5507_v31, %s5105_s16 }
 0x24a   : > { %v1283_v22 = vpop.permute.xlu1 %1282  ;;  %v1285_v29 = vpop.permute.xlu0 %1284 }
 0x24b   : > { %1402 = vst.msk [vmem:[#allocation4 + $0x8e] sm:$0xfc] %vm8377_vm13, %v1283_v22 }
 0x24c   : > { %1565 = vrot.lane.b32.xlu1 %v6427_v48, %s5105_s16  ;;  %1403 = vst.msk [vmem:[#allocation4 + $0x96] sm:$0xff] %vm8375_vm14, %v1285_v29  ;;  %1567 = vrot.lane.b32.xlu0 %v5515_v32, %s5105_s16  ;;  %v6471_v29 = vld [vmem:[#allocation2 + $0xb8] sm:$0x3] }
 0x24e   : > { %v1287_v62 = vpop.permute.xlu1 %1286  ;;  %v1289_v11 = vpop.permute.xlu0 %1288 }
 0x24f   : > { %1404 = vst.msk [vmem:[#allocation4 + $0x9e] sm:$0x3] %vm8374_vm15, %v1287_v62 }
 0x250   : > { %1569 = vrot.lane.b32.xlu1 %v5517_v33, %s5105_s16  ;;  %1405 = vst.msk [vmem:[#allocation4 + $0x9e] sm:$0xfc] %vm8377_vm13, %v1289_v11  ;;  %1571 = vrot.lane.b32.xlu0 %v6438_v24, %s5105_s16 }
 0x252   : > { %v1291_v25 = vpop.permute.xlu1 %1290  ;;  %v1293_v23 = vpop.permute.xlu0 %1292 }
 0x253   : > { %1406 = vst.msk [vmem:[#allocation4 + $0xa6] sm:$0xff] %vm8375_vm14, %v1291_v25  ;;  %v6482_v25 = vld [vmem:[#allocation2 + $0xd0] sm:$0x3] }
 0x254   : > { %1573 = vrot.lane.b32.xlu1 %v5523_v34, %s5105_s16  ;;  %1407 = vst.msk [vmem:[#allocation4 + $0xae] sm:$0x3] %vm8374_vm15, %v1293_v23  ;;  %1575 = vrot.lane.b32.xlu0 %v5525_v35, %s5105_s16 }
 0x256   : > { %v1295_v26 = vpop.permute.xlu1 %1294  ;;  %v1297_v21 = vpop.permute.xlu0 %1296 }
 0x257   : > { %1408 = vst.msk [vmem:[#allocation4 + $0xae] sm:$0xfc] %vm8377_vm13, %v1295_v26 }
 0x258   : > { %1577 = vrot.lane.b32.xlu1 %v6449_v16, %s5105_s16  ;;  %1409 = vst.msk [vmem:[#allocation4 + $0xb6] sm:$0xff] %vm8375_vm14, %v1297_v21  ;;  %1579 = vrot.lane.b32.xlu0 %v5533_v36, %s5105_s16 }
 0x25a   : > { %v1299_v20 = vpop.permute.xlu1 %1298  ;;  %v1301_v7 = vpop.permute.xlu0 %1300 }
 0x25b   : > { %1410 = vst.msk [vmem:[#allocation4 + $0xbe] sm:$0x3] %vm8374_vm15, %v1299_v20 }
 0x25c   : > { %1581 = vrot.lane.b32.xlu1 %v5535_v37, %s5105_s16  ;;  %1411 = vst.msk [vmem:[#allocation4 + $0xbe] sm:$0xfc] %vm8377_vm13, %v1301_v7  ;;  %1583 = vrot.lane.b32.xlu0 %v6460_v10, %s5105_s16  ;;  %v6493_v7 = vld [vmem:[#allocation2 + $0xe8] sm:$0x3] }
 0x25e   : > { %v1303_v50 = vpop.permute.xlu1 %1302  ;;  %v1305_v57 = vpop.permute.xlu0 %1304 }
 0x25f   : > { %1412 = vst.msk [vmem:[#allocation4 + $0xc6] sm:$0xff] %vm8375_vm14, %v1303_v50 }
 0x260   : > { %1585 = vrot.lane.b32.xlu1 %v5541_v38, %s5105_s16  ;;  %1413 = vst.msk [vmem:[#allocation4 + $0xce] sm:$0x3] %vm8374_vm15, %v1305_v57  ;;  %1587 = vrot.lane.b32.xlu0 %v5543_v39, %s5105_s16 }
 0x262   : > { %v1307_v49 = vpop.permute.xlu1 %1306  ;;  %v1309_v22 = vpop.permute.xlu0 %1308 }
 0x263   : > { %1414 = vst.msk [vmem:[#allocation4 + $0xce] sm:$0xfc] %vm8377_vm13, %v1307_v49  ;;  %v6504_v49 = vld [vmem:[#allocation2 + $0x100] sm:$0x3] }
 0x264   : > { %1589 = vrot.lane.b32.xlu1 %v6471_v29, %s5105_s16  ;;  %1415 = vst.msk [vmem:[#allocation4 + $0xd6] sm:$0xff] %vm8375_vm14, %v1309_v22  ;;  %1591 = vrot.lane.b32.xlu0 %v5551_v40, %s5105_s16 }
 0x266   : > { %v1311_v62 = vpop.permute.xlu1 %1310  ;;  %v1313_v11 = vpop.permute.xlu0 %1312 }
 0x267   : > { %1416 = vst.msk [vmem:[#allocation4 + $0xde] sm:$0x3] %vm8374_vm15, %v1311_v62 }
 0x268   : > { %1593 = vrot.lane.b32.xlu1 %v5553_v41, %s5105_s16  ;;  %1417 = vst.msk [vmem:[#allocation4 + $0xde] sm:$0xfc] %vm8377_vm13, %v1313_v11  ;;  %1595 = vrot.lane.b32.xlu0 %v6482_v25, %s5105_s16 }
 0x26a   : > { %v1315_v23 = vpop.permute.xlu1 %1314  ;;  %v1317_v26 = vpop.permute.xlu0 %1316 }
 0x26b   : > { %1418 = vst.msk [vmem:[#allocation4 + $0xe6] sm:$0xff] %vm8375_vm14, %v1315_v23 }
 0x26c   : > { %1597 = vrot.lane.b32.xlu1 %v5561_v43, %s5105_s16  ;;  %1419 = vst.msk [vmem:[#allocation4 + $0xee] sm:$0x3] %vm8374_vm15, %v1317_v26  ;;  %1599 = vrot.lane.b32.xlu0 %v5563_v44, %s5105_s16  ;;  %v6515_v26 = vld [vmem:[#allocation2 + $0x118] sm:$0x3] }
 0x26e   : > { %v1319_v21 = vpop.permute.xlu1 %1318  ;;  %v1321_v20 = vpop.permute.xlu0 %1320 }
 0x26f   : > { %1420 = vst.msk [vmem:[#allocation4 + $0xee] sm:$0xfc] %vm8377_vm13, %v1319_v21  ;;  %vm8381_vm13 = vcmask 294144  }
 0x270   : > { %1601 = vrot.lane.b32.xlu1 %v6493_v7, %s5105_s16  ;;  %1421 = vst.msk [vmem:[#allocation4 + $0xf6] sm:$0xff] %vm8375_vm14, %v1321_v20  ;;  %1603 = vrot.lane.b32.xlu0 %v5571_v45, %s5105_s16  ;;  %vm1703_vm14 = vcmask 254176  }
 0x272   : > { %v1323_v50 = vpop.permute.xlu1 %1322  ;;  %v1426_v57 = vpop.permute.xlu0 %1425 }
 0x273   : > { %1422 = vst.msk [vmem:[#allocation4 + $0xfe] sm:$0x3] %vm8374_vm15, %v1323_v50  ;;  %v6526_v50 = vld [vmem:[#allocation2 + $0x130] sm:$0x3]  ;;  %vm8379_vm15 = vcmask 261344  }
 0x274   : > { %1605 = vrot.lane.b32.xlu1 %v5573_v46, %s5105_s16  ;;  %1522 = vst.msk [vmem:[#allocation4] sm:$0xff] %vm8376_vm1, %v1426_v57  ;;  %1607 = vrot.lane.b32.xlu0 %v6504_v49, %s5105_s16 }
 0x276   : > { %v1428_v22 = vpop.permute.xlu1 %1427  ;;  %v1430_v62 = vpop.permute.xlu0 %1429 }
 0x277   : > { %1523 = vst.msk [vmem:[#allocation4 + $0x8] sm:$0xff] %vm8376_vm1, %v1428_v22  ;;  %1524 = vst.msk [vmem:[#allocation4 + $0x10] sm:$0xff] %vm8376_vm1, %v1430_v62 }
 0x278   : > { %1609 = vrot.lane.b32.xlu1 %v5579_v47, %s5105_s16  ;;  %1611 = vrot.lane.b32.xlu0 %v5638_v58, %s5105_s16 }
 0x27a   : > { %v1432_v11 = vpop.permute.xlu1 %1431  ;;  %v1434_v23 = vpop.permute.xlu0 %1433 }
 0x27b   : > { %1525 = vst.msk [vmem:[#allocation4 + $0x18] sm:$0xff] %vm8376_vm1, %v1432_v11  ;;  %1526 = vst.msk [vmem:[#allocation4 + $0x20] sm:$0xff] %vm8376_vm1, %v1434_v23 }
 0x27c   : > { %1613 = vrot.lane.b32.xlu1 %v6515_v26, %s5105_s16  ;;  %1615 = vrot.lane.b32.xlu0 %v5640_v59, %s5105_s16 }
 0x27e   : > { %v1436_v21 = vpop.permute.xlu1 %1435  ;;  %v1438_v20 = vpop.permute.xlu0 %1437 }
 0x27f   : > { %1527 = vst.msk [vmem:[#allocation4 + $0x28] sm:$0xff] %vm8376_vm1, %v1436_v21  ;;  %1528 = vst.msk [vmem:[#allocation4 + $0x30] sm:$0xff] %vm8376_vm1, %v1438_v20 }
 0x280   : > { %1617 = vrot.lane.b32.xlu1 %v5648_v60, %s5105_s16  ;;  %1619 = vrot.lane.b32.xlu0 %v6526_v50, %s5105_s16 }
 0x282   : > { %v1440_v57 = vpop.permute.xlu1 %1439  ;;  %v1442_v22 = vpop.permute.xlu0 %1441 }
 0x283   : > { %1529 = vst.msk [vmem:[#allocation4 + $0x38] sm:$0xff] %vm8376_vm1, %v1440_v57  ;;  %1530 = vst.msk [vmem:[#allocation4 + $0x40] sm:$0xff] %vm8376_vm1, %v1442_v22 }
 0x284   : > { %1621 = vrot.lane.b32.xlu1 %v5650_v61, %s5105_s16  ;;  %1623 = vrot.lane.b32.xlu0 %v5658_v63, %s5105_s16 }
 0x286   : > { %v1444_v62 = vpop.permute.xlu1 %1443  ;;  %v1446_v11 = vpop.permute.xlu0 %1445 }
 0x287   : > { %1531 = vst.msk [vmem:[#allocation4 + $0x48] sm:$0xff] %vm8376_vm1, %v1444_v62  ;;  %1532 = vst.msk [vmem:[#allocation4 + $0x50] sm:$0xff] %vm8376_vm1, %v1446_v11  ;;  %v1977_v11 = vld [vmem:[%s8347_s1] sm:$0xff] }
 0x288   : > { %1625 = vrot.lane.b32.xlu1 %v6274_v53, %s5105_s16  ;;  %1627 = vrot.lane.b32.xlu0 %v5660_v0, %s5105_s16 }
 0x28a   : > { %v1448_v23 = vpop.permute.xlu1 %1447  ;;  %v1450_v21 = vpop.permute.xlu0 %1449 }
 0x28b   : > { %1533 = vst.msk [vmem:[#allocation4 + $0x58] sm:$0xff] %vm8376_vm1, %v1448_v23  ;;  %1534 = vst.msk [vmem:[#allocation4 + $0x60] sm:$0xff] %vm8376_vm1, %v1450_v21  ;;  %v1978_v23 = vld [vmem:[%s8347_s1 + $0x8] sm:$0xff] }
 0x28c   : > { %1629 = vrot.lane.b32.xlu1 %v5668_v56, %s5105_s16  ;;  %1631 = vrot.lane.b32.xlu0 %v6285_v17, %s5105_s16  ;;  %v4933_v21 = vpack.c.bf16 %v1978_v23, %v1977_v11  ;;  %v1980_v11 = vld [vmem:[%s8347_s1 + $0x18] sm:$0xff] }
 0x28e   : > { %v1452_v20 = vpop.permute.xlu1 %1451  ;;  %v1454_v57 = vpop.permute.xlu0 %1453  ;;  %4934 = vmatprep.subr.bf16.mxu0 %v4933_v21 }
 0x28f   : > { %1535 = vst.msk [vmem:[#allocation4 + $0x68] sm:$0xff] %vm8376_vm1, %v1452_v20  ;;  %1536 = vst.msk [vmem:[#allocation4 + $0x70] sm:$0xff] %vm8376_vm1, %v1454_v57  ;;  %v6564_v20 = vld [vmem:[#allocation2 + $0x180] sm:$0xff]  ;;  %4936 = vmatpush3.bf16.msra.mxu0 %v4933_v21  ;;  %v6586_v21 = vld [vmem:[#allocation2 + $0x1a8] sm:$0x3] }
 0x290   : > { %1633 = vrot.lane.b32.xlu1 %v5670_v55, %s5105_s16  ;;  %1635 = vrot.lane.b32.xlu0 %v5676_v54, %s5105_s16 }
 0x292   : > { %v1456_v22 = vpop.permute.xlu1 %1455  ;;  %v1458_v62 = vpop.permute.xlu0 %1457 }
 0x293   : > { %1537 = vst.msk [vmem:[#allocation4 + $0x78] sm:$0xff] %vm8376_vm1, %v1456_v22  ;;  %1538 = vst.msk [vmem:[#allocation4 + $0x80] sm:$0xff] %vm8376_vm1, %v1458_v62  ;;  %v1979_v62 = vld [vmem:[%s8347_s1 + $0x10] sm:$0xff] }
 0x294   : > { %1637 = vrot.lane.b32.xlu1 %v6296_v42, %s5105_s16  ;;  %1639 = vrot.lane.b32.xlu0 %v6564_v20, %s5105_s16  ;;  %v4937_v23 = vpack.c.bf16 %v1980_v11, %v1979_v62 }
 0x296   : > { %v1460_v57 = vpop.permute.xlu1 %1459  ;;  %v1462_v22 = vpop.permute.xlu0 %1461  ;;  %4938 = vmatprep.subr.bf16.mxu0 %v4937_v23 }
 0x297   : > { %1539 = vst.msk [vmem:[#allocation4 + $0x88] sm:$0xff] %vm8376_vm1, %v1460_v57  ;;  %1540 = vst.msk [vmem:[#allocation4 + $0x90] sm:$0xff] %vm8376_vm1, %v1462_v22  ;;  %4940 = vmatpush3.bf16.msra.mxu0 %v4937_v23 }
 0x298   : > { %1641 = vrot.lane.b32.xlu1 %v6569_v15, %s5105_s16  ;;  %1643 = vrot.lane.b32.xlu0 %v6153_v19, %s5105_s16  ;;  %v1981_v19 = vld [vmem:[%s8347_s1 + $0x20] sm:$0xf] }
 0x299   : > { %4825 = vmatprep.subr.msk.mxu0 %vm2086_vm2, %v1981_v19 }
 0x29a   : > { %v1464_v57 = vpop.permute.xlu1 %1463  ;;  %v1466_v14 = vpop.permute.xlu0 %1465 }
 0x29b   : > { %1541 = vst.msk [vmem:[#allocation4 + $0x98] sm:$0xff] %vm8376_vm1, %v1464_v57  ;;  %1542 = vst.msk [vmem:[#allocation4 + $0xa0] sm:$0xff] %vm8376_vm1, %v1466_v14  ;;  %4826 = vmatpush3.msk.msra.mxu0 %vm2086_vm2, %v1981_v19  ;;  %vm1699_vm2 = vcmask 261345  }
 0x29c   : > { %1645 = vrot.lane.b32.xlu1 %v6397_v52, %s5105_s16  ;;  %1647 = vrot.lane.b32.xlu0 %v6402_v51, %s5105_s16 }
 0x29e   : > { %v1468_v22 = vpop.permute.xlu1 %1467  ;;  %v1470_v62 = vpop.permute.xlu0 %1469 }
 0x29f   : > { %1543 = vst.msk [vmem:[#allocation4 + $0xa8] sm:$0xff] %vm8376_vm1, %v1468_v22  ;;  %1544 = vst.msk [vmem:[#allocation4 + $0xb0] sm:$0xff] %vm8376_vm1, %v1470_v62 }
 0x2a0   : > { %1649 = vrot.lane.b32.xlu1 %v6586_v21, %s5105_s16  ;;  %1750 = vrot.lane.b32.xlu0 %v5495_v27, %s5106_s23 }
 0x2a2   : > { %v1472_v14 = vpop.permute.xlu1 %1471  ;;  %v1474_v11 = vpop.permute.xlu0 %1473 }
 0x2a3   : > { %1545 = vst.msk [vmem:[#allocation4 + $0xb8] sm:$0xff] %vm8376_vm1, %v1472_v14  ;;  %1546 = vst.msk [vmem:[#allocation4 + $0xc0] sm:$0xff] %vm8376_vm1, %v1474_v11 }
 0x2a4   : > { %1752 = vrot.lane.b32.xlu1 %v5497_v28, %s5106_s23  ;;  %1754 = vrot.lane.b32.xlu0 %v6416_v18, %s5106_s23 }
 0x2a6   : > { %v1476_v23 = vpop.permute.xlu1 %1475  ;;  %v1478_v57 = vpop.permute.xlu0 %1477 }
 0x2a7   : > { %1547 = vst.msk [vmem:[#allocation4 + $0xc8] sm:$0xff] %vm8376_vm1, %v1476_v23  ;;  %1548 = vst.msk [vmem:[#allocation4 + $0xd0] sm:$0xff] %vm8376_vm1, %v1478_v57 }
 0x2a8   : > { %1756 = vrot.lane.b32.xlu1 %v5505_v30, %s5106_s23  ;;  %1758 = vrot.lane.b32.xlu0 %v5507_v31, %s5106_s23 }
 0x2aa   : > { %v1480_v27 = vpop.permute.xlu1 %1479  ;;  %v1482_v28 = vpop.permute.xlu0 %1481 }
 0x2ab   : > { %1549 = vst.msk [vmem:[#allocation4 + $0xd8] sm:$0xff] %vm8376_vm1, %v1480_v27  ;;  %1550 = vst.msk [vmem:[#allocation4 + $0xe0] sm:$0xff] %vm8376_vm1, %v1482_v28 }
 0x2ac   : > { %1760 = vrot.lane.b32.xlu1 %v6427_v48, %s5106_s23  ;;  %1762 = vrot.lane.b32.xlu0 %v5515_v32, %s5106_s23 }
 0x2ae   : > { %v1484_v18 = vpop.permute.xlu1 %1483  ;;  %v1486_v30 = vpop.permute.xlu0 %1485 }
 0x2af   : > { %1551 = vst.msk [vmem:[#allocation4 + $0xe8] sm:$0xff] %vm8376_vm1, %v1484_v18  ;;  %1552 = vst.msk [vmem:[#allocation4 + $0xf0] sm:$0xff] %vm8376_vm1, %v1486_v30 }
 0x2b0   : > { %1764 = vrot.lane.b32.xlu1 %v5517_v33, %s5106_s23  ;;  %1766 = vrot.lane.b32.xlu0 %v6438_v24, %s5106_s23 }
 0x2b2   : > { %v1488_v31 = vpop.permute.xlu1 %1487  ;;  %v1556_v48 = vpop.permute.xlu0 %1555 }
 0x2b3   : > { %1553 = vst.msk [vmem:[#allocation4 + $0xf8] sm:$0xff] %vm8376_vm1, %v1488_v31  ;;  %vm8382_vm1 = vcmask 294146  }
 0x2b4   : > { %1768 = vrot.lane.b32.xlu1 %v5523_v34, %s5106_s23  ;;  %1700 = vst.msk [vmem:[#allocation4 - $0x1] sm:$0xfe] %vm1699_vm2, %v1556_v48  ;;  %1770 = vrot.lane.b32.xlu0 %v5525_v35, %s5106_s23 }
 0x2b6   : > { %v1558_v32 = vpop.permute.xlu1 %1557  ;;  %v1560_v33 = vpop.permute.xlu0 %1559 }
 0x2b7   : > { %1702 = vst.msk [vmem:[#allocation4 + $0x7] sm:$0xff] %vm8379_vm15, %v1558_v32 }
 0x2b8   : > { %1772 = vrot.lane.b32.xlu1 %v6449_v16, %s5106_s23  ;;  %1704 = vst.msk [vmem:[#allocation4 + $0xf] sm:$0x1] %vm1703_vm14, %v1560_v33  ;;  %1774 = vrot.lane.b32.xlu0 %v5533_v36, %s5106_s23 }
 0x2ba   : > { %v1562_v34 = vpop.permute.xlu1 %1561  ;;  %v1564_v24 = vpop.permute.xlu0 %1563 }
 0x2bb   : > { %1705 = vst.msk [vmem:[#allocation4 + $0xf] sm:$0xfe] %vm1699_vm2, %v1562_v34 }
 0x2bc   : > { %1776 = vrot.lane.b32.xlu1 %v5535_v37, %s5106_s23  ;;  %1706 = vst.msk [vmem:[#allocation4 + $0x17] sm:$0xff] %vm8379_vm15, %v1564_v24  ;;  %1778 = vrot.lane.b32.xlu0 %v6460_v10, %s5106_s23 }
 0x2be   : > { %v1566_v35 = vpop.permute.xlu1 %1565  ;;  %v1568_v16 = vpop.permute.xlu0 %1567 }
 0x2bf   : > { %1707 = vst.msk [vmem:[#allocation4 + $0x1f] sm:$0x1] %vm1703_vm14, %v1566_v35 }
 0x2c0   : > { %1780 = vrot.lane.b32.xlu1 %v5541_v38, %s5106_s23  ;;  %1708 = vst.msk [vmem:[#allocation4 + $0x1f] sm:$0xfe] %vm1699_vm2, %v1568_v16  ;;  %1782 = vrot.lane.b32.xlu0 %v5543_v39, %s5106_s23 }
 0x2c2   : > { %v1570_v36 = vpop.permute.xlu1 %1569  ;;  %v1572_v37 = vpop.permute.xlu0 %1571 }
 0x2c3   : > { %1709 = vst.msk [vmem:[#allocation4 + $0x27] sm:$0xff] %vm8379_vm15, %v1570_v36 }
 0x2c4   : > { %1784 = vrot.lane.b32.xlu1 %v6471_v29, %s5106_s23  ;;  %1710 = vst.msk [vmem:[#allocation4 + $0x2f] sm:$0x1] %vm1703_vm14, %v1572_v37  ;;  %1786 = vrot.lane.b32.xlu0 %v5551_v40, %s5106_s23 }
 0x2c6   : > { %v1574_v10 = vpop.permute.xlu1 %1573  ;;  %v1576_v38 = vpop.permute.xlu0 %1575 }
 0x2c7   : > { %1711 = vst.msk [vmem:[#allocation4 + $0x2f] sm:$0xfe] %vm1699_vm2, %v1574_v10 }
 0x2c8   : > { %1788 = vrot.lane.b32.xlu1 %v5553_v41, %s5106_s23  ;;  %1712 = vst.msk [vmem:[#allocation4 + $0x37] sm:$0xff] %vm8379_vm15, %v1576_v38  ;;  %1790 = vrot.lane.b32.xlu0 %v6482_v25, %s5106_s23 }
 0x2ca   : > { %v1578_v39 = vpop.permute.xlu1 %1577  ;;  %v1580_v29 = vpop.permute.xlu0 %1579 }
 0x2cb   : > { %1713 = vst.msk [vmem:[#allocation4 + $0x3f] sm:$0x1] %vm1703_vm14, %v1578_v39 }
 0x2cc   : > { %1792 = vrot.lane.b32.xlu1 %v5561_v43, %s5106_s23  ;;  %1714 = vst.msk [vmem:[#allocation4 + $0x3f] sm:$0xfe] %vm1699_vm2, %v1580_v29  ;;  %1794 = vrot.lane.b32.xlu0 %v5563_v44, %s5106_s23 }
 0x2ce   : > { %v1582_v40 = vpop.permute.xlu1 %1581  ;;  %v1584_v41 = vpop.permute.xlu0 %1583 }
 0x2cf   : > { %1715 = vst.msk [vmem:[#allocation4 + $0x47] sm:$0xff] %vm8379_vm15, %v1582_v40 }
 0x2d0   : > { %1796 = vrot.lane.b32.xlu1 %v6493_v7, %s5106_s23  ;;  %1716 = vst.msk [vmem:[#allocation4 + $0x4f] sm:$0x1] %vm1703_vm14, %v1584_v41  ;;  %1798 = vrot.lane.b32.xlu0 %v5571_v45, %s5106_s23 }
 0x2d2   : > { %v1586_v25 = vpop.permute.xlu1 %1585  ;;  %v1588_v43 = vpop.permute.xlu0 %1587 }
 0x2d3   : > { %1717 = vst.msk [vmem:[#allocation4 + $0x4f] sm:$0xfe] %vm1699_vm2, %v1586_v25 }
 0x2d4   : > { %1800 = vrot.lane.b32.xlu1 %v5573_v46, %s5106_s23  ;;  %1718 = vst.msk [vmem:[#allocation4 + $0x57] sm:$0xff] %vm8379_vm15, %v1588_v43  ;;  %1802 = vrot.lane.b32.xlu0 %v6504_v49, %s5106_s23 }
 0x2d6   : > { %v1590_v44 = vpop.permute.xlu1 %1589  ;;  %v1592_v7 = vpop.permute.xlu0 %1591 }
 0x2d7   : > { %1719 = vst.msk [vmem:[#allocation4 + $0x5f] sm:$0x1] %vm1703_vm14, %v1590_v44 }
 0x2d8   : > { %1804 = vrot.lane.b32.xlu1 %v5579_v47, %s5106_s23  ;;  %1720 = vst.msk [vmem:[#allocation4 + $0x5f] sm:$0xfe] %vm1699_vm2, %v1592_v7  ;;  %1806 = vrot.lane.b32.xlu0 %v5638_v58, %s5106_s23 }
 0x2da   : > { %v1594_v45 = vpop.permute.xlu1 %1593  ;;  %v1596_v46 = vpop.permute.xlu0 %1595 }
 0x2db   : > { %1721 = vst.msk [vmem:[#allocation4 + $0x67] sm:$0xff] %vm8379_vm15, %v1594_v45 }
 0x2dc   : > { %1808 = vrot.lane.b32.xlu1 %v6515_v26, %s5106_s23  ;;  %1722 = vst.msk [vmem:[#allocation4 + $0x6f] sm:$0x1] %vm1703_vm14, %v1596_v46  ;;  %1810 = vrot.lane.b32.xlu0 %v5640_v59, %s5106_s23 }
 0x2de   : > { %v1598_v49 = vpop.permute.xlu1 %1597  ;;  %v1600_v47 = vpop.permute.xlu0 %1599 }
 0x2df   : > { %1723 = vst.msk [vmem:[#allocation4 + $0x6f] sm:$0xfe] %vm1699_vm2, %v1598_v49 }
 0x2e0   : > { %1812 = vrot.lane.b32.xlu1 %v5648_v60, %s5106_s23  ;;  %1724 = vst.msk [vmem:[#allocation4 + $0x77] sm:$0xff] %vm8379_vm15, %v1600_v47  ;;  %1814 = vrot.lane.b32.xlu0 %v6526_v50, %s5106_s23 }
 0x2e2   : > { %v1602_v58 = vpop.permute.xlu1 %1601  ;;  %v1604_v26 = vpop.permute.xlu0 %1603 }
 0x2e3   : > { %1725 = vst.msk [vmem:[#allocation4 + $0x7f] sm:$0x1] %vm1703_vm14, %v1602_v58 }
 0x2e4   : > { %1816 = vrot.lane.b32.xlu1 %v5650_v61, %s5106_s23  ;;  %1726 = vst.msk [vmem:[#allocation4 + $0x7f] sm:$0xfe] %vm1699_vm2, %v1604_v26  ;;  %1818 = vrot.lane.b32.xlu0 %v5658_v63, %s5106_s23 }
 0x2e6   : > { %v1606_v59 = vpop.permute.xlu1 %1605  ;;  %v1608_v60 = vpop.permute.xlu0 %1607 }
 0x2e7   : > { %1727 = vst.msk [vmem:[#allocation4 + $0x87] sm:$0xff] %vm8379_vm15, %v1606_v59 }
 0x2e8   : > { %1820 = vrot.lane.b32.xlu1 %v6274_v53, %s5106_s23  ;;  %1728 = vst.msk [vmem:[#allocation4 + $0x8f] sm:$0x1] %vm1703_vm14, %v1608_v60  ;;  %1822 = vrot.lane.b32.xlu0 %v5660_v0, %s5106_s23 }
 0x2ea   : > { %v1610_v50 = vpop.permute.xlu1 %1609  ;;  %v1612_v61 = vpop.permute.xlu0 %1611 }
 0x2eb   : > { %1729 = vst.msk [vmem:[#allocation4 + $0x8f] sm:$0xfe] %vm1699_vm2, %v1610_v50 }
 0x2ec   : > { %1824 = vrot.lane.b32.xlu1 %v5668_v56, %s5106_s23  ;;  %1730 = vst.msk [vmem:[#allocation4 + $0x97] sm:$0xff] %vm8379_vm15, %v1612_v61  ;;  %1826 = vrot.lane.b32.xlu0 %v6285_v17, %s5106_s23 }
 0x2ee   : > { %v1614_v63 = vpop.permute.xlu1 %1613  ;;  %v1616_v53 = vpop.permute.xlu0 %1615 }
 0x2ef   : > { %1731 = vst.msk [vmem:[#allocation4 + $0x9f] sm:$0x1] %vm1703_vm14, %v1614_v63 }
 0x2f0   : > { %1828 = vrot.lane.b32.xlu1 %v5670_v55, %s5106_s23  ;;  %1732 = vst.msk [vmem:[#allocation4 + $0x9f] sm:$0xfe] %vm1699_vm2, %v1616_v53  ;;  %1830 = vrot.lane.b32.xlu0 %v5676_v54, %s5106_s23  ;;  %v5015_v54 = vld [vmem:[#allocation2 + $0x190] sm:$0x3] }
 0x2f2   : > { %v1618_v0 = vpop.permute.xlu1 %1617  ;;  %v1620_v56 = vpop.permute.xlu0 %1619 }
 0x2f3   : > { %1733 = vst.msk [vmem:[#allocation4 + $0xa7] sm:$0xff] %vm8379_vm15, %v1618_v0 }
 0x2f4   : > { %1832 = vrot.lane.b32.xlu1 %v6296_v42, %s5106_s23  ;;  %1734 = vst.msk [vmem:[#allocation4 + $0xaf] sm:$0x1] %vm1703_vm14, %v1620_v56  ;;  %1834 = vrot.lane.b32.xlu0 %v6564_v20, %s5106_s23 }
 0x2f6   : > { %v1622_v17 = vpop.permute.xlu1 %1621  ;;  %v1624_v55 = vpop.permute.xlu0 %1623 }
 0x2f7   : > { %1735 = vst.msk [vmem:[#allocation4 + $0xaf] sm:$0xfe] %vm1699_vm2, %v1622_v17 }
 0x2f8   : > { %1836 = vrot.lane.b32.xlu1 %v6569_v15, %s5106_s23  ;;  %1736 = vst.msk [vmem:[#allocation4 + $0xb7] sm:$0xff] %vm8379_vm15, %v1624_v55  ;;  %1838 = vrot.lane.b32.xlu0 %v5015_v54, %s5106_s23 }
 0x2fa   : > { %v1626_v22 = vpop.permute.xlu1 %1625  ;;  %v1628_v42 = vpop.permute.xlu0 %1627 }
 0x2fb   : > { %1737 = vst.msk [vmem:[#allocation4 + $0xbf] sm:$0x1] %vm1703_vm14, %v1626_v22 }
 0x2fc   : > { %1840 = vrot.lane.b32.xlu1 %v6397_v52, %s5106_s23  ;;  %1738 = vst.msk [vmem:[#allocation4 + $0xbf] sm:$0xfe] %vm1699_vm2, %v1628_v42  ;;  %1842 = vrot.lane.b32.xlu0 %v6402_v51, %s5106_s23 }
 0x2fe   : > { %v1630_v20 = vpop.permute.xlu1 %1629  ;;  %v1632_v15 = vpop.permute.xlu0 %1631 }
 0x2ff   : > { %1739 = vst.msk [vmem:[#allocation4 + $0xc7] sm:$0xff] %vm8379_vm15, %v1630_v20 }
 0x300   : > { %1844 = vrot.lane.b32.xlu1 %v6586_v21, %s5106_s23  ;;  %1740 = vst.msk [vmem:[#allocation4 + $0xcf] sm:$0x1] %vm1703_vm14, %v1632_v15 }
 0x302   : > { %v1634_v19 = vpop.permute.xlu1 %1633  ;;  %v1636_v62 = vpop.permute.xlu0 %1635 }
 0x303   : > { %1741 = vst.msk [vmem:[#allocation4 + $0xcf] sm:$0xfe] %vm1699_vm2, %v1634_v19 }
 0x304   : > { %1742 = vst.msk [vmem:[#allocation4 + $0xd7] sm:$0xff] %vm8379_vm15, %v1636_v62 }
 0x306   : > { %v1638_v52 = vpop.permute.xlu1 %1637  ;;  %v1640_v14 = vpop.permute.xlu0 %1639 }
 0x307   : > { %1743 = vst.msk [vmem:[#allocation4 + $0xdf] sm:$0x1] %vm1703_vm14, %v1638_v52 }
 0x308   : > { %1744 = vst.msk [vmem:[#allocation4 + $0xdf] sm:$0xfe] %vm1699_vm2, %v1640_v14 }
 0x30a   : > { %v1642_v51 = vpop.permute.xlu1 %1641  ;;  %v1644_v11 = vpop.permute.xlu0 %1643 }
 0x30b   : > { %1745 = vst.msk [vmem:[#allocation4 + $0xe7] sm:$0xff] %vm8379_vm15, %v1642_v51 }
 0x30c   : > { %1746 = vst.msk [vmem:[#allocation4 + $0xef] sm:$0x1] %vm1703_vm14, %v1644_v11 }
 0x30e   : > { %v1646_v21 = vpop.permute.xlu1 %1645  ;;  %v1648_v23 = vpop.permute.xlu0 %1647 }
 0x30f   : > { %1747 = vst.msk [vmem:[#allocation4 + $0xef] sm:$0xfe] %vm1699_vm2, %v1646_v21 }
 0x310   : > { %1748 = vst.msk [vmem:[#allocation4 + $0xf7] sm:$0xff] %vm8379_vm15, %v1648_v23  ;;  %vm1989_vm15 = vcmask 293888  }
 0x312   : > { %v1650_v57 = vpop.permute.xlu1 %1649  ;;  %v1751_v27 = vpop.permute.xlu0 %1750 }
 0x313   : > { %1749 = vst.msk [vmem:[#allocation4 + $0xff] sm:$0x1] %vm1703_vm14, %v1650_v57 }
 0x314   : > { %1895 = vst.msk [vmem:[#allocation4 - $0x2] sm:$0xfc] %vm8382_vm1, %v1751_v27 }
 0x316   : > { %v1753_v28 = vpop.permute.xlu1 %1752  ;;  %v1755_v18 = vpop.permute.xlu0 %1754 }
 0x317   : > { %1897 = vst.msk [vmem:[#allocation4 + $0x6] sm:$0xff] %vm8381_vm13, %v1753_v28 }
 0x318   : > { %1899 = vst.msk [vmem:[#allocation4 + $0xe] sm:$0x3] %vm8380_vm12, %v1755_v18 }
 0x31a   : > { %v1757_v30 = vpop.permute.xlu1 %1756  ;;  %v1759_v31 = vpop.permute.xlu0 %1758 }
 0x31b   : > { %1900 = vst.msk [vmem:[#allocation4 + $0xe] sm:$0xfc] %vm8382_vm1, %v1757_v30 }
 0x31c   : > { %1901 = vst.msk [vmem:[#allocation4 + $0x16] sm:$0xff] %vm8381_vm13, %v1759_v31 }
 0x31e   : > { %v1761_v48 = vpop.permute.xlu1 %1760  ;;  %v1945_v32 = vld [vmem:[#allocation4] sm:$0xff]  ;;  %v1763_v33 = vpop.permute.xlu0 %1762 }
 0x31f   : > { %1902 = vst.msk [vmem:[#allocation4 + $0x1e] sm:$0x3] %vm8380_vm12, %v1761_v48  ;;  %4827 = vmatprep.mubr.msk.f32.mxu0 %vm1989_vm15, %v1945_v32  ;;  %v1946_v34 = vld [vmem:[#allocation4 + $0x8] sm:$0xff] }
 0x320   : > { %1903 = vst.msk [vmem:[#allocation4 + $0x1e] sm:$0xfc] %vm8382_vm1, %v1763_v33  ;;  %4828 = vmatmul.mubr.msk.f32.vlgmr.msra.gmra.mrb[0].mxu0 %vm1989_vm15, %v1946_v34 }
 0x322   : > { %v1765_v24 = vpop.permute.xlu1 %1764  ;;  %v1767_v35 = vpop.permute.xlu0 %1766 }
 0x323   : > { %1904 = vst.msk [vmem:[#allocation4 + $0x26] sm:$0xff] %vm8381_vm13, %v1765_v24  ;;  %v1947_v16 = vld [vmem:[#allocation4 + $0x10] sm:$0xff] }
 0x324   : > { %1905 = vst.msk [vmem:[#allocation4 + $0x2e] sm:$0x3] %vm8380_vm12, %v1767_v35  ;;  %4830 = vmatprep.mubr.msk.f32.mxu0 %vm1989_vm15, %v1947_v16 }
 0x326   : > { %v1769_v36 = vpop.permute.xlu1 %1768  ;;  %v1948_v37 = vld [vmem:[#allocation4 + $0x18] sm:$0xff]  ;;  %v1771_v10 = vpop.permute.xlu0 %1770 }
 0x327   : > { %1906 = vst.msk [vmem:[#allocation4 + $0x2e] sm:$0xfc] %vm8382_vm1, %v1769_v36  ;;  %4831 = vmatmul.mubr.msk.f32.gmra.mrb[2].mxu0 %vm1989_vm15, %v1948_v37 }
 0x328   : > { %1907 = vst.msk [vmem:[#allocation4 + $0x36] sm:$0xff] %vm8381_vm13, %v1771_v10 }
 0x32a   : > { %v1773_v38 = vpop.permute.xlu1 %1772  ;;  %v1949_v39 = vld [vmem:[#allocation4 + $0x20] sm:$0xff]  ;;  %v1775_v29 = vpop.permute.xlu0 %1774 }
 0x32b   : > { %1908 = vst.msk [vmem:[#allocation4 + $0x3e] sm:$0x3] %vm8380_vm12, %v1773_v38  ;;  %4833 = vmatprep.mubr.msk.f32.mxu0 %vm1989_vm15, %v1949_v39  ;;  %v1950_v40 = vld [vmem:[#allocation4 + $0x28] sm:$0xff] }
 0x32c   : > { %1909 = vst.msk [vmem:[#allocation4 + $0x3e] sm:$0xfc] %vm8382_vm1, %v1775_v29  ;;  %4834 = vmatmul.mubr.msk.f32.gmra.mrb[4].mxu0 %vm1989_vm15, %v1950_v40 }
 0x32e   : > { %v1777_v41 = vpop.permute.xlu1 %1776  ;;  %v1779_v25 = vpop.permute.xlu0 %1778 }
 0x32f   : > { %1910 = vst.msk [vmem:[#allocation4 + $0x46] sm:$0xff] %vm8381_vm13, %v1777_v41  ;;  %v1951_v43 = vld [vmem:[#allocation4 + $0x30] sm:$0xff] }
 0x330   : > { %1911 = vst.msk [vmem:[#allocation4 + $0x4e] sm:$0x3] %vm8380_vm12, %v1779_v25  ;;  %4836 = vmatprep.mubr.msk.f32.mxu0 %vm1989_vm15, %v1951_v43  ;;  %v6824_v43 = vld [vmem:[#allocation3] sm:$0xff] }
 0x331   : > { %2578 = vrot.lane.b32.xlu0 %v6824_v43, %s5099_s10  ;;  %2498 = vst.msk [vmem:[#allocation4] sm:$0xff] %vm255_vm0, %v6824_v43 }
 0x332   : > { %v1781_v44 = vpop.permute.xlu1 %1780  ;;  %v1952_v7 = vld [vmem:[#allocation4 + $0x38] sm:$0xff]  ;;  %v1783_v45 = vpop.permute.xlu0 %1782 }
 0x333   : > { %1912 = vst.msk [vmem:[#allocation4 + $0x4e] sm:$0xfc] %vm8382_vm1, %v1781_v44  ;;  %4837 = vmatmul.mubr.msk.f32.gmra.mrb[6].mxu0 %vm1989_vm15, %v1952_v7  ;;  %v6830_v44 = vld [vmem:[#allocation3 + $0x10] sm:$0x3]  ;;  %v6832_v7 = vld [vmem:[#allocation3 + $0x8] sm:$0xff] }
 0x334   : > { %1913 = vst.msk [vmem:[#allocation4 + $0x56] sm:$0xff] %vm8381_vm13, %v1783_v45  ;;  %2580 = vrot.lane.b32.xlu1 %v6832_v7, %s5099_s10 }
 0x335   : > { %2582 = vrot.lane.b32.xlu0 %v6830_v44, %s5099_s10  ;;  %2499 = vst.msk [vmem:[#allocation4 + $0x8] sm:$0xff] %vm255_vm0, %v6832_v7 }
 0x336   : > { %v1785_v46 = vpop.permute.xlu1 %1784  ;;  %v1953_v49 = vld [vmem:[#allocation4 + $0x40] sm:$0xff]  ;;  %v1787_v47 = vpop.permute.xlu0 %1786 }
 0x337   : > { %1914 = vst.msk [vmem:[#allocation4 + $0x5e] sm:$0x3] %vm8380_vm12, %v1785_v46  ;;  %4839 = vmatprep.mubr.msk.f32.mxu0 %vm1989_vm15, %v1953_v49  ;;  %v1954_v58 = vld [vmem:[#allocation4 + $0x48] sm:$0xff] }
 0x338   : > { %1915 = vst.msk [vmem:[#allocation4 + $0x5e] sm:$0xfc] %vm8382_vm1, %v1787_v47  ;;  %4840 = vmatmul.mubr.msk.f32.gmra.mrb[8].mxu0 %vm1989_vm15, %v1954_v58 }
 0x33a   : > { %v1789_v26 = vpop.permute.xlu1 %1788  ;;  %v1791_v59 = vpop.permute.xlu0 %1790 }
 0x33b   : > { %1916 = vst.msk [vmem:[#allocation4 + $0x66] sm:$0xff] %vm8381_vm13, %v1789_v26  ;;  %v1955_v60 = vld [vmem:[#allocation4 + $0x50] sm:$0xff] }
 0x33c   : > { %1917 = vst.msk [vmem:[#allocation4 + $0x6e] sm:$0x3] %vm8380_vm12, %v1791_v59  ;;  %4842 = vmatprep.mubr.msk.f32.mxu0 %vm1989_vm15, %v1955_v60 }
 0x33e   : > { %v1793_v50 = vpop.permute.xlu1 %1792  ;;  %v1956_v61 = vld [vmem:[#allocation4 + $0x58] sm:$0xff]  ;;  %v1795_v63 = vpop.permute.xlu0 %1794 }
 0x33f   : > { %1918 = vst.msk [vmem:[#allocation4 + $0x6e] sm:$0xfc] %vm8382_vm1, %v1793_v50  ;;  %4843 = vmatmul.mubr.msk.f32.gmra.mrb[10].mxu0 %vm1989_vm15, %v1956_v61  ;;  %v6849_v50 = vld [vmem:[%s8348_s2] ss:$0 sm:$0xff] }
 0x340   : > { %1919 = vst.msk [vmem:[#allocation4 + $0x76] sm:$0xff] %vm8381_vm13, %v1795_v63 }
 0x342   : > { %v1797_v53 = vpop.permute.xlu1 %1796  ;;  %v1957_v0 = vld [vmem:[#allocation4 + $0x60] sm:$0xff]  ;;  %v1799_v56 = vpop.permute.xlu0 %1798 }
 0x343   : > { %1920 = vst.msk [vmem:[#allocation4 + $0x7e] sm:$0x3] %vm8380_vm12, %v1797_v53  ;;  %4845 = vmatprep.mubr.msk.f32.mxu0 %vm1989_vm15, %v1957_v0  ;;  %v1958_v17 = vld [vmem:[#allocation4 + $0x68] sm:$0xff] }
 0x344   : > { %1921 = vst.msk [vmem:[#allocation4 + $0x7e] sm:$0xfc] %vm8382_vm1, %v1799_v56  ;;  %4846 = vmatmul.mubr.msk.f32.gmra.mrb[12].mxu0 %vm1989_vm15, %v1958_v17 }
 0x346   : > { %v1801_v55 = vpop.permute.xlu1 %1800  ;;  %v1803_v54 = vpop.permute.xlu0 %1802 }
 0x347   : > { %1922 = vst.msk [vmem:[#allocation4 + $0x86] sm:$0xff] %vm8381_vm13, %v1801_v55  ;;  %v1959_v22 = vld [vmem:[#allocation4 + $0x70] sm:$0xff] }
 0x348   : > { %1923 = vst.msk [vmem:[#allocation4 + $0x8e] sm:$0x3] %vm8380_vm12, %v1803_v54  ;;  %4848 = vmatprep.mubr.msk.f32.mxu0 %vm1989_vm15, %v1959_v22 }
 0x34a   : > { %v1805_v42 = vpop.permute.xlu1 %1804  ;;  %v1960_v20 = vld [vmem:[#allocation4 + $0x78] sm:$0xff]  ;;  %v1807_v15 = vpop.permute.xlu0 %1806 }
 0x34b   : > { %1924 = vst.msk [vmem:[#allocation4 + $0x8e] sm:$0xfc] %vm8382_vm1, %v1805_v42  ;;  %4849 = vmatmul.mubr.msk.f32.gmra.mrb[14].mxu0 %vm1989_vm15, %v1960_v20 }
 0x34c   : > { %1925 = vst.msk [vmem:[#allocation4 + $0x96] sm:$0xff] %vm8381_vm13, %v1807_v15 }
 0x34e   : > { %v1809_v19 = vpop.permute.xlu1 %1808  ;;  %v1961_v62 = vld [vmem:[#allocation4 + $0x80] sm:$0xff]  ;;  %v1811_v52 = vpop.permute.xlu0 %1810 }
 0x34f   : > { %1926 = vst.msk [vmem:[#allocation4 + $0x9e] sm:$0x3] %vm8380_vm12, %v1809_v19  ;;  %4851 = vmatprep.mubr.msk.f32.mxu0 %vm1989_vm15, %v1961_v62  ;;  %v1962_v14 = vld [vmem:[#allocation4 + $0x88] sm:$0xff] }
 0x350   : > { %1927 = vst.msk [vmem:[#allocation4 + $0x9e] sm:$0xfc] %vm8382_vm1, %v1811_v52  ;;  %4852 = vmatmul.mubr.msk.f32.gmra.mrb[16].mxu0 %vm1989_vm15, %v1962_v14 }
 0x352   : > { %v1813_v51 = vpop.permute.xlu1 %1812  ;;  %v1815_v11 = vpop.permute.xlu0 %1814 }
 0x353   : > { %1928 = vst.msk [vmem:[#allocation4 + $0xa6] sm:$0xff] %vm8381_vm13, %v1813_v51  ;;  %v1963_v21 = vld [vmem:[#allocation4 + $0x90] sm:$0xff] }
 0x354   : > { %1929 = vst.msk [vmem:[#allocation4 + $0xae] sm:$0x3] %vm8380_vm12, %v1815_v11  ;;  %4854 = vmatprep.mubr.msk.f32.mxu0 %vm1989_vm15, %v1963_v21 }
 0x356   : > { %v1817_v23 = vpop.permute.xlu1 %1816  ;;  %v1964_v57 = vld [vmem:[#allocation4 + $0x98] sm:$0xff]  ;;  %v1819_v27 = vpop.permute.xlu0 %1818 }
 0x357   : > { %1930 = vst.msk [vmem:[#allocation4 + $0xae] sm:$0xfc] %vm8382_vm1, %v1817_v23  ;;  %4855 = vmatmul.mubr.msk.f32.gmra.mrb[18].mxu0 %vm1989_vm15, %v1964_v57 }
 0x358   : > { %1931 = vst.msk [vmem:[#allocation4 + $0xb6] sm:$0xff] %vm8381_vm13, %v1819_v27 }
 0x35a   : > { %v1821_v28 = vpop.permute.xlu1 %1820  ;;  %v1965_v18 = vld [vmem:[#allocation4 + $0xa0] sm:$0xff]  ;;  %v1823_v30 = vpop.permute.xlu0 %1822 }
 0x35b   : > { %1932 = vst.msk [vmem:[#allocation4 + $0xbe] sm:$0x3] %vm8380_vm12, %v1821_v28  ;;  %4857 = vmatprep.mubr.msk.f32.mxu0 %vm1989_vm15, %v1965_v18  ;;  %v1966_v31 = vld [vmem:[#allocation4 + $0xa8] sm:$0xff] }
 0x35c   : > { %1933 = vst.msk [vmem:[#allocation4 + $0xbe] sm:$0xfc] %vm8382_vm1, %v1823_v30  ;;  %4858 = vmatmul.mubr.msk.f32.gmra.mrb[20].mxu0 %vm1989_vm15, %v1966_v31 }
 0x35e   : > { %v1825_v48 = vpop.permute.xlu1 %1824  ;;  %v1827_v32 = vpop.permute.xlu0 %1826 }
 0x35f   : > { %1934 = vst.msk [vmem:[#allocation4 + $0xc6] sm:$0xff] %vm8381_vm13, %v1825_v48  ;;  %v1967_v33 = vld [vmem:[#allocation4 + $0xb0] sm:$0xff] }
 0x360   : > { %1935 = vst.msk [vmem:[#allocation4 + $0xce] sm:$0x3] %vm8380_vm12, %v1827_v32  ;;  %4860 = vmatprep.mubr.msk.f32.mxu0 %vm1989_vm15, %v1967_v33 }
 0x362   : > { %v1829_v34 = vpop.permute.xlu1 %1828  ;;  %v1968_v24 = vld [vmem:[#allocation4 + $0xb8] sm:$0xff]  ;;  %v1831_v35 = vpop.permute.xlu0 %1830 }
 0x363   : > { %1936 = vst.msk [vmem:[#allocation4 + $0xce] sm:$0xfc] %vm8382_vm1, %v1829_v34  ;;  %4861 = vmatmul.mubr.msk.f32.gmra.mrb[22].mxu0 %vm1989_vm15, %v1968_v24 }
 0x364   : > { %1937 = vst.msk [vmem:[#allocation4 + $0xd6] sm:$0xff] %vm8381_vm13, %v1831_v35 }
 0x366   : > { %v1833_v16 = vpop.permute.xlu1 %1832  ;;  %v1969_v36 = vld [vmem:[#allocation4 + $0xc0] sm:$0xff]  ;;  %v1835_v37 = vpop.permute.xlu0 %1834 }
 0x367   : > { %1938 = vst.msk [vmem:[#allocation4 + $0xde] sm:$0x3] %vm8380_vm12, %v1833_v16  ;;  %4863 = vmatprep.mubr.msk.f32.mxu0 %vm1989_vm15, %v1969_v36  ;;  %v1970_v10 = vld [vmem:[#allocation4 + $0xc8] sm:$0xff] }
 0x368   : > { %1939 = vst.msk [vmem:[#allocation4 + $0xde] sm:$0xfc] %vm8382_vm1, %v1835_v37  ;;  %4864 = vmatmul.mubr.msk.f32.gmra.mrb[24].mxu0 %vm1989_vm15, %v1970_v10 }
 0x36a   : > { %v1837_v38 = vpop.permute.xlu1 %1836  ;;  %v1839_v39 = vpop.permute.xlu0 %1838 }
 0x36b   : > { %1940 = vst.msk [vmem:[#allocation4 + $0xe6] sm:$0xff] %vm8381_vm13, %v1837_v38  ;;  %v1971_v29 = vld [vmem:[#allocation4 + $0xd0] sm:$0xff] }
 0x36c   : > { %1941 = vst.msk [vmem:[#allocation4 + $0xee] sm:$0x3] %vm8380_vm12, %v1839_v39  ;;  %4866 = vmatprep.mubr.msk.f32.mxu0 %vm1989_vm15, %v1971_v29 }
 0x36e   : > { %v1972_v40 = vld [vmem:[#allocation4 + $0xd8] sm:$0xff]  ;;  %v1841_v45 = vpop.permute.xlu1 %1840  ;;  %v1843_v46 = vpop.permute.xlu0 %1842 }
 0x36f   : > { %4867 = vmatmul.mubr.msk.f32.gmra.mrb[26].mxu0 %vm1989_vm15, %v1972_v40  ;;  %1942 = vst.msk [vmem:[#allocation4 + $0xee] sm:$0xfc] %vm8382_vm1, %v1841_v45 }
 0x370   : > { %1943 = vst.msk [vmem:[#allocation4 + $0xf6] sm:$0xff] %vm8381_vm13, %v1843_v46 }
 0x372   : > { %v1973_v41 = vld [vmem:[#allocation4 + $0xe0] sm:$0xff]  ;;  %v1845_v49 = vpop.permute.xlu1 %1844 }
 0x373   : > { %4869 = vmatprep.mubr.msk.f32.mxu0 %vm1989_vm15, %v1973_v41  ;;  %v1974_v25 = vld [vmem:[#allocation4 + $0xe8] sm:$0xff]  ;;  %1944 = vst.msk [vmem:[#allocation4 + $0xfe] sm:$0x3] %vm8380_vm12, %v1845_v49 }
 0x374   : > { %4870 = vmatmul.mubr.msk.f32.gmra.mrb[28].mxu0 %vm1989_vm15, %v1974_v25 }
 0x377   : > { %v1975_v47 = vld [vmem:[#allocation4 + $0xf0] sm:$0xff] }
 0x378   : > { %4872 = vmatprep.mubr.msk.f32.mxu0 %vm1989_vm15, %v1975_v47 }
 0x37a   : > { %v1976_v58 = vld [vmem:[#allocation4 + $0xf8] sm:$0xff] }
 0x37b   : > { %4873 = vmatmul.mubr.msk.f32.gmra.mrb[30].mxu0 %vm1989_vm15, %v1976_v58 }
 0x3a3   : > { %v2579_v26 = vpop.permute.xlu0 %2578 }
 0x3a4   : > { %2722 = vst.msk [vmem:[#allocation4 - $0x1] sm:$0xfe] %vm655_vm5, %v2579_v26 }
 0x3a6   : > { %v2581_v60 = vpop.permute.xlu1 %2580 }
 0x3a7   : > { %v2583_v59 = vpop.permute.xlu0 %2582  ;;  %2723 = vst.msk [vmem:[#allocation4 + $0x7] sm:$0xff] %vm657_vm3, %v2581_v60 }
 0x3a8   : > { %2724 = vst.msk [vmem:[#allocation4 + $0xf] sm:$0x1] %vm659_vm4, %v2583_v59 }
 0x3f3   : > { %v4829_v61 = vpop.f32.mrb[0].mxu0 }
 0x3f4   : > { %v2162_v63 = vadd.f32 %v4829_v61, %v6849_v50  ;;  %v2156_v53 = vpop.f32.mrb[1].mxu0 }
 0x3f5   : > { %v2157_v0 = vadd.f32 %v6849_v50, %v2156_v53 }
 0x3f6   : > { %vm2316_vm15 = vcmp.ge.f32.partialorder %v2162_v63, 0.0  ;;  %v2348_v56 = vmul.f32 0.1, %v2162_v63 }
 0x3f7   : > { %vm2315_vm12 = vcmp.ge.f32.partialorder %v2157_v0, 0.0  ;;  %v2347_v17 = vmul.f32 0.1, %v2157_v0 }
 0x3f8   : > { %v2380_v55 = vsel %vm2316_vm15, %v2162_v63, %v2348_v56 }
 0x3f9   : > { %2413 = vst.msk [vmem:[#allocation3 + $0x21] sm:$0xff] %vm255_vm0, %v2380_v55  ;;  %v2379_v54 = vsel %vm2315_vm12, %v2157_v0, %v2347_v17 }
 0x3fa   : > { %v4832_v22 = vpop.f32.mrb[2].mxu0  ;;  %2412 = vst.msk [vmem:[#allocation3 + $0x19] sm:$0xff] %vm255_vm0, %v2379_v54 }
 0x3fb   : > { %v2172_v42 = vadd.f32 %v4832_v22, %v6849_v50  ;;  %v2166_v20 = vpop.f32.mrb[3].mxu0 }
 0x3fc   : > { %v2167_v15 = vadd.f32 %v6849_v50, %v2166_v20 }
 0x3fd   : > { %vm2318_vm13 = vcmp.ge.f32.partialorder %v2172_v42, 0.0  ;;  %v2350_v19 = vmul.f32 0.1, %v2172_v42 }
 0x3fe   : > { %vm2317_vm1 = vcmp.ge.f32.partialorder %v2167_v15, 0.0  ;;  %v2349_v62 = vmul.f32 0.1, %v2167_v15 }
 0x3ff   : > { %v2382_v52 = vsel %vm2318_vm13, %v2172_v42, %v2350_v19  ;;  %v4835_v51 = vpop.f32.mrb[4].mxu0 }
 0x400   : > { %2415 = vst.msk [vmem:[#allocation3 + $0x39] sm:$0xff] %vm255_vm0, %v2382_v52  ;;  %v2381_v14 = vsel %vm2317_vm1, %v2167_v15, %v2349_v62  ;;  %v2182_v11 = vadd.f32 %v4835_v51, %v6849_v50  ;;  %v2176_v21 = vpop.f32.mrb[5].mxu0  ;;  %v6876_v32 = vld [vmem:[#allocation3 + $0x28] sm:$0x3] }
 0x401   : > { %2414 = vst.msk [vmem:[#allocation3 + $0x31] sm:$0xff] %vm255_vm0, %v2381_v14  ;;  %v2177_v23 = vadd.f32 %v6849_v50, %v2176_v21  ;;  %v6863_v57 = vld [vmem:[#allocation3 + $0x20] sm:$0xff]  ;;  %v6865_v27 = vld [vmem:[#allocation3 + $0x18] sm:$0xff] }
 0x402   : > { %vm2320_vm12 = vcmp.ge.f32.partialorder %v2182_v11, 0.0  ;;  %v2352_v28 = vmul.f32 0.1, %v2182_v11  ;;  %2586 = vrot.lane.b32.xlu0 %v6863_v57, %s5099_s10  ;;  %2501 = vst.msk [vmem:[#allocation4 + $0x18] sm:$0xff] %vm255_vm0, %v6863_v57  ;;  %2584 = vrot.lane.b32.xlu1 %v6865_v27, %s5099_s10  ;;  %2500 = vst.msk [vmem:[#allocation4 + $0x10] sm:$0xff] %vm255_vm0, %v6865_v27 }
 0x403   : > { %vm2319_vm13 = vcmp.ge.f32.partialorder %v2177_v23, 0.0  ;;  %v2351_v18 = vmul.f32 0.1, %v2177_v23 }
 0x404   : > { %v2384_v30 = vsel %vm2320_vm12, %v2182_v11, %v2352_v28 }
 0x405   : > { %2417 = vst.msk [vmem:[#allocation3 + $0x51] sm:$0xff] %vm255_vm0, %v2384_v30  ;;  %v2383_v31 = vsel %vm2319_vm13, %v2177_v23, %v2351_v18 }
 0x406   : > { %v4838_v48 = vpop.f32.mrb[6].mxu0  ;;  %2416 = vst.msk [vmem:[#allocation3 + $0x49] sm:$0xff] %vm255_vm0, %v2383_v31  ;;  %2588 = vrot.lane.b32.xlu1 %v6876_v32, %s5099_s10 }
 0x407   : > { %v2192_v33 = vadd.f32 %v4838_v48, %v6849_v50  ;;  %v2186_v34 = vpop.f32.mrb[7].mxu0  ;;  %v6896_v29 = vld [vmem:[#allocation3 + $0x40] sm:$0x3] }
 0x408   : > { %v2187_v24 = vadd.f32 %v6849_v50, %v2186_v34  ;;  %v6883_v35 = vld [vmem:[#allocation3 + $0x30] sm:$0xff]  ;;  %v6885_v16 = vld [vmem:[#allocation3 + $0x38] sm:$0xff] }
 0x409   : > { %vm2322_vm1 = vcmp.ge.f32.partialorder %v2192_v33, 0.0  ;;  %v2354_v36 = vmul.f32 0.1, %v2192_v33  ;;  %2590 = vrot.lane.b32.xlu0 %v6883_v35, %s5099_s10  ;;  %2502 = vst.msk [vmem:[#allocation4 + $0x20] sm:$0xff] %vm255_vm0, %v6883_v35  ;;  %2503 = vst.msk [vmem:[#allocation4 + $0x28] sm:$0xff] %vm255_vm0, %v6885_v16 }
 0x40a   : > { %vm2321_vm15 = vcmp.ge.f32.partialorder %v2187_v24, 0.0  ;;  %v2353_v37 = vmul.f32 0.1, %v2187_v24  ;;  %2592 = vrot.lane.b32.xlu1 %v6885_v16, %s5099_s10 }
 0x40b   : > { %v2386_v10 = vsel %vm2322_vm1, %v2192_v33, %v2354_v36  ;;  %v4841_v39 = vpop.f32.mrb[8].mxu0 }
 0x40c   : > { %2419 = vst.msk [vmem:[#allocation3 + $0x69] sm:$0xff] %vm255_vm0, %v2386_v10  ;;  %v2385_v38 = vsel %vm2321_vm15, %v2187_v24, %v2353_v37  ;;  %v2202_v40 = vadd.f32 %v4841_v39, %v6849_v50  ;;  %v2196_v41 = vpop.f32.mrb[9].mxu0  ;;  %v6916_v60 = vld [vmem:[#allocation3 + $0x58] sm:$0x3] }
 0x40d   : > { %2418 = vst.msk [vmem:[#allocation3 + $0x61] sm:$0xff] %vm255_vm0, %v2385_v38  ;;  %2594 = vrot.lane.b32.xlu0 %v6896_v29, %s5099_s10  ;;  %v2197_v25 = vadd.f32 %v6849_v50, %v2196_v41  ;;  %v6903_v45 = vld [vmem:[#allocation3 + $0x48] sm:$0xff]  ;;  %v6905_v46 = vld [vmem:[#allocation3 + $0x50] sm:$0xff] }
 0x40e   : > { %vm2324_vm12 = vcmp.ge.f32.partialorder %v2202_v40, 0.0  ;;  %v2356_v49 = vmul.f32 0.1, %v2202_v40  ;;  %2596 = vrot.lane.b32.xlu1 %v6903_v45, %s5099_s10  ;;  %2504 = vst.msk [vmem:[#allocation4 + $0x30] sm:$0xff] %vm255_vm0, %v6903_v45  ;;  %2505 = vst.msk [vmem:[#allocation4 + $0x38] sm:$0xff] %vm255_vm0, %v6905_v46 }
 0x40f   : > { %vm2323_vm13 = vcmp.ge.f32.partialorder %v2197_v25, 0.0  ;;  %v2355_v47 = vmul.f32 0.1, %v2197_v25 }
 0x410   : > { %v2388_v58 = vsel %vm2324_vm12, %v2202_v40, %v2356_v49 }
 0x411   : > { %2598 = vrot.lane.b32.xlu0 %v6905_v46, %s5099_s10  ;;  %2421 = vst.msk [vmem:[#allocation3 + $0x81] sm:$0xff] %vm255_vm0, %v2388_v58  ;;  %v2387_v26 = vsel %vm2323_vm13, %v2197_v25, %v2355_v47 }
 0x412   : > { %v4844_v59 = vpop.f32.mrb[10].mxu0  ;;  %2420 = vst.msk [vmem:[#allocation3 + $0x79] sm:$0xff] %vm255_vm0, %v2387_v26  ;;  %2600 = vrot.lane.b32.xlu1 %v6916_v60, %s5099_s10 }
 0x413   : > { %v2212_v61 = vadd.f32 %v4844_v59, %v6849_v50  ;;  %v2206_v63 = vpop.f32.mrb[11].mxu0  ;;  %v6936_v20 = vld [vmem:[#allocation3 + $0x70] sm:$0x3] }
 0x414   : > { %v2207_v53 = vadd.f32 %v6849_v50, %v2206_v63  ;;  %v6923_v0 = vld [vmem:[#allocation3 + $0x60] sm:$0xff]  ;;  %v6925_v56 = vld [vmem:[#allocation3 + $0x68] sm:$0xff] }
 0x415   : > { %vm2326_vm1 = vcmp.ge.f32.partialorder %v2212_v61, 0.0  ;;  %v2358_v17 = vmul.f32 0.1, %v2212_v61  ;;  %2602 = vrot.lane.b32.xlu0 %v6923_v0, %s5099_s10  ;;  %2506 = vst.msk [vmem:[#allocation4 + $0x40] sm:$0xff] %vm255_vm0, %v6923_v0  ;;  %2507 = vst.msk [vmem:[#allocation4 + $0x48] sm:$0xff] %vm255_vm0, %v6925_v56 }
 0x416   : > { %vm2325_vm15 = vcmp.ge.f32.partialorder %v2207_v53, 0.0  ;;  %v2357_v55 = vmul.f32 0.1, %v2207_v53  ;;  %2604 = vrot.lane.b32.xlu1 %v6925_v56, %s5099_s10 }
 0x417   : > { %v2390_v54 = vsel %vm2326_vm1, %v2212_v61, %v2358_v17  ;;  %v4847_v42 = vpop.f32.mrb[12].mxu0 }
 0x418   : > { %2423 = vst.msk [vmem:[#allocation3 + $0x99] sm:$0xff] %vm255_vm0, %v2390_v54  ;;  %v2389_v22 = vsel %vm2325_vm15, %v2207_v53, %v2357_v55  ;;  %v2222_v15 = vadd.f32 %v4847_v42, %v6849_v50  ;;  %v2216_v19 = vpop.f32.mrb[13].mxu0  ;;  %v6956_v18 = vld [vmem:[#allocation3 + $0x88] sm:$0x3] }
 0x419   : > { %2422 = vst.msk [vmem:[#allocation3 + $0x91] sm:$0xff] %vm255_vm0, %v2389_v22  ;;  %2606 = vrot.lane.b32.xlu0 %v6936_v20, %s5099_s10  ;;  %v2217_v62 = vadd.f32 %v6849_v50, %v2216_v19  ;;  %v6943_v52 = vld [vmem:[#allocation3 + $0x78] sm:$0xff]  ;;  %v6945_v14 = vld [vmem:[#allocation3 + $0x80] sm:$0xff] }
 0x41a   : > { %vm2328_vm12 = vcmp.ge.f32.partialorder %v2222_v15, 0.0  ;;  %v2360_v51 = vmul.f32 0.1, %v2222_v15  ;;  %2608 = vrot.lane.b32.xlu1 %v6943_v52, %s5099_s10  ;;  %2508 = vst.msk [vmem:[#allocation4 + $0x50] sm:$0xff] %vm255_vm0, %v6943_v52  ;;  %2509 = vst.msk [vmem:[#allocation4 + $0x58] sm:$0xff] %vm255_vm0, %v6945_v14 }
 0x41b   : > { %vm2327_vm13 = vcmp.ge.f32.partialorder %v2217_v62, 0.0  ;;  %v2359_v11 = vmul.f32 0.1, %v2217_v62 }
 0x41c   : > { %v2392_v21 = vsel %vm2328_vm12, %v2222_v15, %v2360_v51 }
 0x41d   : > { %2610 = vrot.lane.b32.xlu0 %v6945_v14, %s5099_s10  ;;  %2425 = vst.msk [vmem:[#allocation3 + $0xb1] sm:$0xff] %vm255_vm0, %v2392_v21  ;;  %v2391_v23 = vsel %vm2327_vm13, %v2217_v62, %v2359_v11 }
 0x41e   : > { %v4850_v28 = vpop.f32.mrb[14].mxu0  ;;  %2424 = vst.msk [vmem:[#allocation3 + $0xa9] sm:$0xff] %vm255_vm0, %v2391_v23  ;;  %2612 = vrot.lane.b32.xlu1 %v6956_v18, %s5099_s10 }
 0x41f   : > { %v2232_v30 = vadd.f32 %v4850_v28, %v6849_v50  ;;  %v2226_v31 = vpop.f32.mrb[15].mxu0  ;;  %v6976_v39 = vld [vmem:[#allocation3 + $0xa0] sm:$0x3] }
 0x420   : > { %v2227_v48 = vadd.f32 %v6849_v50, %v2226_v31  ;;  %v6963_v33 = vld [vmem:[#allocation3 + $0x90] sm:$0xff]  ;;  %v6965_v34 = vld [vmem:[#allocation3 + $0x98] sm:$0xff] }
 0x421   : > { %vm2330_vm1 = vcmp.ge.f32.partialorder %v2232_v30, 0.0  ;;  %v2362_v24 = vmul.f32 0.1, %v2232_v30  ;;  %2614 = vrot.lane.b32.xlu0 %v6963_v33, %s5099_s10  ;;  %2510 = vst.msk [vmem:[#allocation4 + $0x60] sm:$0xff] %vm255_vm0, %v6963_v33  ;;  %2511 = vst.msk [vmem:[#allocation4 + $0x68] sm:$0xff] %vm255_vm0, %v6965_v34 }
 0x422   : > { %vm2329_vm15 = vcmp.ge.f32.partialorder %v2227_v48, 0.0  ;;  %v2361_v36 = vmul.f32 0.1, %v2227_v48  ;;  %2616 = vrot.lane.b32.xlu1 %v6965_v34, %s5099_s10 }
 0x423   : > { %v2394_v37 = vsel %vm2330_vm1, %v2232_v30, %v2362_v24  ;;  %v4853_v38 = vpop.f32.mrb[16].mxu0 }
 0x424   : > { %2427 = vst.msk [vmem:[#allocation3 + $0xc9] sm:$0xff] %vm255_vm0, %v2394_v37  ;;  %v2393_v10 = vsel %vm2329_vm15, %v2227_v48, %v2361_v36  ;;  %v2242_v40 = vadd.f32 %v4853_v38, %v6849_v50  ;;  %v2236_v41 = vpop.f32.mrb[17].mxu0  ;;  %v6996_v53 = vld [vmem:[#allocation3 + $0xb8] sm:$0x3] }
 0x425   : > { %2426 = vst.msk [vmem:[#allocation3 + $0xc1] sm:$0xff] %vm255_vm0, %v2393_v10  ;;  %2618 = vrot.lane.b32.xlu0 %v6976_v39, %s5099_s10  ;;  %v2237_v25 = vadd.f32 %v6849_v50, %v2236_v41  ;;  %v6983_v49 = vld [vmem:[#allocation3 + $0xa8] sm:$0xff]  ;;  %v6985_v47 = vld [vmem:[#allocation3 + $0xb0] sm:$0xff] }
 0x426   : > { %vm2332_vm12 = vcmp.ge.f32.partialorder %v2242_v40, 0.0  ;;  %v2364_v58 = vmul.f32 0.1, %v2242_v40  ;;  %2620 = vrot.lane.b32.xlu1 %v6983_v49, %s5099_s10  ;;  %2512 = vst.msk [vmem:[#allocation4 + $0x70] sm:$0xff] %vm255_vm0, %v6983_v49  ;;  %2513 = vst.msk [vmem:[#allocation4 + $0x78] sm:$0xff] %vm255_vm0, %v6985_v47 }
 0x427   : > { %vm2331_vm13 = vcmp.ge.f32.partialorder %v2237_v25, 0.0  ;;  %v2363_v26 = vmul.f32 0.1, %v2237_v25 }
 0x428   : > { %v2396_v59 = vsel %vm2332_vm12, %v2242_v40, %v2364_v58 }
 0x429   : > { %2622 = vrot.lane.b32.xlu0 %v6985_v47, %s5099_s10  ;;  %2429 = vst.msk [vmem:[#allocation3 + $0xe1] sm:$0xff] %vm255_vm0, %v2396_v59  ;;  %v2395_v61 = vsel %vm2331_vm13, %v2237_v25, %v2363_v26 }
 0x42a   : > { %v4856_v63 = vpop.f32.mrb[18].mxu0  ;;  %2428 = vst.msk [vmem:[#allocation3 + $0xd9] sm:$0xff] %vm255_vm0, %v2395_v61  ;;  %2624 = vrot.lane.b32.xlu1 %v6996_v53, %s5099_s10 }
 0x42b   : > { %v2252_v17 = vadd.f32 %v4856_v63, %v6849_v50  ;;  %v2246_v55 = vpop.f32.mrb[19].mxu0  ;;  %v7016_v21 = vld [vmem:[#allocation3 + $0xd0] sm:$0x3] }
 0x42c   : > { %v2247_v54 = vadd.f32 %v6849_v50, %v2246_v55  ;;  %v7003_v22 = vld [vmem:[#allocation3 + $0xc0] sm:$0xff]  ;;  %v7005_v42 = vld [vmem:[#allocation3 + $0xc8] sm:$0xff] }
 0x42d   : > { %vm2334_vm1 = vcmp.ge.f32.partialorder %v2252_v17, 0.0  ;;  %v2366_v15 = vmul.f32 0.1, %v2252_v17  ;;  %2626 = vrot.lane.b32.xlu0 %v7003_v22, %s5099_s10  ;;  %2514 = vst.msk [vmem:[#allocation4 + $0x80] sm:$0xff] %vm255_vm0, %v7003_v22  ;;  %2515 = vst.msk [vmem:[#allocation4 + $0x88] sm:$0xff] %vm255_vm0, %v7005_v42 }
 0x42e   : > { %vm2333_vm15 = vcmp.ge.f32.partialorder %v2247_v54, 0.0  ;;  %v2365_v19 = vmul.f32 0.1, %v2247_v54  ;;  %2628 = vrot.lane.b32.xlu1 %v7005_v42, %s5099_s10 }
 0x42f   : > { %v2398_v62 = vsel %vm2334_vm1, %v2252_v17, %v2366_v15  ;;  %v4859_v11 = vpop.f32.mrb[20].mxu0 }
 0x430   : > { %2431 = vst.msk [vmem:[#allocation3 + $0xf9] sm:$0xff] %vm255_vm0, %v2398_v62  ;;  %v2397_v51 = vsel %vm2333_vm15, %v2247_v54, %v2365_v19  ;;  %v2262_v23 = vadd.f32 %v4859_v11, %v6849_v50  ;;  %v2256_v28 = vpop.f32.mrb[21].mxu0  ;;  %v7036_v40 = vld [vmem:[#allocation3 + $0xe8] sm:$0x3] }
 0x431   : > { %2430 = vst.msk [vmem:[#allocation3 + $0xf1] sm:$0xff] %vm255_vm0, %v2397_v51  ;;  %2630 = vrot.lane.b32.xlu0 %v7016_v21, %s5099_s10  ;;  %v2257_v30 = vadd.f32 %v6849_v50, %v2256_v28  ;;  %v7023_v31 = vld [vmem:[#allocation3 + $0xd8] sm:$0xff]  ;;  %v7025_v48 = vld [vmem:[#allocation3 + $0xe0] sm:$0xff] }
 0x432   : > { %vm2336_vm12 = vcmp.ge.f32.partialorder %v2262_v23, 0.0  ;;  %v2368_v24 = vmul.f32 0.1, %v2262_v23  ;;  %2632 = vrot.lane.b32.xlu1 %v7023_v31, %s5099_s10  ;;  %2516 = vst.msk [vmem:[#allocation4 + $0x90] sm:$0xff] %vm255_vm0, %v7023_v31  ;;  %2517 = vst.msk [vmem:[#allocation4 + $0x98] sm:$0xff] %vm255_vm0, %v7025_v48 }
 0x433   : > { %vm2335_vm13 = vcmp.ge.f32.partialorder %v2257_v30, 0.0  ;;  %v2367_v36 = vmul.f32 0.1, %v2257_v30 }
 0x434   : > { %v2400_v37 = vsel %vm2336_vm12, %v2262_v23, %v2368_v24 }
 0x435   : > { %2634 = vrot.lane.b32.xlu0 %v7025_v48, %s5099_s10  ;;  %2433 = vst.msk [vmem:[#allocation3 + $0x111] sm:$0xff] %vm255_vm0, %v2400_v37  ;;  %v2399_v10 = vsel %vm2335_vm13, %v2257_v30, %v2367_v36 }
 0x436   : > { %v4862_v38 = vpop.f32.mrb[22].mxu0  ;;  %2432 = vst.msk [vmem:[#allocation3 + $0x109] sm:$0xff] %vm255_vm0, %v2399_v10  ;;  %2636 = vrot.lane.b32.xlu1 %v7036_v40, %s5099_s10 }
 0x437   : > { %v2272_v41 = vadd.f32 %v4862_v38, %v6849_v50  ;;  %v2266_v25 = vpop.f32.mrb[23].mxu0  ;;  %v7056_v15 = vld [vmem:[#allocation3 + $0x100] sm:$0x3] }
 0x438   : > { %v2267_v58 = vadd.f32 %v6849_v50, %v2266_v25  ;;  %v7043_v26 = vld [vmem:[#allocation3 + $0xf0] sm:$0xff]  ;;  %v7045_v59 = vld [vmem:[#allocation3 + $0xf8] sm:$0xff] }
 0x439   : > { %vm2338_vm1 = vcmp.ge.f32.partialorder %v2272_v41, 0.0  ;;  %v2370_v61 = vmul.f32 0.1, %v2272_v41  ;;  %2638 = vrot.lane.b32.xlu0 %v7043_v26, %s5099_s10  ;;  %2518 = vst.msk [vmem:[#allocation4 + $0xa0] sm:$0xff] %vm255_vm0, %v7043_v26  ;;  %2519 = vst.msk [vmem:[#allocation4 + $0xa8] sm:$0xff] %vm255_vm0, %v7045_v59 }
 0x43a   : > { %vm2337_vm15 = vcmp.ge.f32.partialorder %v2267_v58, 0.0  ;;  %v2369_v63 = vmul.f32 0.1, %v2267_v58  ;;  %2640 = vrot.lane.b32.xlu1 %v7045_v59, %s5099_s10 }
 0x43b   : > { %v2402_v17 = vsel %vm2338_vm1, %v2272_v41, %v2370_v61  ;;  %v4865_v54 = vpop.f32.mrb[24].mxu0 }
 0x43c   : > { %2435 = vst.msk [vmem:[#allocation3 + $0x129] sm:$0xff] %vm255_vm0, %v2402_v17  ;;  %v2401_v55 = vsel %vm2337_vm15, %v2267_v58, %v2369_v63  ;;  %v2282_v19 = vadd.f32 %v4865_v54, %v6849_v50  ;;  %v2276_v62 = vpop.f32.mrb[25].mxu0  ;;  %v7076_v10 = vld [vmem:[#allocation3 + $0x118] sm:$0x3] }
 0x43d   : > { %2434 = vst.msk [vmem:[#allocation3 + $0x121] sm:$0xff] %vm255_vm0, %v2401_v55  ;;  %2642 = vrot.lane.b32.xlu0 %v7056_v15, %s5099_s10  ;;  %v2277_v51 = vadd.f32 %v6849_v50, %v2276_v62  ;;  %v7063_v11 = vld [vmem:[#allocation3 + $0x108] sm:$0xff]  ;;  %v7065_v23 = vld [vmem:[#allocation3 + $0x110] sm:$0xff] }
 0x43e   : > { %vm2340_vm12 = vcmp.ge.f32.partialorder %v2282_v19, 0.0  ;;  %v2372_v28 = vmul.f32 0.1, %v2282_v19  ;;  %2644 = vrot.lane.b32.xlu1 %v7063_v11, %s5099_s10  ;;  %2520 = vst.msk [vmem:[#allocation4 + $0xb0] sm:$0xff] %vm255_vm0, %v7063_v11  ;;  %2521 = vst.msk [vmem:[#allocation4 + $0xb8] sm:$0xff] %vm255_vm0, %v7065_v23 }
 0x43f   : > { %vm2339_vm13 = vcmp.ge.f32.partialorder %v2277_v51, 0.0  ;;  %v2371_v30 = vmul.f32 0.1, %v2277_v51 }
 0x440   : > { %v2404_v24 = vsel %vm2340_vm12, %v2282_v19, %v2372_v28 }
 0x441   : > { %2646 = vrot.lane.b32.xlu0 %v7065_v23, %s5099_s10  ;;  %2437 = vst.msk [vmem:[#allocation3 + $0x141] sm:$0xff] %vm255_vm0, %v2404_v24  ;;  %v2403_v36 = vsel %vm2339_vm13, %v2277_v51, %v2371_v30 }
 0x442   : > { %v4868_v37 = vpop.f32.mrb[26].mxu0  ;;  %2436 = vst.msk [vmem:[#allocation3 + $0x139] sm:$0xff] %vm255_vm0, %v2403_v36  ;;  %2648 = vrot.lane.b32.xlu1 %v7076_v10, %s5099_s10 }
 0x443   : > { %v2292_v38 = vadd.f32 %v4868_v37, %v6849_v50  ;;  %v2286_v41 = vpop.f32.mrb[27].mxu0  ;;  %v7096_v62 = vld [vmem:[#allocation3 + $0x130] sm:$0x3] }
 0x444   : > { %v2287_v25 = vadd.f32 %v6849_v50, %v2286_v41  ;;  %v7083_v58 = vld [vmem:[#allocation3 + $0x120] sm:$0xff]  ;;  %v7085_v61 = vld [vmem:[#allocation3 + $0x128] sm:$0xff] }
 0x445   : > { %vm2342_vm1 = vcmp.ge.f32.partialorder %v2292_v38, 0.0  ;;  %v2374_v63 = vmul.f32 0.1, %v2292_v38  ;;  %2650 = vrot.lane.b32.xlu0 %v7083_v58, %s5099_s10  ;;  %2522 = vst.msk [vmem:[#allocation4 + $0xc0] sm:$0xff] %vm255_vm0, %v7083_v58  ;;  %2523 = vst.msk [vmem:[#allocation4 + $0xc8] sm:$0xff] %vm255_vm0, %v7085_v61 }
 0x446   : > { %vm2341_vm15 = vcmp.ge.f32.partialorder %v2287_v25, 0.0  ;;  %v2373_v17 = vmul.f32 0.1, %v2287_v25  ;;  %2652 = vrot.lane.b32.xlu1 %v7085_v61, %s5099_s10 }
 0x447   : > { %v2406_v55 = vsel %vm2342_vm1, %v2292_v38, %v2374_v63  ;;  %v4871_v19 = vpop.f32.mrb[28].mxu0 }
 0x448   : > { %2439 = vst.msk [vmem:[#allocation3 + $0x159] sm:$0xff] %vm255_vm0, %v2406_v55  ;;  %v2405_v54 = vsel %vm2341_vm15, %v2287_v25, %v2373_v17  ;;  %v2302_v51 = vadd.f32 %v4871_v19, %v6849_v50  ;;  %v2296_v28 = vpop.f32.mrb[29].mxu0  ;;  %v7116_v63 = vld [vmem:[#allocation3 + $0x148] sm:$0x3] }
 0x449   : > { %2438 = vst.msk [vmem:[#allocation3 + $0x151] sm:$0xff] %vm255_vm0, %v2405_v54  ;;  %2654 = vrot.lane.b32.xlu0 %v7096_v62, %s5099_s10  ;;  %v2297_v30 = vadd.f32 %v6849_v50, %v2296_v28  ;;  %v7103_v24 = vld [vmem:[#allocation3 + $0x138] sm:$0xff]  ;;  %v7105_v36 = vld [vmem:[#allocation3 + $0x140] sm:$0xff] }
 0x44a   : > { %vm2344_vm12 = vcmp.ge.f32.partialorder %v2302_v51, 0.0  ;;  %v2376_v37 = vmul.f32 0.1, %v2302_v51  ;;  %2656 = vrot.lane.b32.xlu1 %v7103_v24, %s5099_s10  ;;  %2524 = vst.msk [vmem:[#allocation4 + $0xd0] sm:$0xff] %vm255_vm0, %v7103_v24  ;;  %2525 = vst.msk [vmem:[#allocation4 + $0xd8] sm:$0xff] %vm255_vm0, %v7105_v36 }
 0x44b   : > { %vm2343_vm13 = vcmp.ge.f32.partialorder %v2297_v30, 0.0  ;;  %v2375_v38 = vmul.f32 0.1, %v2297_v30 }
 0x44c   : > { %v2408_v41 = vsel %vm2344_vm12, %v2302_v51, %v2376_v37 }
 0x44d   : > { %2658 = vrot.lane.b32.xlu0 %v7105_v36, %s5099_s10  ;;  %2441 = vst.msk [vmem:[#allocation3 + $0x171] sm:$0xff] %vm255_vm0, %v2408_v41  ;;  %v2407_v25 = vsel %vm2343_vm13, %v2297_v30, %v2375_v38 }
 0x44e   : > { %2440 = vst.msk [vmem:[#allocation3 + $0x169] sm:$0xff] %vm255_vm0, %v2407_v25  ;;  %2660 = vrot.lane.b32.xlu1 %v7116_v63, %s5099_s10  ;;  %v4874_v30 = vpop.f32.mrb[30].mxu0 }
 0x44f   : > { %v7133_v54 = vld [vmem:[#allocation3 + $0x160] sm:$0x3]  ;;  %v2312_v37 = vadd.f32 %v4874_v30, %v6849_v50  ;;  %v2306_v38 = vpop.f32.mrb[31].mxu0 }
 0x450   : > { %v7121_v17 = vld [vmem:[#allocation3 + $0x150] sm:$0xff]  ;;  %v7123_v55 = vld [vmem:[#allocation3 + $0x158] sm:$0xff] }
 0x451   : > { %2662 = vrot.lane.b32.xlu0 %v7121_v17, %s5099_s10  ;;  %2526 = vst.msk [vmem:[#allocation4 + $0xe0] sm:$0xff] %vm255_vm0, %v7121_v17  ;;  %2527 = vst.msk [vmem:[#allocation4 + $0xe8] sm:$0xff] %vm255_vm0, %v7123_v55  ;;  %vm2346_vm1 = vcmp.ge.f32.partialorder %v2312_v37, 0.0 }
 0x452   : > { %2664 = vrot.lane.b32.xlu1 %v7123_v55, %s5099_s10 }
 0x454   : > { %v7149_v28 = vld [vmem:[#allocation3 + $0x178] sm:$0x3] }
 0x455   : > { %2666 = vrot.lane.b32.xlu0 %v7133_v54, %s5099_s10  ;;  %v7137_v19 = vld [vmem:[#allocation3 + $0x168] sm:$0xff]  ;;  %v7139_v51 = vld [vmem:[#allocation3 + $0x170] sm:$0xff] }
 0x456   : > { %2668 = vrot.lane.b32.xlu1 %v7137_v19, %s5099_s10  ;;  %2528 = vst.msk [vmem:[#allocation4 + $0xf0] sm:$0xff] %vm255_vm0, %v7137_v19  ;;  %2529 = vst.msk [vmem:[#allocation4 + $0xf8] sm:$0xff] %vm255_vm0, %v7139_v51 }
 0x459   : > { %2670 = vrot.lane.b32.xlu0 %v7139_v51, %s5099_s10 }
 0x45a   : > { %2672 = vrot.lane.b32.xlu1 %v7149_v28, %s5099_s10 }
 0x45d   : > { %2770 = vrot.lane.b32.xlu0 %v6824_v43, %s5100_s11  ;;  %v2307_v43 = vadd.f32 %v6849_v50, %v2306_v38 }
 0x45e   : > { %2772 = vrot.lane.b32.xlu1 %v6832_v7, %s5100_s11 }
 0x45f   : > { %vm2345_vm15 = vcmp.ge.f32.partialorder %v2307_v43, 0.0  ;;  %v2377_v7 = vmul.f32 0.1, %v2307_v43 }
 0x461   : > { %2774 = vrot.lane.b32.xlu0 %v6830_v44, %s5100_s11  ;;  %v2378_v44 = vmul.f32 0.1, %v2312_v37  ;;  %v2409_v25 = vsel %vm2345_vm15, %v2307_v43, %v2377_v7 }
 0x462   : > { %2776 = vrot.lane.b32.xlu1 %v6865_v27, %s5100_s11  ;;  %2442 = vst.msk [vmem:[#allocation3 + $0x181] sm:$0xff] %vm255_vm0, %v2409_v25 }
 0x463   : > { %v2410_v41 = vsel %vm2346_vm1, %v2312_v37, %v2378_v44 }
 0x464   : > { %2443 = vst.msk [vmem:[#allocation3 + $0x189] sm:$0xff] %vm255_vm0, %v2410_v41  ;;  %vm8407_vm0 = vcmask 155776  }
 0x465   : > { %2778 = vrot.lane.b32.xlu0 %v6863_v57, %s5100_s11  ;;  %vm8415_vm12 = vmmov %vm8407_vm0 }
 0x466   : > { %2780 = vrot.lane.b32.xlu1 %v6876_v32, %s5100_s11  ;;  %vm8416_vm13 = vmmov %vm8407_vm0 }
 0x467   : > { %vm8417_vm1 = vmmov %vm8407_vm0 }
 0x468   : > { %vm8418_vm15 = vmmov %vm8407_vm0 }
 0x469   : > { %2782 = vrot.lane.b32.xlu0 %v6883_v35, %s5100_s11 }
 0x46a   : > { %2784 = vrot.lane.b32.xlu1 %v6885_v16, %s5100_s11 }
 0x46d   : > { %2786 = vrot.lane.b32.xlu0 %v6896_v29, %s5100_s11 }
 0x46e   : > { %2788 = vrot.lane.b32.xlu1 %v6903_v45, %s5100_s11 }
 0x471   : > { %2790 = vrot.lane.b32.xlu0 %v6905_v46, %s5100_s11 }
 0x472   : > { %2792 = vrot.lane.b32.xlu1 %v6916_v60, %s5100_s11 }
 0x474   : > { %v2587_v50 = vpop.permute.xlu0 %2586  ;;  %v2585_v30 = vpop.permute.xlu1 %2584 }
 0x475   : > { %2794 = vrot.lane.b32.xlu0 %v6923_v0, %s5100_s11  ;;  %2726 = vst.msk [vmem:[#allocation4 + $0x17] sm:$0xff] %vm657_vm3, %v2587_v50 }
 0x476   : > { %2725 = vst.msk [vmem:[#allocation4 + $0xf] sm:$0xfe] %vm655_vm5, %v2585_v30  ;;  %2796 = vrot.lane.b32.xlu1 %v6925_v56, %s5100_s11 }
 0x478   : > { %v2589_v37 = vpop.permute.xlu1 %2588 }
 0x479   : > { %2798 = vrot.lane.b32.xlu0 %v6936_v20, %s5100_s11  ;;  %2727 = vst.msk [vmem:[#allocation4 + $0x1f] sm:$0x1] %vm659_vm4, %v2589_v37 }
 0x47a   : > { %2800 = vrot.lane.b32.xlu1 %v6943_v52, %s5100_s11 }
 0x47b   : > { %v2591_v38 = vpop.permute.xlu0 %2590 }
 0x47c   : > { %2728 = vst.msk [vmem:[#allocation4 + $0x1f] sm:$0xfe] %vm655_vm5, %v2591_v38  ;;  %v2593_v43 = vpop.permute.xlu1 %2592 }
 0x47d   : > { %2802 = vrot.lane.b32.xlu0 %v6945_v14, %s5100_s11  ;;  %2729 = vst.msk [vmem:[#allocation4 + $0x27] sm:$0xff] %vm657_vm3, %v2593_v43 }
 0x47e   : > { %2804 = vrot.lane.b32.xlu1 %v6956_v18, %s5100_s11 }
 0x47f   : > { %v2595_v44 = vpop.permute.xlu0 %2594 }
 0x480   : > { %2730 = vst.msk [vmem:[#allocation4 + $0x2f] sm:$0x1] %vm659_vm4, %v2595_v44  ;;  %v2597_v7 = vpop.permute.xlu1 %2596 }
 0x481   : > { %2806 = vrot.lane.b32.xlu0 %v6963_v33, %s5100_s11  ;;  %2731 = vst.msk [vmem:[#allocation4 + $0x2f] sm:$0xfe] %vm655_vm5, %v2597_v7 }
 0x482   : > { %2808 = vrot.lane.b32.xlu1 %v6965_v34, %s5100_s11 }
 0x483   : > { %v2599_v41 = vpop.permute.xlu0 %2598 }
 0x484   : > { %2732 = vst.msk [vmem:[#allocation4 + $0x37] sm:$0xff] %vm657_vm3, %v2599_v41  ;;  %v2601_v25 = vpop.permute.xlu1 %2600 }
 0x485   : > { %2810 = vrot.lane.b32.xlu0 %v6976_v39, %s5100_s11  ;;  %2733 = vst.msk [vmem:[#allocation4 + $0x3f] sm:$0x1] %vm659_vm4, %v2601_v25 }
 0x486   : > { %2812 = vrot.lane.b32.xlu1 %v6983_v49, %s5100_s11 }
 0x487   : > { %v2603_v50 = vpop.permute.xlu0 %2602 }
 0x488   : > { %2734 = vst.msk [vmem:[#allocation4 + $0x3f] sm:$0xfe] %vm655_vm5, %v2603_v50  ;;  %v2605_v30 = vpop.permute.xlu1 %2604 }
 0x489   : > { %2814 = vrot.lane.b32.xlu0 %v6985_v47, %s5100_s11  ;;  %2735 = vst.msk [vmem:[#allocation4 + $0x47] sm:$0xff] %vm657_vm3, %v2605_v30 }
 0x48a   : > { %2816 = vrot.lane.b32.xlu1 %v6996_v53, %s5100_s11 }
 0x48b   : > { %v2607_v37 = vpop.permute.xlu0 %2606 }
 0x48c   : > { %2736 = vst.msk [vmem:[#allocation4 + $0x4f] sm:$0x1] %vm659_vm4, %v2607_v37  ;;  %v2609_v38 = vpop.permute.xlu1 %2608 }
 0x48d   : > { %2818 = vrot.lane.b32.xlu0 %v7003_v22, %s5100_s11  ;;  %2737 = vst.msk [vmem:[#allocation4 + $0x4f] sm:$0xfe] %vm655_vm5, %v2609_v38 }
 0x48e   : > { %2820 = vrot.lane.b32.xlu1 %v7005_v42, %s5100_s11 }
 0x48f   : > { %v2611_v43 = vpop.permute.xlu0 %2610 }
 0x490   : > { %2738 = vst.msk [vmem:[#allocation4 + $0x57] sm:$0xff] %vm657_vm3, %v2611_v43  ;;  %v2613_v44 = vpop.permute.xlu1 %2612 }
 0x491   : > { %2822 = vrot.lane.b32.xlu0 %v7016_v21, %s5100_s11  ;;  %2739 = vst.msk [vmem:[#allocation4 + $0x5f] sm:$0x1] %vm659_vm4, %v2613_v44 }
 0x492   : > { %2824 = vrot.lane.b32.xlu1 %v7023_v31, %s5100_s11 }
 0x493   : > { %v2615_v7 = vpop.permute.xlu0 %2614 }
 0x494   : > { %2740 = vst.msk [vmem:[#allocation4 + $0x5f] sm:$0xfe] %vm655_vm5, %v2615_v7  ;;  %v2617_v41 = vpop.permute.xlu1 %2616 }
 0x495   : > { %2826 = vrot.lane.b32.xlu0 %v7025_v48, %s5100_s11  ;;  %2741 = vst.msk [vmem:[#allocation4 + $0x67] sm:$0xff] %vm657_vm3, %v2617_v41 }
 0x496   : > { %2828 = vrot.lane.b32.xlu1 %v7036_v40, %s5100_s11 }
 0x497   : > { %v2619_v25 = vpop.permute.xlu0 %2618 }
 0x498   : > { %2742 = vst.msk [vmem:[#allocation4 + $0x6f] sm:$0x1] %vm659_vm4, %v2619_v25  ;;  %v2621_v50 = vpop.permute.xlu1 %2620 }
 0x499   : > { %2830 = vrot.lane.b32.xlu0 %v7043_v26, %s5100_s11  ;;  %2743 = vst.msk [vmem:[#allocation4 + $0x6f] sm:$0xfe] %vm655_vm5, %v2621_v50 }
 0x49a   : > { %2832 = vrot.lane.b32.xlu1 %v7045_v59, %s5100_s11 }
 0x49b   : > { %v2623_v30 = vpop.permute.xlu0 %2622 }
 0x49c   : > { %2744 = vst.msk [vmem:[#allocation4 + $0x77] sm:$0xff] %vm657_vm3, %v2623_v30  ;;  %v2625_v37 = vpop.permute.xlu1 %2624 }
 0x49d   : > { %2834 = vrot.lane.b32.xlu0 %v7056_v15, %s5100_s11  ;;  %2745 = vst.msk [vmem:[#allocation4 + $0x7f] sm:$0x1] %vm659_vm4, %v2625_v37 }
 0x49e   : > { %2836 = vrot.lane.b32.xlu1 %v7063_v11, %s5100_s11 }
 0x49f   : > { %v2627_v38 = vpop.permute.xlu0 %2626 }
 0x4a0   : > { %2746 = vst.msk [vmem:[#allocation4 + $0x7f] sm:$0xfe] %vm655_vm5, %v2627_v38  ;;  %v2629_v43 = vpop.permute.xlu1 %2628 }
 0x4a1   : > { %2838 = vrot.lane.b32.xlu0 %v7065_v23, %s5100_s11  ;;  %2747 = vst.msk [vmem:[#allocation4 + $0x87] sm:$0xff] %vm657_vm3, %v2629_v43 }
 0x4a2   : > { %2840 = vrot.lane.b32.xlu1 %v7076_v10, %s5100_s11 }
 0x4a3   : > { %v2631_v44 = vpop.permute.xlu0 %2630 }
 0x4a4   : > { %2748 = vst.msk [vmem:[#allocation4 + $0x8f] sm:$0x1] %vm659_vm4, %v2631_v44  ;;  %v2633_v7 = vpop.permute.xlu1 %2632 }
 0x4a5   : > { %2842 = vrot.lane.b32.xlu0 %v7083_v58, %s5100_s11  ;;  %2749 = vst.msk [vmem:[#allocation4 + $0x8f] sm:$0xfe] %vm655_vm5, %v2633_v7 }
 0x4a6   : > { %2844 = vrot.lane.b32.xlu1 %v7085_v61, %s5100_s11 }
 0x4a7   : > { %v2635_v41 = vpop.permute.xlu0 %2634 }
 0x4a8   : > { %2750 = vst.msk [vmem:[#allocation4 + $0x97] sm:$0xff] %vm657_vm3, %v2635_v41  ;;  %v2637_v25 = vpop.permute.xlu1 %2636 }
 0x4a9   : > { %2846 = vrot.lane.b32.xlu0 %v7096_v62, %s5100_s11  ;;  %2751 = vst.msk [vmem:[#allocation4 + $0x9f] sm:$0x1] %vm659_vm4, %v2637_v25 }
 0x4aa   : > { %2848 = vrot.lane.b32.xlu1 %v7103_v24, %s5100_s11 }
 0x4ab   : > { %v2639_v50 = vpop.permute.xlu0 %2638 }
 0x4ac   : > { %2752 = vst.msk [vmem:[#allocation4 + $0x9f] sm:$0xfe] %vm655_vm5, %v2639_v50  ;;  %v2641_v30 = vpop.permute.xlu1 %2640 }
 0x4ad   : > { %2850 = vrot.lane.b32.xlu0 %v7105_v36, %s5100_s11  ;;  %2753 = vst.msk [vmem:[#allocation4 + $0xa7] sm:$0xff] %vm657_vm3, %v2641_v30 }
 0x4ae   : > { %2852 = vrot.lane.b32.xlu1 %v7116_v63, %s5100_s11 }
 0x4af   : > { %v2643_v37 = vpop.permute.xlu0 %2642 }
 0x4b0   : > { %2754 = vst.msk [vmem:[#allocation4 + $0xaf] sm:$0x1] %vm659_vm4, %v2643_v37  ;;  %v2645_v38 = vpop.permute.xlu1 %2644 }
 0x4b1   : > { %2854 = vrot.lane.b32.xlu0 %v7121_v17, %s5100_s11  ;;  %2755 = vst.msk [vmem:[#allocation4 + $0xaf] sm:$0xfe] %vm655_vm5, %v2645_v38 }
 0x4b2   : > { %2856 = vrot.lane.b32.xlu1 %v7123_v55, %s5100_s11 }
 0x4b3   : > { %v2647_v43 = vpop.permute.xlu0 %2646 }
 0x4b4   : > { %2756 = vst.msk [vmem:[#allocation4 + $0xb7] sm:$0xff] %vm657_vm3, %v2647_v43  ;;  %v2649_v44 = vpop.permute.xlu1 %2648 }
 0x4b5   : > { %2858 = vrot.lane.b32.xlu0 %v7133_v54, %s5100_s11  ;;  %2757 = vst.msk [vmem:[#allocation4 + $0xbf] sm:$0x1] %vm659_vm4, %v2649_v44 }
 0x4b6   : > { %2860 = vrot.lane.b32.xlu1 %v7137_v19, %s5100_s11 }
 0x4b7   : > { %v2651_v7 = vpop.permute.xlu0 %2650 }
 0x4b8   : > { %2758 = vst.msk [vmem:[#allocation4 + $0xbf] sm:$0xfe] %vm655_vm5, %v2651_v7  ;;  %v2653_v41 = vpop.permute.xlu1 %2652 }
 0x4b9   : > { %2862 = vrot.lane.b32.xlu0 %v7139_v51, %s5100_s11  ;;  %2759 = vst.msk [vmem:[#allocation4 + $0xc7] sm:$0xff] %vm657_vm3, %v2653_v41 }
 0x4ba   : > { %2864 = vrot.lane.b32.xlu1 %v7149_v28, %s5100_s11 }
 0x4bb   : > { %v2655_v25 = vpop.permute.xlu0 %2654 }
 0x4bc   : > { %2760 = vst.msk [vmem:[#allocation4 + $0xcf] sm:$0x1] %vm659_vm4, %v2655_v25  ;;  %v2657_v50 = vpop.permute.xlu1 %2656 }
 0x4bd   : > { %2964 = vrot.lane.b32.xlu0 %v6865_v27, %s5101_s12  ;;  %2761 = vst.msk [vmem:[#allocation4 + $0xcf] sm:$0xfe] %vm655_vm5, %v2657_v50 }
 0x4be   : > { %2966 = vrot.lane.b32.xlu1 %v6863_v57, %s5101_s12 }
 0x4bf   : > { %v2659_v30 = vpop.permute.xlu0 %2658 }
 0x4c0   : > { %2762 = vst.msk [vmem:[#allocation4 + $0xd7] sm:$0xff] %vm657_vm3, %v2659_v30  ;;  %v2661_v37 = vpop.permute.xlu1 %2660 }
 0x4c1   : > { %2968 = vrot.lane.b32.xlu0 %v6883_v35, %s5101_s12  ;;  %2763 = vst.msk [vmem:[#allocation4 + $0xdf] sm:$0x1] %vm659_vm4, %v2661_v37 }
 0x4c2   : > { %2970 = vrot.lane.b32.xlu1 %v6885_v16, %s5101_s12 }
 0x4c3   : > { %v2663_v38 = vpop.permute.xlu0 %2662 }
 0x4c4   : > { %2764 = vst.msk [vmem:[#allocation4 + $0xdf] sm:$0xfe] %vm655_vm5, %v2663_v38  ;;  %v2665_v43 = vpop.permute.xlu1 %2664 }
 0x4c5   : > { %2972 = vrot.lane.b32.xlu0 %v6903_v45, %s5101_s12  ;;  %2765 = vst.msk [vmem:[#allocation4 + $0xe7] sm:$0xff] %vm657_vm3, %v2665_v43 }
 0x4c6   : > { %2974 = vrot.lane.b32.xlu1 %v6905_v46, %s5101_s12 }
 0x4c7   : > { %v2667_v44 = vpop.permute.xlu0 %2666 }
 0x4c8   : > { %2766 = vst.msk [vmem:[#allocation4 + $0xef] sm:$0x1] %vm659_vm4, %v2667_v44  ;;  %v2669_v7 = vpop.permute.xlu1 %2668 }
 0x4c9   : > { %2976 = vrot.lane.b32.xlu0 %v6923_v0, %s5101_s12  ;;  %2767 = vst.msk [vmem:[#allocation4 + $0xef] sm:$0xfe] %vm655_vm5, %v2669_v7  ;;  %vm8410_vm5 = vmmov %vm8407_vm0 }
 0x4ca   : > { %2978 = vrot.lane.b32.xlu1 %v6925_v56, %s5101_s12 }
 0x4cb   : > { %v2671_v41 = vpop.permute.xlu0 %2670 }
 0x4cc   : > { %2768 = vst.msk [vmem:[#allocation4 + $0xf7] sm:$0xff] %vm657_vm3, %v2671_v41  ;;  %v2673_v25 = vpop.permute.xlu1 %2672  ;;  %vm8408_vm3 = vmmov %vm8407_vm0 }
 0x4cd   : > { %2980 = vrot.lane.b32.xlu0 %v6943_v52, %s5101_s12  ;;  %2769 = vst.msk [vmem:[#allocation4 + $0xff] sm:$0x1] %vm659_vm4, %v2673_v25  ;;  %vm8409_vm4 = vmmov %vm8407_vm0 }
 0x4ce   : > { %2982 = vrot.lane.b32.xlu1 %v6945_v14, %s5101_s12 }
 0x4cf   : > { %v2771_v50 = vpop.permute.xlu0 %2770 }
 0x4d0   : > { %2914 = vst.msk [vmem:[#allocation4 - $0x2] sm:$0xfc] %vm850_vm6, %v2771_v50  ;;  %v2773_v30 = vpop.permute.xlu1 %2772 }
 0x4d1   : > { %2984 = vrot.lane.b32.xlu0 %v6963_v33, %s5101_s12  ;;  %2915 = vst.msk [vmem:[#allocation4 + $0x6] sm:$0xff] %vm852_vm7, %v2773_v30 }
 0x4d2   : > { %2986 = vrot.lane.b32.xlu1 %v6965_v34, %s5101_s12 }
 0x4d3   : > { %v2775_v37 = vpop.permute.xlu0 %2774 }
 0x4d4   : > { %2916 = vst.msk [vmem:[#allocation4 + $0xe] sm:$0x3] %vm854_vm8, %v2775_v37  ;;  %v2777_v38 = vpop.permute.xlu1 %2776 }
 0x4d5   : > { %2988 = vrot.lane.b32.xlu0 %v6983_v49, %s5101_s12  ;;  %2917 = vst.msk [vmem:[#allocation4 + $0xe] sm:$0xfc] %vm850_vm6, %v2777_v38 }
 0x4d6   : > { %2990 = vrot.lane.b32.xlu1 %v6985_v47, %s5101_s12 }
 0x4d7   : > { %v2779_v43 = vpop.permute.xlu0 %2778 }
 0x4d8   : > { %2918 = vst.msk [vmem:[#allocation4 + $0x16] sm:$0xff] %vm852_vm7, %v2779_v43  ;;  %v2781_v44 = vpop.permute.xlu1 %2780 }
 0x4d9   : > { %2992 = vrot.lane.b32.xlu0 %v7003_v22, %s5101_s12  ;;  %2919 = vst.msk [vmem:[#allocation4 + $0x1e] sm:$0x3] %vm854_vm8, %v2781_v44 }
 0x4da   : > { %2994 = vrot.lane.b32.xlu1 %v7005_v42, %s5101_s12 }
 0x4db   : > { %v2783_v7 = vpop.permute.xlu0 %2782 }
 0x4dc   : > { %2920 = vst.msk [vmem:[#allocation4 + $0x1e] sm:$0xfc] %vm850_vm6, %v2783_v7  ;;  %v2785_v41 = vpop.permute.xlu1 %2784 }
 0x4dd   : > { %2996 = vrot.lane.b32.xlu0 %v7023_v31, %s5101_s12  ;;  %2921 = vst.msk [vmem:[#allocation4 + $0x26] sm:$0xff] %vm852_vm7, %v2785_v41 }
 0x4de   : > { %2998 = vrot.lane.b32.xlu1 %v7025_v48, %s5101_s12 }
 0x4df   : > { %v2787_v25 = vpop.permute.xlu0 %2786 }
 0x4e0   : > { %2922 = vst.msk [vmem:[#allocation4 + $0x2e] sm:$0x3] %vm854_vm8, %v2787_v25  ;;  %v2789_v50 = vpop.permute.xlu1 %2788 }
 0x4e1   : > { %3000 = vrot.lane.b32.xlu0 %v7043_v26, %s5101_s12  ;;  %2923 = vst.msk [vmem:[#allocation4 + $0x2e] sm:$0xfc] %vm850_vm6, %v2789_v50 }
 0x4e2   : > { %3002 = vrot.lane.b32.xlu1 %v7045_v59, %s5101_s12 }
 0x4e3   : > { %v2791_v30 = vpop.permute.xlu0 %2790 }
 0x4e4   : > { %2924 = vst.msk [vmem:[#allocation4 + $0x36] sm:$0xff] %vm852_vm7, %v2791_v30  ;;  %v2793_v37 = vpop.permute.xlu1 %2792 }
 0x4e5   : > { %3004 = vrot.lane.b32.xlu0 %v7063_v11, %s5101_s12  ;;  %2925 = vst.msk [vmem:[#allocation4 + $0x3e] sm:$0x3] %vm854_vm8, %v2793_v37 }
 0x4e6   : > { %3006 = vrot.lane.b32.xlu1 %v7065_v23, %s5101_s12 }
 0x4e7   : > { %v2795_v38 = vpop.permute.xlu0 %2794 }
 0x4e8   : > { %2926 = vst.msk [vmem:[#allocation4 + $0x3e] sm:$0xfc] %vm850_vm6, %v2795_v38  ;;  %v2797_v43 = vpop.permute.xlu1 %2796  ;;  %v7379_v38 = vld [vmem:[#allocation3 + $0x180] sm:$0xff] }
 0x4e9   : > { %3008 = vrot.lane.b32.xlu0 %v7083_v58, %s5101_s12  ;;  %2927 = vst.msk [vmem:[#allocation4 + $0x46] sm:$0xff] %vm852_vm7, %v2797_v43 }
 0x4ea   : > { %3010 = vrot.lane.b32.xlu1 %v7085_v61, %s5101_s12 }
 0x4eb   : > { %v2799_v44 = vpop.permute.xlu0 %2798 }
 0x4ec   : > { %2928 = vst.msk [vmem:[#allocation4 + $0x4e] sm:$0x3] %vm854_vm8, %v2799_v44  ;;  %v2801_v7 = vpop.permute.xlu1 %2800  ;;  %v7384_v44 = vld [vmem:[#allocation3 + $0x188] sm:$0xff] }
 0x4ed   : > { %3012 = vrot.lane.b32.xlu0 %v7103_v24, %s5101_s12  ;;  %2929 = vst.msk [vmem:[#allocation4 + $0x4e] sm:$0xfc] %vm850_vm6, %v2801_v7 }
 0x4ee   : > { %3014 = vrot.lane.b32.xlu1 %v7105_v36, %s5101_s12 }
 0x4ef   : > { %v2803_v41 = vpop.permute.xlu0 %2802 }
 0x4f0   : > { %2930 = vst.msk [vmem:[#allocation4 + $0x56] sm:$0xff] %vm852_vm7, %v2803_v41  ;;  %v2805_v25 = vpop.permute.xlu1 %2804 }
 0x4f1   : > { %3016 = vrot.lane.b32.xlu0 %v7121_v17, %s5101_s12  ;;  %2931 = vst.msk [vmem:[#allocation4 + $0x5e] sm:$0x3] %vm854_vm8, %v2805_v25 }
 0x4f2   : > { %3018 = vrot.lane.b32.xlu1 %v7123_v55, %s5101_s12 }
 0x4f3   : > { %v2807_v50 = vpop.permute.xlu0 %2806 }
 0x4f4   : > { %2932 = vst.msk [vmem:[#allocation4 + $0x5e] sm:$0xfc] %vm850_vm6, %v2807_v50  ;;  %v2809_v30 = vpop.permute.xlu1 %2808 }
 0x4f5   : > { %3020 = vrot.lane.b32.xlu0 %v7137_v19, %s5101_s12  ;;  %2933 = vst.msk [vmem:[#allocation4 + $0x66] sm:$0xff] %vm852_vm7, %v2809_v30 }
 0x4f6   : > { %3022 = vrot.lane.b32.xlu1 %v7139_v51, %s5101_s12 }
 0x4f7   : > { %v2811_v37 = vpop.permute.xlu0 %2810 }
 0x4f8   : > { %2934 = vst.msk [vmem:[#allocation4 + $0x6e] sm:$0x3] %vm854_vm8, %v2811_v37  ;;  %v2813_v43 = vpop.permute.xlu1 %2812 }
 0x4f9   : > { %3024 = vrot.lane.b32.xlu0 %v7379_v38, %s5101_s12  ;;  %2935 = vst.msk [vmem:[#allocation4 + $0x6e] sm:$0xfc] %vm850_vm6, %v2813_v43 }
 0x4fa   : > { %3026 = vrot.lane.b32.xlu1 %v7384_v44, %s5101_s12 }
 0x4fb   : > { %v2815_v7 = vpop.permute.xlu0 %2814 }
 0x4fc   : > { %2936 = vst.msk [vmem:[#allocation4 + $0x76] sm:$0xff] %vm852_vm7, %v2815_v7  ;;  %v2817_v41 = vpop.permute.xlu1 %2816 }
 0x4fd   : > { %3093 = vrot.lane.b32.xlu0 %v6865_v27, %s5102_s13  ;;  %2937 = vst.msk [vmem:[#allocation4 + $0x7e] sm:$0x3] %vm854_vm8, %v2817_v41 }
 0x4fe   : > { %3095 = vrot.lane.b32.xlu1 %v6863_v57, %s5102_s13 }
 0x4ff   : > { %v2819_v25 = vpop.permute.xlu0 %2818 }
 0x500   : > { %2938 = vst.msk [vmem:[#allocation4 + $0x7e] sm:$0xfc] %vm850_vm6, %v2819_v25  ;;  %v2821_v50 = vpop.permute.xlu1 %2820 }
 0x501   : > { %3097 = vrot.lane.b32.xlu0 %v6876_v32, %s5102_s13  ;;  %2939 = vst.msk [vmem:[#allocation4 + $0x86] sm:$0xff] %vm852_vm7, %v2821_v50 }
 0x502   : > { %3099 = vrot.lane.b32.xlu1 %v6883_v35, %s5102_s13 }
 0x503   : > { %v2823_v30 = vpop.permute.xlu0 %2822 }
 0x504   : > { %2940 = vst.msk [vmem:[#allocation4 + $0x8e] sm:$0x3] %vm854_vm8, %v2823_v30  ;;  %v2825_v37 = vpop.permute.xlu1 %2824 }
 0x505   : > { %3101 = vrot.lane.b32.xlu0 %v6885_v16, %s5102_s13  ;;  %2941 = vst.msk [vmem:[#allocation4 + $0x8e] sm:$0xfc] %vm850_vm6, %v2825_v37 }
 0x506   : > { %3103 = vrot.lane.b32.xlu1 %v6896_v29, %s5102_s13 }
 0x507   : > { %v2827_v43 = vpop.permute.xlu0 %2826 }
 0x508   : > { %2942 = vst.msk [vmem:[#allocation4 + $0x96] sm:$0xff] %vm852_vm7, %v2827_v43  ;;  %v2829_v32 = vpop.permute.xlu1 %2828 }
 0x509   : > { %3105 = vrot.lane.b32.xlu0 %v6903_v45, %s5102_s13  ;;  %2943 = vst.msk [vmem:[#allocation4 + $0x9e] sm:$0x3] %vm854_vm8, %v2829_v32 }
 0x50a   : > { %3107 = vrot.lane.b32.xlu1 %v6905_v46, %s5102_s13 }
 0x50b   : > { %v2831_v7 = vpop.permute.xlu0 %2830 }
 0x50c   : > { %2944 = vst.msk [vmem:[#allocation4 + $0x9e] sm:$0xfc] %vm850_vm6, %v2831_v7  ;;  %v2833_v41 = vpop.permute.xlu1 %2832 }
 0x50d   : > { %3109 = vrot.lane.b32.xlu0 %v6916_v60, %s5102_s13  ;;  %2945 = vst.msk [vmem:[#allocation4 + $0xa6] sm:$0xff] %vm852_vm7, %v2833_v41 }
 0x50e   : > { %3111 = vrot.lane.b32.xlu1 %v6923_v0, %s5102_s13 }
 0x50f   : > { %v2835_v29 = vpop.permute.xlu0 %2834 }
 0x510   : > { %2946 = vst.msk [vmem:[#allocation4 + $0xae] sm:$0x3] %vm854_vm8, %v2835_v29  ;;  %v2837_v25 = vpop.permute.xlu1 %2836 }
 0x511   : > { %3113 = vrot.lane.b32.xlu0 %v6925_v56, %s5102_s13  ;;  %2947 = vst.msk [vmem:[#allocation4 + $0xae] sm:$0xfc] %vm850_vm6, %v2837_v25 }
 0x512   : > { %3115 = vrot.lane.b32.xlu1 %v6936_v20, %s5102_s13 }
 0x513   : > { %v2839_v50 = vpop.permute.xlu0 %2838 }
 0x514   : > { %2948 = vst.msk [vmem:[#allocation4 + $0xb6] sm:$0xff] %vm852_vm7, %v2839_v50  ;;  %v2841_v60 = vpop.permute.xlu1 %2840 }
 0x515   : > { %3117 = vrot.lane.b32.xlu0 %v6943_v52, %s5102_s13  ;;  %2949 = vst.msk [vmem:[#allocation4 + $0xbe] sm:$0x3] %vm854_vm8, %v2841_v60 }
 0x516   : > { %3119 = vrot.lane.b32.xlu1 %v6945_v14, %s5102_s13 }
 0x517   : > { %v2843_v30 = vpop.permute.xlu0 %2842 }
 0x518   : > { %2950 = vst.msk [vmem:[#allocation4 + $0xbe] sm:$0xfc] %vm850_vm6, %v2843_v30  ;;  %v2845_v37 = vpop.permute.xlu1 %2844 }
 0x519   : > { %3121 = vrot.lane.b32.xlu0 %v6956_v18, %s5102_s13  ;;  %2951 = vst.msk [vmem:[#allocation4 + $0xc6] sm:$0xff] %vm852_vm7, %v2845_v37 }
 0x51a   : > { %3123 = vrot.lane.b32.xlu1 %v6963_v33, %s5102_s13 }
 0x51b   : > { %v2847_v20 = vpop.permute.xlu0 %2846 }
 0x51c   : > { %2952 = vst.msk [vmem:[#allocation4 + $0xce] sm:$0x3] %vm854_vm8, %v2847_v20  ;;  %v2849_v43 = vpop.permute.xlu1 %2848 }
 0x51d   : > { %3125 = vrot.lane.b32.xlu0 %v6965_v34, %s5102_s13  ;;  %2953 = vst.msk [vmem:[#allocation4 + $0xce] sm:$0xfc] %vm850_vm6, %v2849_v43 }
 0x51e   : > { %3127 = vrot.lane.b32.xlu1 %v6976_v39, %s5102_s13 }
 0x51f   : > { %v2851_v32 = vpop.permute.xlu0 %2850 }
 0x520   : > { %2954 = vst.msk [vmem:[#allocation4 + $0xd6] sm:$0xff] %vm852_vm7, %v2851_v32  ;;  %v2853_v18 = vpop.permute.xlu1 %2852 }
 0x521   : > { %3129 = vrot.lane.b32.xlu0 %v6983_v49, %s5102_s13  ;;  %2955 = vst.msk [vmem:[#allocation4 + $0xde] sm:$0x3] %vm854_vm8, %v2853_v18 }
 0x522   : > { %3131 = vrot.lane.b32.xlu1 %v6985_v47, %s5102_s13 }
 0x523   : > { %v2855_v7 = vpop.permute.xlu0 %2854 }
 0x524   : > { %2956 = vst.msk [vmem:[#allocation4 + $0xde] sm:$0xfc] %vm850_vm6, %v2855_v7  ;;  %v2857_v41 = vpop.permute.xlu1 %2856 }
 0x525   : > { %3133 = vrot.lane.b32.xlu0 %v6996_v53, %s5102_s13  ;;  %2957 = vst.msk [vmem:[#allocation4 + $0xe6] sm:$0xff] %vm852_vm7, %v2857_v41 }
 0x526   : > { %3135 = vrot.lane.b32.xlu1 %v7003_v22, %s5102_s13 }
 0x527   : > { %v2859_v39 = vpop.permute.xlu0 %2858 }
 0x528   : > { %2958 = vst.msk [vmem:[#allocation4 + $0xee] sm:$0x3] %vm854_vm8, %v2859_v39  ;;  %v2861_v29 = vpop.permute.xlu1 %2860 }
 0x529   : > { %3137 = vrot.lane.b32.xlu0 %v7005_v42, %s5102_s13  ;;  %2959 = vst.msk [vmem:[#allocation4 + $0xee] sm:$0xfc] %vm850_vm6, %v2861_v29  ;;  %vm8411_vm6 = vmmov %vm8407_vm0 }
 0x52a   : > { %3139 = vrot.lane.b32.xlu1 %v7016_v21, %s5102_s13 }
 0x52b   : > { %v2863_v25 = vpop.permute.xlu0 %2862 }
 0x52c   : > { %2960 = vst.msk [vmem:[#allocation4 + $0xf6] sm:$0xff] %vm852_vm7, %v2863_v25  ;;  %v2865_v53 = vpop.permute.xlu1 %2864  ;;  %vm8412_vm7 = vmmov %vm8407_vm0 }
 0x52d   : > { %3141 = vrot.lane.b32.xlu0 %v7023_v31, %s5102_s13  ;;  %2961 = vst.msk [vmem:[#allocation4 + $0xfe] sm:$0x3] %vm854_vm8, %v2865_v53  ;;  %vm8413_vm8 = vmmov %vm8407_vm0 }
 0x52e   : > { %3143 = vrot.lane.b32.xlu1 %v7025_v48, %s5102_s13 }
 0x52f   : > { %v2965_v50 = vpop.permute.xlu0 %2964 }
 0x530   : > { %3060 = vst.msk [vmem:[#allocation4] sm:$0xff] %vm999_vm9, %v2965_v50  ;;  %v2967_v60 = vpop.permute.xlu1 %2966 }
 0x531   : > { %3145 = vrot.lane.b32.xlu0 %v7036_v40, %s5102_s13  ;;  %3061 = vst.msk [vmem:[#allocation4 + $0x8] sm:$0xff] %vm999_vm9, %v2967_v60 }
 0x532   : > { %3147 = vrot.lane.b32.xlu1 %v7043_v26, %s5102_s13 }
 0x533   : > { %v2969_v21 = vpop.permute.xlu0 %2968 }
 0x534   : > { %3062 = vst.msk [vmem:[#allocation4 + $0x10] sm:$0xff] %vm999_vm9, %v2969_v21  ;;  %v2971_v30 = vpop.permute.xlu1 %2970 }
 0x535   : > { %3149 = vrot.lane.b32.xlu0 %v7045_v59, %s5102_s13  ;;  %3063 = vst.msk [vmem:[#allocation4 + $0x18] sm:$0xff] %vm999_vm9, %v2971_v30  ;;  %v7530_v30 = vld [vmem:[#allocation3 + $0x190] sm:$0x3] }
 0x536   : > { %3151 = vrot.lane.b32.xlu1 %v7056_v15, %s5102_s13 }
 0x537   : > { %v2973_v37 = vpop.permute.xlu0 %2972 }
 0x538   : > { %3064 = vst.msk [vmem:[#allocation4 + $0x20] sm:$0xff] %vm999_vm9, %v2973_v37  ;;  %v2975_v40 = vpop.permute.xlu1 %2974 }
 0x539   : > { %3153 = vrot.lane.b32.xlu0 %v7063_v11, %s5102_s13  ;;  %3065 = vst.msk [vmem:[#allocation4 + $0x28] sm:$0xff] %vm999_vm9, %v2975_v40 }
 0x53a   : > { %3155 = vrot.lane.b32.xlu1 %v7065_v23, %s5102_s13 }
 0x53b   : > { %v2977_v20 = vpop.permute.xlu0 %2976 }
 0x53c   : > { %3066 = vst.msk [vmem:[#allocation4 + $0x30] sm:$0xff] %vm999_vm9, %v2977_v20  ;;  %v2979_v43 = vpop.permute.xlu1 %2978 }
 0x53d   : > { %3157 = vrot.lane.b32.xlu0 %v7076_v10, %s5102_s13  ;;  %3067 = vst.msk [vmem:[#allocation4 + $0x38] sm:$0xff] %vm999_vm9, %v2979_v43 }
 0x53e   : > { %3159 = vrot.lane.b32.xlu1 %v7083_v58, %s5102_s13 }
 0x53f   : > { %v2981_v15 = vpop.permute.xlu0 %2980 }
 0x540   : > { %3068 = vst.msk [vmem:[#allocation4 + $0x40] sm:$0xff] %vm999_vm9, %v2981_v15  ;;  %v2983_v32 = vpop.permute.xlu1 %2982  ;;  %v5016_v15 = vld [vmem:[#allocation3 + $0x28] sm:$0x3] }
 0x541   : > { %3161 = vrot.lane.b32.xlu0 %v7085_v61, %s5102_s13  ;;  %3069 = vst.msk [vmem:[#allocation4 + $0x48] sm:$0xff] %vm999_vm9, %v2983_v32 }
 0x542   : > { %3163 = vrot.lane.b32.xlu1 %v7096_v62, %s5102_s13 }
 0x543   : > { %v2985_v18 = vpop.permute.xlu0 %2984 }
 0x544   : > { %3070 = vst.msk [vmem:[#allocation4 + $0x50] sm:$0xff] %vm999_vm9, %v2985_v18  ;;  %v2987_v10 = vpop.permute.xlu1 %2986 }
 0x545   : > { %3165 = vrot.lane.b32.xlu0 %v7103_v24, %s5102_s13  ;;  %3071 = vst.msk [vmem:[#allocation4 + $0x58] sm:$0xff] %vm999_vm9, %v2987_v10 }
 0x546   : > { %3167 = vrot.lane.b32.xlu1 %v7105_v36, %s5102_s13 }
 0x547   : > { %v2989_v7 = vpop.permute.xlu0 %2988 }
 0x548   : > { %3072 = vst.msk [vmem:[#allocation4 + $0x60] sm:$0xff] %vm999_vm9, %v2989_v7  ;;  %v2991_v41 = vpop.permute.xlu1 %2990 }
 0x549   : > { %3169 = vrot.lane.b32.xlu0 %v7116_v63, %s5102_s13  ;;  %3073 = vst.msk [vmem:[#allocation4 + $0x68] sm:$0xff] %vm999_vm9, %v2991_v41 }
 0x54a   : > { %3171 = vrot.lane.b32.xlu1 %v7121_v17, %s5102_s13 }
 0x54b   : > { %v2993_v62 = vpop.permute.xlu0 %2992 }
 0x54c   : > { %3074 = vst.msk [vmem:[#allocation4 + $0x70] sm:$0xff] %vm999_vm9, %v2993_v62  ;;  %v2995_v39 = vpop.permute.xlu1 %2994  ;;  %v7560_v62 = vld [vmem:[#allocation3 + $0x58] sm:$0x3] }
 0x54d   : > { %3173 = vrot.lane.b32.xlu0 %v7123_v55, %s5102_s13  ;;  %3075 = vst.msk [vmem:[#allocation4 + $0x78] sm:$0xff] %vm999_vm9, %v2995_v39 }
 0x54e   : > { %3175 = vrot.lane.b32.xlu1 %v7133_v54, %s5102_s13 }
 0x54f   : > { %v2997_v29 = vpop.permute.xlu0 %2996 }
 0x550   : > { %3076 = vst.msk [vmem:[#allocation4 + $0x80] sm:$0xff] %vm999_vm9, %v2997_v29  ;;  %v2999_v25 = vpop.permute.xlu1 %2998 }
 0x551   : > { %3177 = vrot.lane.b32.xlu0 %v7137_v19, %s5102_s13  ;;  %3077 = vst.msk [vmem:[#allocation4 + $0x88] sm:$0xff] %vm999_vm9, %v2999_v25  ;;  %v7571_v25 = vld [vmem:[#allocation3 + $0x70] sm:$0x3] }
 0x552   : > { %3179 = vrot.lane.b32.xlu1 %v7139_v51, %s5102_s13 }
 0x553   : > { %v3001_v53 = vpop.permute.xlu0 %3000 }
 0x554   : > { %3078 = vst.msk [vmem:[#allocation4 + $0x90] sm:$0xff] %vm999_vm9, %v3001_v53  ;;  %v3003_v50 = vpop.permute.xlu1 %3002 }
 0x555   : > { %3181 = vrot.lane.b32.xlu0 %v7149_v28, %s5102_s13  ;;  %3079 = vst.msk [vmem:[#allocation4 + $0x98] sm:$0xff] %vm999_vm9, %v3003_v50 }
 0x556   : > { %3183 = vrot.lane.b32.xlu1 %v7379_v38, %s5102_s13 }
 0x557   : > { %v3005_v60 = vpop.permute.xlu0 %3004 }
 0x558   : > { %3080 = vst.msk [vmem:[#allocation4 + $0xa0] sm:$0xff] %vm999_vm9, %v3005_v60  ;;  %v3007_v21 = vpop.permute.xlu1 %3006 }
 0x559   : > { %3185 = vrot.lane.b32.xlu0 %v7384_v44, %s5102_s13  ;;  %3081 = vst.msk [vmem:[#allocation4 + $0xa8] sm:$0xff] %vm999_vm9, %v3007_v21 }
 0x55a   : > { %3187 = vrot.lane.b32.xlu1 %v7530_v30, %s5102_s13 }
 0x55b   : > { %v3009_v37 = vpop.permute.xlu0 %3008 }
 0x55c   : > { %3082 = vst.msk [vmem:[#allocation4 + $0xb0] sm:$0xff] %vm999_vm9, %v3009_v37  ;;  %v3011_v40 = vpop.permute.xlu1 %3010  ;;  %v7582_v37 = vld [vmem:[#allocation3 + $0x88] sm:$0x3] }
 0x55d   : > { %3285 = vrot.lane.b32.xlu0 %v6865_v27, %s5103_s14  ;;  %3083 = vst.msk [vmem:[#allocation4 + $0xb8] sm:$0xff] %vm999_vm9, %v3011_v40 }
 0x55e   : > { %3287 = vrot.lane.b32.xlu1 %v6863_v57, %s5103_s14  ;;  %v7549_v57 = vld [vmem:[#allocation3 + $0x40] sm:$0x3] }
 0x55f   : > { %v3013_v20 = vpop.permute.xlu0 %3012 }
 0x560   : > { %3084 = vst.msk [vmem:[#allocation4 + $0xc0] sm:$0xff] %vm999_vm9, %v3013_v20  ;;  %v3015_v43 = vpop.permute.xlu1 %3014 }
 0x561   : > { %3289 = vrot.lane.b32.xlu0 %v5016_v15, %s5103_s14  ;;  %3085 = vst.msk [vmem:[#allocation4 + $0xc8] sm:$0xff] %vm999_vm9, %v3015_v43  ;;  %v7593_v43 = vld [vmem:[#allocation3 + $0xa0] sm:$0x3] }
 0x562   : > { %3291 = vrot.lane.b32.xlu1 %v6883_v35, %s5103_s14 }
 0x563   : > { %v3017_v32 = vpop.permute.xlu0 %3016 }
 0x564   : > { %3086 = vst.msk [vmem:[#allocation4 + $0xd0] sm:$0xff] %vm999_vm9, %v3017_v32  ;;  %v3019_v27 = vpop.permute.xlu1 %3018 }
 0x565   : > { %3293 = vrot.lane.b32.xlu0 %v6885_v16, %s5103_s14  ;;  %3087 = vst.msk [vmem:[#allocation4 + $0xd8] sm:$0xff] %vm999_vm9, %v3019_v27 }
 0x566   : > { %3295 = vrot.lane.b32.xlu1 %v7549_v57, %s5103_s14 }
 0x567   : > { %v3021_v18 = vpop.permute.xlu0 %3020 }
 0x568   : > { %3088 = vst.msk [vmem:[#allocation4 + $0xe0] sm:$0xff] %vm999_vm9, %v3021_v18  ;;  %v3023_v10 = vpop.permute.xlu1 %3022 }
 0x569   : > { %3297 = vrot.lane.b32.xlu0 %v6903_v45, %s5103_s14  ;;  %3089 = vst.msk [vmem:[#allocation4 + $0xe8] sm:$0xff] %vm999_vm9, %v3023_v10  ;;  %v7604_v10 = vld [vmem:[#allocation3 + $0xb8] sm:$0x3] }
 0x56a   : > { %3299 = vrot.lane.b32.xlu1 %v6905_v46, %s5103_s14 }
 0x56b   : > { %v3025_v7 = vpop.permute.xlu0 %3024 }
 0x56c   : > { %3090 = vst.msk [vmem:[#allocation4 + $0xf0] sm:$0xff] %vm999_vm9, %v3025_v7  ;;  %v3027_v41 = vpop.permute.xlu1 %3026 }
 0x56d   : > { %3301 = vrot.lane.b32.xlu0 %v7560_v62, %s5103_s14  ;;  %3091 = vst.msk [vmem:[#allocation4 + $0xf8] sm:$0xff] %vm999_vm9, %v3027_v41  ;;  %vm8414_vm9 = vmmov %vm8407_vm0 }
 0x56e   : > { %3303 = vrot.lane.b32.xlu1 %v6923_v0, %s5103_s14 }
 0x56f   : > { %v3094_v39 = vpop.permute.xlu0 %3093 }
 0x570   : > { %3237 = vst.msk [vmem:[#allocation4 - $0x1] sm:$0xfe] %vm1177_vm10, %v3094_v39  ;;  %v3096_v29 = vpop.permute.xlu1 %3095  ;;  %v7615_v39 = vld [vmem:[#allocation3 + $0xd0] sm:$0x3] }
 0x571   : > { %3305 = vrot.lane.b32.xlu0 %v6925_v56, %s5103_s14  ;;  %3238 = vst.msk [vmem:[#allocation4 + $0x7] sm:$0xff] %vm1179_vm11, %v3096_v29 }
 0x572   : > { %3307 = vrot.lane.b32.xlu1 %v7571_v25, %s5103_s14 }
 0x573   : > { %v3098_v53 = vpop.permute.xlu0 %3097 }
 0x574   : > { %3239 = vst.msk [vmem:[#allocation4 + $0xf] sm:$0x1] %vm8407_vm0, %v3098_v53  ;;  %v3100_v50 = vpop.permute.xlu1 %3099 }
 0x575   : > { %3309 = vrot.lane.b32.xlu0 %v6943_v52, %s5103_s14  ;;  %3240 = vst.msk [vmem:[#allocation4 + $0xf] sm:$0xfe] %vm1177_vm10, %v3100_v50 }
 0x576   : > { %3311 = vrot.lane.b32.xlu1 %v6945_v14, %s5103_s14 }
 0x577   : > { %v3102_v60 = vpop.permute.xlu0 %3101 }
 0x578   : > { %3241 = vst.msk [vmem:[#allocation4 + $0x17] sm:$0xff] %vm1179_vm11, %v3102_v60  ;;  %v3104_v21 = vpop.permute.xlu1 %3103 }
 0x579   : > { %3313 = vrot.lane.b32.xlu0 %v7582_v37, %s5103_s14  ;;  %3242 = vst.msk [vmem:[#allocation4 + $0x1f] sm:$0x1] %vm8408_vm3, %v3104_v21  ;;  %v7626_v21 = vld [vmem:[#allocation3 + $0xe8] sm:$0x3]  ;;  %vm8419_vm3 = vmmov %vm8407_vm0 }
 0x57a   : > { %3315 = vrot.lane.b32.xlu1 %v6963_v33, %s5103_s14 }
 0x57b   : > { %v3106_v40 = vpop.permute.xlu0 %3105 }
 0x57c   : > { %3243 = vst.msk [vmem:[#allocation4 + $0x1f] sm:$0xfe] %vm1177_vm10, %v3106_v40  ;;  %v3108_v20 = vpop.permute.xlu1 %3107 }
 0x57d   : > { %3317 = vrot.lane.b32.xlu0 %v6965_v34, %s5103_s14  ;;  %3244 = vst.msk [vmem:[#allocation4 + $0x27] sm:$0xff] %vm1179_vm11, %v3108_v20 }
 0x57e   : > { %3319 = vrot.lane.b32.xlu1 %v7593_v43, %s5103_s14 }
 0x57f   : > { %v3110_v15 = vpop.permute.xlu0 %3109 }
 0x580   : > { %3245 = vst.msk [vmem:[#allocation4 + $0x2f] sm:$0x1] %vm8409_vm4, %v3110_v15  ;;  %v3112_v32 = vpop.permute.xlu1 %3111  ;;  %v7637_v15 = vld [vmem:[#allocation3 + $0x100] sm:$0x3]  ;;  %vm8420_vm4 = vmmov %vm8407_vm0 }
 0x581   : > { %3321 = vrot.lane.b32.xlu0 %v6983_v49, %s5103_s14  ;;  %3246 = vst.msk [vmem:[#allocation4 + $0x2f] sm:$0xfe] %vm1177_vm10, %v3112_v32 }
 0x582   : > { %3323 = vrot.lane.b32.xlu1 %v6985_v47, %s5103_s14 }
 0x583   : > { %v3114_v27 = vpop.permute.xlu0 %3113 }
 0x584   : > { %3247 = vst.msk [vmem:[#allocation4 + $0x37] sm:$0xff] %vm1179_vm11, %v3114_v27  ;;  %v3116_v18 = vpop.permute.xlu1 %3115 }
 0x585   : > { %3325 = vrot.lane.b32.xlu0 %v7604_v10, %s5103_s14  ;;  %3248 = vst.msk [vmem:[#allocation4 + $0x3f] sm:$0x1] %vm8410_vm5, %v3116_v18  ;;  %vm8422_vm5 = vcmask 195746  }
 0x586   : > { %3327 = vrot.lane.b32.xlu1 %v7003_v22, %s5103_s14 }
 0x587   : > { %v3118_v7 = vpop.permute.xlu0 %3117 }
 0x588   : > { %3249 = vst.msk [vmem:[#allocation4 + $0x3f] sm:$0xfe] %vm1177_vm10, %v3118_v7  ;;  %v3120_v41 = vpop.permute.xlu1 %3119 }
 0x589   : > { %3329 = vrot.lane.b32.xlu0 %v7005_v42, %s5103_s14  ;;  %3250 = vst.msk [vmem:[#allocation4 + $0x47] sm:$0xff] %vm1179_vm11, %v3120_v41  ;;  %v7648_v41 = vld [vmem:[#allocation3 + $0x118] sm:$0x3] }
 0x58a   : > { %3331 = vrot.lane.b32.xlu1 %v7615_v39, %s5103_s14 }
 0x58b   : > { %v3122_v29 = vpop.permute.xlu0 %3121 }
 0x58c   : > { %3251 = vst.msk [vmem:[#allocation4 + $0x4f] sm:$0x1] %vm8411_vm6, %v3122_v29  ;;  %v3124_v53 = vpop.permute.xlu1 %3123  ;;  %vm8424_vm6 = vcmask 189600  }
 0x58d   : > { %3333 = vrot.lane.b32.xlu0 %v7023_v31, %s5103_s14  ;;  %3252 = vst.msk [vmem:[#allocation4 + $0x4f] sm:$0xfe] %vm1177_vm10, %v3124_v53 }
 0x58e   : > { %3335 = vrot.lane.b32.xlu1 %v7025_v48, %s5103_s14 }
 0x58f   : > { %v3126_v50 = vpop.permute.xlu0 %3125 }
 0x590   : > { %3253 = vst.msk [vmem:[#allocation4 + $0x57] sm:$0xff] %vm1179_vm11, %v3126_v50  ;;  %v3128_v60 = vpop.permute.xlu1 %3127  ;;  %v7659_v50 = vld [vmem:[#allocation3 + $0x130] sm:$0x3] }
 0x591   : > { %3337 = vrot.lane.b32.xlu0 %v7626_v21, %s5103_s14  ;;  %3254 = vst.msk [vmem:[#allocation4 + $0x5f] sm:$0x1] %vm8412_vm7, %v3128_v60  ;;  %vm8425_vm7 = vmmov %vm8422_vm5 }
 0x592   : > { %3339 = vrot.lane.b32.xlu1 %v7043_v26, %s5103_s14 }
 0x593   : > { %v3130_v40 = vpop.permute.xlu0 %3129 }
 0x594   : > { %3255 = vst.msk [vmem:[#allocation4 + $0x5f] sm:$0xfe] %vm1177_vm10, %v3130_v40  ;;  %v3132_v20 = vpop.permute.xlu1 %3131 }
 0x595   : > { %3341 = vrot.lane.b32.xlu0 %v7045_v59, %s5103_s14  ;;  %3256 = vst.msk [vmem:[#allocation4 + $0x67] sm:$0xff] %vm1179_vm11, %v3132_v20 }
 0x596   : > { %3343 = vrot.lane.b32.xlu1 %v7637_v15, %s5103_s14 }
 0x597   : > { %v3134_v32 = vpop.permute.xlu0 %3133 }
 0x598   : > { %3257 = vst.msk [vmem:[#allocation4 + $0x6f] sm:$0x1] %vm8413_vm8, %v3134_v32  ;;  %v3136_v27 = vpop.permute.xlu1 %3135 }
 0x599   : > { %3345 = vrot.lane.b32.xlu0 %v7063_v11, %s5103_s14  ;;  %3258 = vst.msk [vmem:[#allocation4 + $0x6f] sm:$0xfe] %vm1177_vm10, %v3136_v27 }
 0x59a   : > { %3347 = vrot.lane.b32.xlu1 %v7065_v23, %s5103_s14 }
 0x59b   : > { %v3138_v18 = vpop.permute.xlu0 %3137 }
 0x59c   : > { %3259 = vst.msk [vmem:[#allocation4 + $0x77] sm:$0xff] %vm1179_vm11, %v3138_v18  ;;  %v3140_v7 = vpop.permute.xlu1 %3139 }
 0x59d   : > { %3349 = vrot.lane.b32.xlu0 %v7648_v41, %s5103_s14  ;;  %3260 = vst.msk [vmem:[#allocation4 + $0x7f] sm:$0x1] %vm8414_vm9, %v3140_v7  ;;  %vm8427_vm9 = vmmov %vm8424_vm6 }
 0x59e   : > { %3351 = vrot.lane.b32.xlu1 %v7083_v58, %s5103_s14 }
 0x59f   : > { %v3142_v29 = vpop.permute.xlu0 %3141 }
 0x5a0   : > { %3261 = vst.msk [vmem:[#allocation4 + $0x7f] sm:$0xfe] %vm1177_vm10, %v3142_v29  ;;  %v3144_v53 = vpop.permute.xlu1 %3143 }
 0x5a1   : > { %3353 = vrot.lane.b32.xlu0 %v7085_v61, %s5103_s14  ;;  %3262 = vst.msk [vmem:[#allocation4 + $0x87] sm:$0xff] %vm1179_vm11, %v3144_v53 }
 0x5a2   : > { %3355 = vrot.lane.b32.xlu1 %v7659_v50, %s5103_s14 }
 0x5a3   : > { %v3146_v60 = vpop.permute.xlu0 %3145 }
 0x5a4   : > { %3263 = vst.msk [vmem:[#allocation4 + $0x8f] sm:$0x1] %vm8415_vm12, %v3146_v60  ;;  %v3148_v40 = vpop.permute.xlu1 %3147  ;;  %vm8428_vm12 = vmmov %vm8422_vm5 }
 0x5a5   : > { %3357 = vrot.lane.b32.xlu0 %v7103_v24, %s5103_s14  ;;  %3264 = vst.msk [vmem:[#allocation4 + $0x8f] sm:$0xfe] %vm1177_vm10, %v3148_v40 }
 0x5a6   : > { %3359 = vrot.lane.b32.xlu1 %v7105_v36, %s5103_s14 }
 0x5a7   : > { %v3150_v20 = vpop.permute.xlu0 %3149 }
 0x5a8   : > { %3265 = vst.msk [vmem:[#allocation4 + $0x97] sm:$0xff] %vm1179_vm11, %v3150_v20  ;;  %v3152_v32 = vpop.permute.xlu1 %3151 }
 0x5a9   : > { %3361 = vrot.lane.b32.xlu0 %v7116_v63, %s5103_s14  ;;  %3266 = vst.msk [vmem:[#allocation4 + $0x9f] sm:$0x1] %vm8416_vm13, %v3152_v32 }
 0x5aa   : > { %3363 = vrot.lane.b32.xlu1 %v7121_v17, %s5103_s14 }
 0x5ab   : > { %v3154_v27 = vpop.permute.xlu0 %3153 }
 0x5ac   : > { %3267 = vst.msk [vmem:[#allocation4 + $0x9f] sm:$0xfe] %vm1177_vm10, %v3154_v27  ;;  %v3156_v18 = vpop.permute.xlu1 %3155  ;;  %v4185_v27 = vld [vmem:[%s8349_s3] sm:$0xff] }
 0x5ad   : > { %3365 = vrot.lane.b32.xlu0 %v7123_v55, %s5103_s14  ;;  %3268 = vst.msk [vmem:[#allocation4 + $0xa7] sm:$0xff] %vm1179_vm11, %v3156_v18  ;;  %v4186_v18 = vld [vmem:[%s8349_s3 + $0x8] sm:$0xff] }
 0x5ae   : > { %3367 = vrot.lane.b32.xlu1 %v7133_v54, %s5103_s14 }
 0x5af   : > { %v3158_v7 = vpop.permute.xlu0 %3157 }
 0x5b0   : > { %3269 = vst.msk [vmem:[#allocation4 + $0xaf] sm:$0x1] %vm8417_vm1, %v3158_v7  ;;  %v3160_v63 = vpop.permute.xlu1 %3159  ;;  %v4941_v7 = vpack.c.bf16 %v4186_v18, %v4185_v27  ;;  %vm8430_vm1 = vmmov %vm8424_vm6 }
 0x5b1   : > { %3369 = vrot.lane.b32.xlu0 %v7137_v19, %s5103_s14  ;;  %3270 = vst.msk [vmem:[#allocation4 + $0xaf] sm:$0xfe] %vm1177_vm10, %v3160_v63 }
 0x5b2   : > { %3371 = vrot.lane.b32.xlu1 %v7139_v51, %s5103_s14  ;;  %4942 = vmatprep.subr.bf16.mxu1 %v4941_v7 }
 0x5b3   : > { %v3162_v29 = vpop.permute.xlu0 %3161  ;;  %4944 = vmatpush3.bf16.msra.mxu1 %v4941_v7 }
 0x5b4   : > { %3271 = vst.msk [vmem:[#allocation4 + $0xb7] sm:$0xff] %vm1179_vm11, %v3162_v29  ;;  %v3164_v53 = vpop.permute.xlu1 %3163 }
 0x5b5   : > { %3373 = vrot.lane.b32.xlu0 %v7149_v28, %s5103_s14  ;;  %3272 = vst.msk [vmem:[#allocation4 + $0xbf] sm:$0x1] %vm8418_vm15, %v3164_v53  ;;  %v4187_v53 = vld [vmem:[%s8349_s3 + $0x10] sm:$0xff]  ;;  %vm8431_vm15 = vmmov %vm8422_vm5 }
 0x5b6   : > { %3375 = vrot.lane.b32.xlu1 %v7379_v38, %s5103_s14 }
 0x5b7   : > { %v3166_v54 = vpop.permute.xlu0 %3165 }
 0x5b8   : > { %3273 = vst.msk [vmem:[#allocation4 + $0xbf] sm:$0xfe] %vm1177_vm10, %v3166_v54  ;;  %v3168_v60 = vpop.permute.xlu1 %3167  ;;  %v4188_v54 = vld [vmem:[%s8349_s3 + $0x18] sm:$0xff] }
 0x5b9   : > { %3377 = vrot.lane.b32.xlu0 %v7384_v44, %s5103_s14  ;;  %3274 = vst.msk [vmem:[#allocation4 + $0xc7] sm:$0xff] %vm1179_vm11, %v3168_v60  ;;  %v4945_v60 = vpack.c.bf16 %v4188_v54, %v4187_v53 }
 0x5ba   : > { %3379 = vrot.lane.b32.xlu1 %v7530_v30, %s5103_s14  ;;  %s8304_s14 = scalar_lea.hbm %s8351_s5, %s4742_s26 }
 0x5bb   : > { %v3170_v40 = vpop.permute.xlu0 %3169  ;;  %4946 = vmatprep.subr.bf16.mxu1 %v4945_v60 }
 0x5bc   : > { %3275 = vst.msk [vmem:[#allocation4 + $0xcf] sm:$0x1] %vm8407_vm0, %v3170_v40  ;;  %v3172_v28 = vpop.permute.xlu1 %3171  ;;  %4948 = vmatpush3.bf16.msra.mxu1 %v4945_v60 }
 0x5bd   : > { %3479 = vrot.lane.b32.xlu0 %v6883_v35, %s5104_s15  ;;  %3276 = vst.msk [vmem:[#allocation4 + $0xcf] sm:$0xfe] %vm1177_vm10, %v3172_v28 }
 0x5be   : > { %3481 = vrot.lane.b32.xlu1 %v6885_v16, %s5104_s15 }
 0x5bf   : > { %v3174_v38 = vpop.permute.xlu0 %3173 }
 0x5c0   : > { %3277 = vst.msk [vmem:[#allocation4 + $0xd7] sm:$0xff] %vm1179_vm11, %v3174_v38  ;;  %v3176_v44 = vpop.permute.xlu1 %3175 }
 0x5c1   : > { %3483 = vrot.lane.b32.xlu0 %v6903_v45, %s5104_s15  ;;  %3278 = vst.msk [vmem:[#allocation4 + $0xdf] sm:$0x1] %vm8419_vm3, %v3176_v44  ;;  %v4189_v44 = vld [vmem:[%s8349_s3 + $0x20] sm:$0xff]  ;;  %vm8433_vm3 = vmmov %vm8430_vm1 }
 0x5c2   : > { %3485 = vrot.lane.b32.xlu1 %v6905_v46, %s5104_s15  ;;  %4883 = vmatprep.subr.mxu1 %v4189_v44 }
 0x5c3   : > { %v3178_v30 = vpop.permute.xlu0 %3177  ;;  %4884 = vmatpush3.msra.mxu1 %v4189_v44 }
 0x5c4   : > { %3279 = vst.msk [vmem:[#allocation4 + $0xdf] sm:$0xfe] %vm1177_vm10, %v3178_v30  ;;  %v3180_v20 = vpop.permute.xlu1 %3179 }
 0x5c5   : > { %3487 = vrot.lane.b32.xlu0 %v6923_v0, %s5104_s15  ;;  %3280 = vst.msk [vmem:[#allocation4 + $0xe7] sm:$0xff] %vm1179_vm11, %v3180_v20 }
 0x5c6   : > { %3489 = vrot.lane.b32.xlu1 %v6925_v56, %s5104_s15 }
 0x5c7   : > { %v3182_v32 = vpop.permute.xlu0 %3181 }
 0x5c8   : > { %3281 = vst.msk [vmem:[#allocation4 + $0xef] sm:$0x1] %vm8420_vm4, %v3182_v32  ;;  %v3184_v63 = vpop.permute.xlu1 %3183  ;;  %vm8434_vm4 = vmmov %vm8422_vm5 }
 0x5c9   : > { %3491 = vrot.lane.b32.xlu0 %v6943_v52, %s5104_s15  ;;  %3282 = vst.msk [vmem:[#allocation4 + $0xef] sm:$0xfe] %vm1177_vm10, %v3184_v63  ;;  %vm8421_vm10 = vmmov %vm8407_vm0 }
 0x5ca   : > { %3608 = vrot.lane.b32.xlu1 %v6883_v35, %s5105_s16 }
 0x5cb   : > { %v3186_v29 = vpop.permute.xlu0 %3185 }
 0x5cc   : > { %3283 = vst.msk [vmem:[#allocation4 + $0xf7] sm:$0xff] %vm1179_vm11, %v3186_v29  ;;  %v3188_v40 = vpop.permute.xlu1 %3187  ;;  %vm8423_vm11 = vcmask 195744  }
 0x5cd   : > { %3610 = vrot.lane.b32.xlu0 %v6885_v16, %s5105_s16  ;;  %3284 = vst.msk [vmem:[#allocation4 + $0xff] sm:$0x1] %vm8421_vm10, %v3188_v40  ;;  %vm8426_vm8 = vmmov %vm8423_vm11 }
 0x5ce   : > { %3612 = vrot.lane.b32.xlu1 %v7549_v57, %s5105_s16  ;;  %vm8429_vm13 = vmmov %vm8426_vm8 }
 0x5cf   : > { %v3286_v28 = vpop.permute.xlu0 %3285  ;;  %vm8432_vm0 = vmmov %vm8426_vm8 }
 0x5d0   : > { %3429 = vst.msk [vmem:[#allocation4 - $0x2] sm:$0xfc] %vm8422_vm5, %v3286_v28  ;;  %v3288_v38 = vpop.permute.xlu1 %3287  ;;  %vm8435_vm10 = vmmov %vm8432_vm0 }
 0x5d1   : > { %3800 = vrot.lane.b32.xlu0 %v6883_v35, %s5106_s23  ;;  %3430 = vst.msk [vmem:[#allocation4 + $0x6] sm:$0xff] %vm8423_vm11, %v3288_v38  ;;  %vm8436_vm5 = vmmov %vm8430_vm1 }
 0x5d2   : > { %3802 = vrot.lane.b32.xlu1 %v6885_v16, %s5106_s23  ;;  %vm8437_vm11 = vmmov %vm8434_vm4 }
 0x5d3   : > { %v3290_v30 = vpop.permute.xlu0 %3289 }
 0x5d4   : > { %3431 = vst.msk [vmem:[#allocation4 + $0xe] sm:$0x3] %vm8424_vm6, %v3290_v30  ;;  %v3292_v20 = vpop.permute.xlu1 %3291  ;;  %vm8438_vm6 = vmmov %vm8432_vm0 }
 0x5d5   : > { %3804 = vrot.lane.b32.xlu0 %v7549_v57, %s5106_s23  ;;  %3432 = vst.msk [vmem:[#allocation4 + $0xe] sm:$0xfc] %vm8425_vm7, %v3292_v20  ;;  %vm8439_vm7 = vmmov %vm8430_vm1 }
 0x5d6   : > { %4024 = vrot.lane.b32.xlu1 %v5365_v1, %s5107_s17 }
 0x5d7   : > { %v3294_v35 = vpop.permute.xlu0 %3293 }
 0x5d8   : > { %3433 = vst.msk [vmem:[#allocation4 + $0x16] sm:$0xff] %vm8426_vm8, %v3294_v35  ;;  %v3296_v32 = vpop.permute.xlu1 %3295  ;;  %vm8440_vm8 = vmmov %vm8434_vm4 }
 0x5d9   : > { %4026 = vrot.lane.b32.xlu0 %v5368_v2, %s5107_s17  ;;  %3434 = vst.msk [vmem:[#allocation4 + $0x1e] sm:$0x3] %vm8427_vm9, %v3296_v32  ;;  %vm8441_vm9 = vmmov %vm8432_vm0 }
 0x5da   : > { %3614 = vrot.lane.b32.xlu1 %v6903_v45, %s5105_s16 }
 0x5db   : > { %v3298_v16 = vpop.permute.xlu0 %3297 }
 0x5dc   : > { %3435 = vst.msk [vmem:[#allocation4 + $0x1e] sm:$0xfc] %vm8428_vm12, %v3298_v16  ;;  %v3300_v57 = vpop.permute.xlu1 %3299  ;;  %vm8442_vm12 = vmmov %vm8430_vm1 }
 0x5dd   : > { %3616 = vrot.lane.b32.xlu0 %v6905_v46, %s5105_s16  ;;  %3436 = vst.msk [vmem:[#allocation4 + $0x26] sm:$0xff] %vm8429_vm13, %v3300_v57  ;;  %vm8443_vm13 = vmmov %vm8434_vm4 }
 0x5de   : > { %3618 = vrot.lane.b32.xlu1 %v7560_v62, %s5105_s16 }
 0x5df   : > { %v3302_v1 = vpop.permute.xlu0 %3301 }
 0x5e0   : > { %3437 = vst.msk [vmem:[#allocation4 + $0x2e] sm:$0x3] %vm8430_vm1, %v3302_v1  ;;  %v3304_v2 = vpop.permute.xlu1 %3303  ;;  %vm8444_vm1 = vmmov %vm8432_vm0 }
 0x5e1   : > { %3806 = vrot.lane.b32.xlu0 %v6903_v45, %s5106_s23  ;;  %3438 = vst.msk [vmem:[#allocation4 + $0x2e] sm:$0xfc] %vm8431_vm15, %v3304_v2  ;;  %vm8445_vm15 = vmmov %vm8433_vm3 }
 0x5e2   : > { %3808 = vrot.lane.b32.xlu1 %v6905_v46, %s5106_s23 }
 0x5e3   : > { %v3306_v27 = vpop.permute.xlu0 %3305 }
 0x5e4   : > { %3439 = vst.msk [vmem:[#allocation4 + $0x36] sm:$0xff] %vm8432_vm0, %v3306_v27  ;;  %v3308_v18 = vpop.permute.xlu1 %3307  ;;  %vm8446_vm0 = vmmov %vm8434_vm4  ;;  %v8471_v27 = vld [vmem:[#allocation8_spill] sm:$0xff] }
 0x5e5   : > { %3810 = vrot.lane.b32.xlu0 %v7560_v62, %s5106_s23  ;;  %3440 = vst.msk [vmem:[#allocation4 + $0x3e] sm:$0x3] %vm8433_vm3, %v3308_v18  ;;  %vm8447_vm3 = vmmov %vm8444_vm1 }
 0x5e6   : > { %4028 = vrot.lane.b32.xlu1 %v5371_v3, %s5107_s17 }
 0x5e7   : > { %v3310_v7 = vpop.permute.xlu0 %3309 }
 0x5e8   : > { %3441 = vst.msk [vmem:[#allocation4 + $0x3e] sm:$0xfc] %vm8434_vm4, %v3310_v7  ;;  %v3312_v45 = vpop.permute.xlu1 %3311  ;;  %vm8448_vm4 = vmmov %vm8436_vm5 }
 0x5e9   : > { %4030 = vrot.lane.b32.xlu0 %v5380_v4, %s5107_s17  ;;  %3442 = vst.msk [vmem:[#allocation4 + $0x46] sm:$0xff] %vm8435_vm10, %v3312_v45  ;;  %vm8449_vm10 = vmmov %vm8446_vm0 }
 0x5ea   : > { %3620 = vrot.lane.b32.xlu1 %v6923_v0, %s5105_s16 }
 0x5eb   : > { %v3314_v46 = vpop.permute.xlu0 %3313 }
 0x5ec   : > { %3443 = vst.msk [vmem:[#allocation4 + $0x4e] sm:$0x3] %vm8436_vm5, %v3314_v46  ;;  %v3316_v62 = vpop.permute.xlu1 %3315  ;;  %vm8450_vm5 = vmmov %vm8444_vm1 }
 0x5ed   : > { %3622 = vrot.lane.b32.xlu0 %v6925_v56, %s5105_s16  ;;  %3444 = vst.msk [vmem:[#allocation4 + $0x4e] sm:$0xfc] %vm8437_vm11, %v3316_v62  ;;  %vm8451_vm11 = vmmov %vm8448_vm4 }
 0x5ee   : > { %3624 = vrot.lane.b32.xlu1 %v7571_v25, %s5105_s16 }
 0x5ef   : > { %v3318_v3 = vpop.permute.xlu0 %3317 }
 0x5f0   : > { %3445 = vst.msk [vmem:[#allocation4 + $0x56] sm:$0xff] %vm8438_vm6, %v3318_v3  ;;  %v3320_v4 = vpop.permute.xlu1 %3319  ;;  %vm8452_vm6 = vmmov %vm8446_vm0 }
 0x5f1   : > { %3812 = vrot.lane.b32.xlu0 %v6923_v0, %s5106_s23  ;;  %3446 = vst.msk [vmem:[#allocation4 + $0x5e] sm:$0x3] %vm8439_vm7, %v3320_v4  ;;  %vm8453_vm7 = vmmov %vm8444_vm1 }
 0x5f2   : > { %3814 = vrot.lane.b32.xlu1 %v6925_v56, %s5106_s23 }
 0x5f3   : > { %v3322_v63 = vpop.permute.xlu0 %3321 }
 0x5f4   : > { %3447 = vst.msk [vmem:[#allocation4 + $0x5e] sm:$0xfc] %vm8440_vm8, %v3322_v63  ;;  %v3324_v29 = vpop.permute.xlu1 %3323  ;;  %vm8454_vm8 = vmmov %vm8448_vm4 }
 0x5f5   : > { %3816 = vrot.lane.b32.xlu0 %v7571_v25, %s5106_s23  ;;  %3448 = vst.msk [vmem:[#allocation4 + $0x66] sm:$0xff] %vm8441_vm9, %v3324_v29  ;;  %vm8455_vm9 = vmmov %vm8446_vm0  ;;  %v8481_v29 = vld [vmem:[#allocation10_spill] sm:$0xff] }
 0x5f6   : > { %4032 = vrot.lane.b32.xlu1 %v5383_v5, %s5107_s17 }
 0x5f7   : > { %v3326_v53 = vpop.permute.xlu0 %3325 }
 0x5f8   : > { %3449 = vst.msk [vmem:[#allocation4 + $0x6e] sm:$0x3] %vm8442_vm12, %v3326_v53  ;;  %v3328_v0 = vpop.permute.xlu1 %3327  ;;  %vm8456_vm12 = vmmov %vm8444_vm1 }
 0x5f9   : > { %3493 = vrot.lane.b32.xlu0 %v6945_v14, %s5104_s15  ;;  %3450 = vst.msk [vmem:[#allocation4 + $0x6e] sm:$0xfc] %vm8443_vm13, %v3328_v0  ;;  %vm8457_vm13 = vmmov %vm8448_vm4 }
 0x5fa   : > { %4034 = vrot.lane.b32.xlu1 %v5386_v6, %s5107_s17 }
 0x5fb   : > { %v3330_v56 = vpop.permute.xlu0 %3329 }
 0x5fc   : > { %3451 = vst.msk [vmem:[#allocation4 + $0x76] sm:$0xff] %vm8444_vm1, %v3330_v56  ;;  %v3332_v25 = vpop.permute.xlu1 %3331  ;;  %vm8458_vm1 = vmmov %vm8446_vm0 }
 0x5fd   : > { %3626 = vrot.lane.b32.xlu0 %v6943_v52, %s5105_s16  ;;  %3452 = vst.msk [vmem:[#allocation4 + $0x7e] sm:$0x3] %vm8445_vm15, %v3332_v25  ;;  %vm8459_vm15 = vmmov %vm8447_vm3 }
 0x5fe   : > { %3628 = vrot.lane.b32.xlu1 %v6945_v14, %s5105_s16 }
 0x5ff   : > { %v3334_v5 = vpop.permute.xlu0 %3333 }
 0x600   : > { %3453 = vst.msk [vmem:[#allocation4 + $0x7e] sm:$0xfc] %vm8446_vm0, %v3334_v5  ;;  %v3336_v54 = vpop.permute.xlu1 %3335  ;;  %vm8460_vm0 = vmmov %vm8448_vm4 }
 0x601   : > { %3630 = vrot.lane.b32.xlu0 %v7582_v37, %s5105_s16  ;;  %3454 = vst.msk [vmem:[#allocation4 + $0x86] sm:$0xff] %vm8447_vm3, %v3336_v54  ;;  %vm8461_vm3 = vmmov %vm8458_vm1 }
 0x602   : > { %3818 = vrot.lane.b32.xlu1 %v6943_v52, %s5106_s23 }
 0x603   : > { %v3338_v6 = vpop.permute.xlu0 %3337 }
 0x604   : > { %3455 = vst.msk [vmem:[#allocation4 + $0x8e] sm:$0x3] %vm8448_vm4, %v3338_v6  ;;  %v3340_v60 = vpop.permute.xlu1 %3339  ;;  %vm8462_vm4 = vmmov %vm8450_vm5 }
 0x605   : > { %3820 = vrot.lane.b32.xlu0 %v6945_v14, %s5106_s23  ;;  %3456 = vst.msk [vmem:[#allocation4 + $0x8e] sm:$0xfc] %vm8449_vm10, %v3340_v60  ;;  %vm8463_vm10 = vmmov %vm8460_vm0 }
 0x606   : > { %3822 = vrot.lane.b32.xlu1 %v7582_v37, %s5106_s23 }
 0x607   : > { %v3342_v40 = vpop.permute.xlu0 %3341 }
 0x608   : > { %3457 = vst.msk [vmem:[#allocation4 + $0x96] sm:$0xff] %vm8450_vm5, %v3342_v40  ;;  %v3344_v28 = vpop.permute.xlu1 %3343  ;;  %vm8464_vm5 = vmmov %vm8458_vm1 }
 0x609   : > { %4036 = vrot.lane.b32.xlu0 %v5397_v8, %s5107_s17  ;;  %3458 = vst.msk [vmem:[#allocation4 + $0x9e] sm:$0x3] %vm8451_vm11, %v3344_v28  ;;  %vm8465_vm11 = vmmov %vm8462_vm4 }
 0x60a   : > { %3495 = vrot.lane.b32.xlu1 %v6963_v33, %s5104_s15 }
 0x60b   : > { %v3346_v52 = vpop.permute.xlu0 %3345 }
 0x60c   : > { %3459 = vst.msk [vmem:[#allocation4 + $0x9e] sm:$0xfc] %vm8452_vm6, %v3346_v52  ;;  %v3348_v14 = vpop.permute.xlu1 %3347  ;;  %vm8466_vm6 = vmmov %vm8460_vm0 }
 0x60d   : > { %3497 = vrot.lane.b32.xlu0 %v6965_v34, %s5104_s15  ;;  %3460 = vst.msk [vmem:[#allocation4 + $0xa6] sm:$0xff] %vm8453_vm7, %v3348_v14  ;;  %vm8467_vm7 = vmmov %vm8458_vm1 }
 0x60e   : > { %4038 = vrot.lane.b32.xlu1 %v5400_v9, %s5107_s17 }
 0x60f   : > { %v3350_v37 = vpop.permute.xlu0 %3349 }
 0x610   : > { %3461 = vst.msk [vmem:[#allocation4 + $0xae] sm:$0x3] %vm8454_vm8, %v3350_v37  ;;  %v3352_v8 = vpop.permute.xlu1 %3351  ;;  %vm8468_vm8 = vmmov %vm8462_vm4 }
 0x611   : > { %3632 = vrot.lane.b32.xlu0 %v6963_v33, %s5105_s16  ;;  %3462 = vst.msk [vmem:[#allocation4 + $0xae] sm:$0xfc] %vm8455_vm9, %v3352_v8  ;;  %vm8469_vm9 = vmmov %vm8460_vm0 }
 0x612   : > { %3634 = vrot.lane.b32.xlu1 %v6965_v34, %s5105_s16 }
 0x613   : > { %v3354_v38 = vpop.permute.xlu0 %3353 }
 0x614   : > { %3463 = vst.msk [vmem:[#allocation4 + $0xb6] sm:$0xff] %vm8456_vm12, %v3354_v38  ;;  %v3356_v44 = vpop.permute.xlu1 %3355  ;;  %vm8470_vm12 = vcmask 228544  }
 0x615   : > { %3636 = vrot.lane.b32.xlu0 %v7593_v43, %s5105_s16  ;;  %3464 = vst.msk [vmem:[#allocation4 + $0xbe] sm:$0x3] %vm8457_vm13, %v3356_v44  ;;  %vm8472_vm13 = vmmov %vm8470_vm12 }
 0x616   : > { %3824 = vrot.lane.b32.xlu1 %v6963_v33, %s5106_s23 }
 0x617   : > { %v3358_v9 = vpop.permute.xlu0 %3357 }
 0x618   : > { %3465 = vst.msk [vmem:[#allocation4 + $0xbe] sm:$0xfc] %vm8458_vm1, %v3358_v9  ;;  %v3360_v30 = vpop.permute.xlu1 %3359  ;;  %vm8473_vm1 = vmmov %vm8470_vm12 }
 0x619   : > { %3826 = vrot.lane.b32.xlu0 %v6965_v34, %s5106_s23  ;;  %3466 = vst.msk [vmem:[#allocation4 + $0xc6] sm:$0xff] %vm8459_vm15, %v3360_v30  ;;  %vm8474_vm15 = vmmov %vm8473_vm1 }
 0x61a   : > { %3828 = vrot.lane.b32.xlu1 %v7593_v43, %s5106_s23 }
 0x61b   : > { %v3362_v20 = vpop.permute.xlu0 %3361 }
 0x61c   : > { %3467 = vst.msk [vmem:[#allocation4 + $0xce] sm:$0x3] %vm8460_vm0, %v3362_v20  ;;  %v3364_v35 = vpop.permute.xlu1 %3363  ;;  %vm8476_vm0 = vmmov %vm8473_vm1 }
 0x61d   : > { %4040 = vrot.lane.b32.xlu0 %v5415_v12, %s5107_s17  ;;  %3468 = vst.msk [vmem:[#allocation4 + $0xce] sm:$0xfc] %vm8461_vm3, %v3364_v35  ;;  %vm8477_vm3 = vmmov %vm8476_vm0 }
 0x61e   : > { %3499 = vrot.lane.b32.xlu1 %v6983_v49, %s5104_s15 }
 0x61f   : > { %v3366_v33 = vpop.permute.xlu0 %3365 }
 0x620   : > { %3469 = vst.msk [vmem:[#allocation4 + $0xd6] sm:$0xff] %vm8462_vm4, %v3366_v33  ;;  %v3368_v34 = vpop.permute.xlu1 %3367  ;;  %vm8478_vm4 = vmmov %vm8476_vm0 }
 0x621   : > { %3501 = vrot.lane.b32.xlu0 %v6985_v47, %s5104_s15  ;;  %3470 = vst.msk [vmem:[#allocation4 + $0xde] sm:$0x3] %vm8463_vm10, %v3368_v34  ;;  %vm8479_vm10 = vcmask 261344   ;;  %v8496_v34 = vld [vmem:[#allocation14_spill] sm:$0xff] }
 0x622   : > { %4042 = vrot.lane.b32.xlu1 %v5424_v13, %s5107_s17 }
 0x623   : > { %v3370_v43 = vpop.permute.xlu0 %3369 }
 0x624   : > { %3471 = vst.msk [vmem:[#allocation4 + $0xde] sm:$0xfc] %vm8464_vm5, %v3370_v43  ;;  %v3372_v12 = vpop.permute.xlu1 %3371  ;;  %vm8480_vm5 = vcmask 294146   ;;  %v8498_v43 = vld [vmem:[#allocation15_spill] sm:$0xff] }
 0x625   : > { %3638 = vrot.lane.b32.xlu0 %v6983_v49, %s5105_s16  ;;  %3472 = vst.msk [vmem:[#allocation4 + $0xe6] sm:$0xff] %vm8465_vm11, %v3372_v12  ;;  %vm8482_vm11 = vcmask 294144  }
 0x626   : > { %3640 = vrot.lane.b32.xlu1 %v6985_v47, %s5105_s16 }
 0x627   : > { %v3374_v32 = vpop.permute.xlu0 %3373 }
 0x628   : > { %3473 = vst.msk [vmem:[#allocation4 + $0xee] sm:$0x3] %vm8466_vm6, %v3374_v32  ;;  %v3376_v16 = vpop.permute.xlu1 %3375  ;;  %vm4120_vm6 = vcmask 326944  }
 0x629   : > { %3642 = vrot.lane.b32.xlu0 %v7604_v10, %s5105_s16  ;;  %3474 = vst.msk [vmem:[#allocation4 + $0xee] sm:$0xfc] %vm8467_vm7, %v3376_v16  ;;  %vm8483_vm7 = vcmask 288000  }
 0x62a   : > { %3830 = vrot.lane.b32.xlu1 %v6983_v49, %s5106_s23 }
 0x62b   : > { %v3378_v13 = vpop.permute.xlu0 %3377 }
 0x62c   : > { %3475 = vst.msk [vmem:[#allocation4 + $0xf6] sm:$0xff] %vm8468_vm8, %v3378_v13  ;;  %v3380_v57 = vpop.permute.xlu1 %3379  ;;  %vm4197_vm8 = vcmask 326656  }
 0x62d   : > { %3832 = vrot.lane.b32.xlu0 %v6985_v47, %s5106_s23  ;;  %3476 = vst.msk [vmem:[#allocation4 + $0xfe] sm:$0x3] %vm8469_vm9, %v3380_v57  ;;  %vm8485_vm9 = vmmov %vm8479_vm10 }
 0x62e   : > { %3834 = vrot.lane.b32.xlu1 %v7604_v10, %s5106_s23  ;;  %v8475_v10 = vld [vmem:[#allocation9_spill] sm:$0xff] }
 0x62f   : > { %v3480_v1 = vpop.permute.xlu0 %3479 }
 0x630   : > { %3575 = vst.msk [vmem:[#allocation4] sm:$0xff] %vm8470_vm12, %v3480_v1  ;;  %v3482_v2 = vpop.permute.xlu1 %3481  ;;  %vm8486_vm12 = vmmov %vm8480_vm5 }
 0x631   : > { %4044 = vrot.lane.b32.xlu0 %v8471_v27, %s5107_s17  ;;  %3576 = vst.msk [vmem:[#allocation4 + $0x8] sm:$0xff] %vm8472_vm13, %v3482_v2  ;;  %vm8487_vm13 = vmmov %vm8482_vm11 }
 0x632   : > { %3503 = vrot.lane.b32.xlu1 %v7003_v22, %s5104_s15 }
 0x633   : > { %v3484_v49 = vpop.permute.xlu0 %3483 }
 0x634   : > { %3577 = vst.msk [vmem:[#allocation4 + $0x10] sm:$0xff] %vm8473_vm1, %v3484_v49  ;;  %v3486_v47 = vpop.permute.xlu1 %3485  ;;  %vm8488_vm1 = vmmov %vm8483_vm7 }
 0x635   : > { %3505 = vrot.lane.b32.xlu0 %v7005_v42, %s5104_s15  ;;  %3578 = vst.msk [vmem:[#allocation4 + $0x18] sm:$0xff] %vm8474_vm15, %v3486_v47  ;;  %vm8491_vm15 = vmmov %vm8485_vm9  ;;  %v8504_v47 = vld [vmem:[#allocation16_spill] sm:$0xff] }
 0x636   : > { %4046 = vrot.lane.b32.xlu1 %v8475_v10, %s5107_s17 }
 0x637   : > { %v3488_v18 = vpop.permute.xlu0 %3487 }
 0x638   : > { %3579 = vst.msk [vmem:[#allocation4 + $0x20] sm:$0xff] %vm8476_vm0, %v3488_v18  ;;  %v3490_v7 = vpop.permute.xlu1 %3489  ;;  %vm8492_vm0 = vmmov %vm8480_vm5 }
 0x639   : > { %3644 = vrot.lane.b32.xlu0 %v7003_v22, %s5105_s16  ;;  %3580 = vst.msk [vmem:[#allocation4 + $0x28] sm:$0xff] %vm8477_vm3, %v3490_v7  ;;  %vm8493_vm3 = vmmov %vm8482_vm11 }
 0x63a   : > { %3646 = vrot.lane.b32.xlu1 %v7005_v42, %s5105_s16 }
 0x63b   : > { %v3492_v45 = vpop.permute.xlu0 %3491 }
 0x63c   : > { %3581 = vst.msk [vmem:[#allocation4 + $0x30] sm:$0xff] %vm8478_vm4, %v3492_v45  ;;  %v3609_v46 = vpop.permute.xlu1 %3608  ;;  %vm8494_vm4 = vmmov %vm8488_vm1 }
 0x63d   : > { %3648 = vrot.lane.b32.xlu0 %v7615_v39, %s5105_s16  ;;  %3752 = vst.msk [vmem:[#allocation4 - $0x1] sm:$0xfe] %vm1699_vm2, %v3609_v46 }
 0x63e   : > { %3836 = vrot.lane.b32.xlu1 %v7003_v22, %s5106_s23 }
 0x63f   : > { %v3611_v62 = vpop.permute.xlu0 %3610 }
 0x640   : > { %3753 = vst.msk [vmem:[#allocation4 + $0x7] sm:$0xff] %vm8479_vm10, %v3611_v62  ;;  %v3613_v3 = vpop.permute.xlu1 %3612  ;;  %vm8495_vm10 = vcmask 228544  }
 0x641   : > { %3838 = vrot.lane.b32.xlu0 %v7005_v42, %s5106_s23  ;;  %3754 = vst.msk [vmem:[#allocation4 + $0xf] sm:$0x1] %vm1703_vm14, %v3613_v3 }
 0x642   : > { %3840 = vrot.lane.b32.xlu1 %v7615_v39, %s5106_s23  ;;  %v8484_v39 = vld [vmem:[#allocation11_spill] sm:$0xff] }
 0x643   : > { %v3801_v4 = vpop.permute.xlu0 %3800 }
 0x644   : > { %3944 = vst.msk [vmem:[#allocation4 - $0x2] sm:$0xfc] %vm8480_vm5, %v3801_v4  ;;  %v3803_v63 = vpop.permute.xlu1 %3802  ;;  %vm8497_vm5 = vmmov %vm8485_vm9 }
 0x645   : > { %4048 = vrot.lane.b32.xlu0 %v8481_v29, %s5107_s17  ;;  %3945 = vst.msk [vmem:[#allocation4 + $0x6] sm:$0xff] %vm8482_vm11, %v3803_v63  ;;  %vm8499_vm11 = vmmov %vm8492_vm0 }
 0x646   : > { %3507 = vrot.lane.b32.xlu1 %v7023_v31, %s5104_s15 }
 0x647   : > { %v3805_v22 = vpop.permute.xlu0 %3804 }
 0x648   : > { %3946 = vst.msk [vmem:[#allocation4 + $0xe] sm:$0x3] %vm8483_vm7, %v3805_v22  ;;  %v4025_v42 = vpop.permute.xlu1 %4024  ;;  %vm8500_vm7 = vmmov %vm8493_vm3  ;;  %v8512_v22 = vld [vmem:[#allocation18_spill] sm:$0xff] }
 0x649   : > { %3509 = vrot.lane.b32.xlu0 %v7025_v48, %s5104_s15  ;;  %4121 = vst.msk [vmem:[#allocation4] sm:$0xff] %vm4120_vm6, %v4025_v42 }
 0x64a   : > { %4050 = vrot.lane.b32.xlu1 %v8484_v39, %s5107_s17 }
 0x64b   : > { %v4027_v53 = vpop.permute.xlu0 %4026 }
 0x64c   : > { %4122 = vst.msk [vmem:[#allocation4 + $0x8] sm:$0xff] %vm4120_vm6, %v4027_v53  ;;  %v3615_v0 = vpop.permute.xlu1 %3614 }
 0x64d   : > { %3650 = vrot.lane.b32.xlu0 %v7023_v31, %s5105_s16  ;;  %3755 = vst.msk [vmem:[#allocation4 + $0xf] sm:$0xfe] %vm1699_vm2, %v3615_v0 }
 0x64e   : > { %3652 = vrot.lane.b32.xlu1 %v7025_v48, %s5105_s16 }
 0x64f   : > { %v3617_v56 = vpop.permute.xlu0 %3616 }
 0x650   : > { %3756 = vst.msk [vmem:[#allocation4 + $0x17] sm:$0xff] %vm8485_vm9, %v3617_v56  ;;  %v3619_v25 = vpop.permute.xlu1 %3618  ;;  %v4153_v5 = vld [vmem:[#allocation4] sm:$0xff]  ;;  %vm8501_vm9 = vmmov %vm8488_vm1 }
 0x651   : > { %3654 = vrot.lane.b32.xlu0 %v7626_v21, %s5105_s16  ;;  %3757 = vst.msk [vmem:[#allocation4 + $0x1f] sm:$0x1] %vm1703_vm14, %v3619_v25  ;;  %4885 = vmatprep.mubr.msk.f32.mxu1 %vm4197_vm8, %v4153_v5  ;;  %v5028_v5 = vld [vmem:[#allocation3 + $0x148] sm:$0x3] }
 0x652   : > { %3842 = vrot.lane.b32.xlu1 %v7023_v31, %s5106_s23  ;;  %v8489_v31 = vld [vmem:[#allocation12_spill] sm:$0xff] }
 0x653   : > { %v3807_v54 = vpop.permute.xlu0 %3806  ;;  %v4154_v6 = vld [vmem:[#allocation4 + $0x8] sm:$0xff] }
 0x654   : > { %3947 = vst.msk [vmem:[#allocation4 + $0xe] sm:$0xfc] %vm8486_vm12, %v3807_v54  ;;  %4886 = vmatmul.mubr.msk.f32.vlgmr.msra.gmra.mrb[0].mxu1 %vm4197_vm8, %v4154_v6  ;;  %v3809_v60 = vpop.permute.xlu1 %3808  ;;  %vm8502_vm12 = vmmov %vm8495_vm10 }
 0x655   : > { %3844 = vrot.lane.b32.xlu0 %v7025_v48, %s5106_s23  ;;  %3948 = vst.msk [vmem:[#allocation4 + $0x16] sm:$0xff] %vm8487_vm13, %v3809_v60  ;;  %vm8503_vm13 = vmmov %vm8495_vm10 }
 0x656   : > { %3846 = vrot.lane.b32.xlu1 %v7626_v21, %s5106_s23  ;;  %v8490_v21 = vld [vmem:[#allocation13_spill] sm:$0xff] }
 0x657   : > { %v3811_v40 = vpop.permute.xlu0 %3810 }
 0x658   : > { %3949 = vst.msk [vmem:[#allocation4 + $0x1e] sm:$0x3] %vm8488_vm1, %v3811_v40  ;;  %v4029_v28 = vpop.permute.xlu1 %4028  ;;  %vm8505_vm1 = vmmov %vm8497_vm5 }
 0x659   : > { %4052 = vrot.lane.b32.xlu0 %v8489_v31, %s5107_s17  ;;  %4123 = vst.msk [vmem:[#allocation4 + $0x10] sm:$0xff] %vm4120_vm6, %v4029_v28  ;;  %v8519_v28 = vld [vmem:[#allocation20_spill] sm:$0xff] }
 0x65a   : > { %3511 = vrot.lane.b32.xlu1 %v7043_v26, %s5104_s15 }
 0x65b   : > { %v4031_v52 = vpop.permute.xlu0 %4030 }
 0x65c   : > { %4124 = vst.msk [vmem:[#allocation4 + $0x18] sm:$0xff] %vm4120_vm6, %v4031_v52  ;;  %v3621_v48 = vpop.permute.xlu1 %3620  ;;  %v8520_v52 = vld [vmem:[#allocation21_spill] sm:$0xff] }
 0x65d   : > { %3513 = vrot.lane.b32.xlu0 %v7045_v59, %s5104_s15  ;;  %3758 = vst.msk [vmem:[#allocation4 + $0x1f] sm:$0xfe] %vm1699_vm2, %v3621_v48 }
 0x65e   : > { %4054 = vrot.lane.b32.xlu1 %v8490_v21, %s5107_s17 }
 0x65f   : > { %v3623_v14 = vpop.permute.xlu0 %3622 }
 0x660   : > { %3759 = vst.msk [vmem:[#allocation4 + $0x27] sm:$0xff] %vm8491_vm15, %v3623_v14  ;;  %v3625_v37 = vpop.permute.xlu1 %3624  ;;  %v4155_v8 = vld [vmem:[#allocation4 + $0x10] sm:$0xff]  ;;  %vm8507_vm15 = vmmov %vm8492_vm0 }
 0x661   : > { %3656 = vrot.lane.b32.xlu0 %v7043_v26, %s5105_s16  ;;  %3760 = vst.msk [vmem:[#allocation4 + $0x2f] sm:$0x1] %vm1703_vm14, %v3625_v37  ;;  %4888 = vmatprep.mubr.msk.f32.mxu1 %vm4197_vm8, %v4155_v8 }
 0x662   : > { %3658 = vrot.lane.b32.xlu1 %v7045_v59, %s5105_s16 }
 0x663   : > { %v3813_v38 = vpop.permute.xlu0 %3812  ;;  %v4156_v44 = vld [vmem:[#allocation4 + $0x18] sm:$0xff] }
 0x664   : > { %3950 = vst.msk [vmem:[#allocation4 + $0x1e] sm:$0xfc] %vm8492_vm0, %v3813_v38  ;;  %4889 = vmatmul.mubr.msk.f32.gmra.mrb[2].mxu1 %vm4197_vm8, %v4156_v44  ;;  %v3815_v9 = vpop.permute.xlu1 %3814  ;;  %vm8508_vm0 = vmmov %vm8493_vm3  ;;  %v5029_v38 = vld [vmem:[#allocation3 + $0x160] sm:$0x3] }
 0x665   : > { %3660 = vrot.lane.b32.xlu0 %v7637_v15, %s5105_s16  ;;  %3951 = vst.msk [vmem:[#allocation4 + $0x26] sm:$0xff] %vm8493_vm3, %v3815_v9  ;;  %vm8509_vm3 = vmmov %vm8494_vm4 }
 0x666   : > { %3848 = vrot.lane.b32.xlu1 %v7043_v26, %s5106_s23 }
 0x667   : > { %v3817_v30 = vpop.permute.xlu0 %3816 }
 0x668   : > { %3952 = vst.msk [vmem:[#allocation4 + $0x2e] sm:$0x3] %vm8494_vm4, %v3817_v30  ;;  %v4033_v20 = vpop.permute.xlu1 %4032  ;;  %vm8510_vm4 = vmmov %vm8495_vm10 }
 0x669   : > { %3850 = vrot.lane.b32.xlu0 %v7045_v59, %s5106_s23  ;;  %4125 = vst.msk [vmem:[#allocation4 + $0x20] sm:$0xff] %vm4120_vm6, %v4033_v20 }
 0x66a   : > { %3852 = vrot.lane.b32.xlu1 %v7637_v15, %s5106_s23 }
 0x66b   : > { %v3494_v35 = vpop.permute.xlu0 %3493 }
 0x66c   : > { %3582 = vst.msk [vmem:[#allocation4 + $0x38] sm:$0xff] %vm8495_vm10, %v3494_v35  ;;  %v4035_v33 = vpop.permute.xlu1 %4034  ;;  %vm8511_vm10 = vmmov %vm8510_vm4  ;;  %v8523_v35 = vld [vmem:[#allocation22_spill] sm:$0xff] }
 0x66d   : > { %4056 = vrot.lane.b32.xlu0 %v8496_v34, %s5107_s17  ;;  %4126 = vst.msk [vmem:[#allocation4 + $0x28] sm:$0xff] %vm4120_vm6, %v4035_v33  ;;  %v8525_v34 = vld [vmem:[#allocation23_spill] sm:$0xff] }
 0x66e   : > { %3515 = vrot.lane.b32.xlu1 %v7063_v11, %s5104_s15 }
 0x66f   : > { %v3627_v26 = vpop.permute.xlu0 %3626 }
 0x670   : > { %3761 = vst.msk [vmem:[#allocation4 + $0x2f] sm:$0xfe] %vm1699_vm2, %v3627_v26  ;;  %v3629_v59 = vpop.permute.xlu1 %3628  ;;  %v4157_v15 = vld [vmem:[#allocation4 + $0x20] sm:$0xff] }
 0x671   : > { %3517 = vrot.lane.b32.xlu0 %v7065_v23, %s5104_s15  ;;  %3762 = vst.msk [vmem:[#allocation4 + $0x37] sm:$0xff] %vm8497_vm5, %v3629_v59  ;;  %4891 = vmatprep.mubr.msk.f32.mxu1 %vm4197_vm8, %v4157_v15  ;;  %vm8513_vm5 = vmmov %vm8505_vm1 }
 0x672   : > { %4058 = vrot.lane.b32.xlu1 %v8498_v43, %s5107_s17 }
 0x673   : > { %v3631_v12 = vpop.permute.xlu0 %3630 }
 0x674   : > { %3763 = vst.msk [vmem:[#allocation4 + $0x3f] sm:$0x1] %vm1703_vm14, %v3631_v12  ;;  %v3819_v32 = vpop.permute.xlu1 %3818  ;;  %v4158_v16 = vld [vmem:[#allocation4 + $0x28] sm:$0xff] }
 0x675   : > { %3662 = vrot.lane.b32.xlu0 %v7063_v11, %s5105_s16  ;;  %3953 = vst.msk [vmem:[#allocation4 + $0x2e] sm:$0xfc] %vm8499_vm11, %v3819_v32  ;;  %4892 = vmatmul.mubr.msk.f32.gmra.mrb[4].mxu1 %vm4197_vm8, %v4158_v16  ;;  %v5030_v32 = vld [vmem:[#allocation3 + $0x178] sm:$0x3] }
 0x676   : > { %3664 = vrot.lane.b32.xlu1 %v7065_v23, %s5105_s16 }
 0x677   : > { %v3821_v13 = vpop.permute.xlu0 %3820 }
 0x678   : > { %3954 = vst.msk [vmem:[#allocation4 + $0x36] sm:$0xff] %vm8500_vm7, %v3821_v13  ;;  %v3823_v57 = vpop.permute.xlu1 %3822  ;;  %vm8515_vm7 = vmmov %vm8508_vm0 }
 0x679   : > { %3666 = vrot.lane.b32.xlu0 %v7648_v41, %s5105_s16  ;;  %3955 = vst.msk [vmem:[#allocation4 + $0x3e] sm:$0x3] %vm8501_vm9, %v3823_v57  ;;  %vm8516_vm9 = vmmov %vm8509_vm3 }
 0x67a   : > { %3854 = vrot.lane.b32.xlu1 %v7063_v11, %s5106_s23 }
 0x67b   : > { %v4037_v1 = vpop.permute.xlu0 %4036 }
 0x67c   : > { %4127 = vst.msk [vmem:[#allocation4 + $0x30] sm:$0xff] %vm4120_vm6, %v4037_v1  ;;  %v3496_v2 = vpop.permute.xlu1 %3495 }
 0x67d   : > { %3856 = vrot.lane.b32.xlu0 %v7065_v23, %s5106_s23  ;;  %3583 = vst.msk [vmem:[#allocation4 + $0x40] sm:$0xff] %vm8502_vm12, %v3496_v2  ;;  %vm8517_vm12 = vmmov %vm8510_vm4  ;;  %v8530_v2 = vld [vmem:[#allocation24_spill] sm:$0xff] }
 0x67e   : > { %3858 = vrot.lane.b32.xlu1 %v7648_v41, %s5106_s23  ;;  %v8506_v41 = vld [vmem:[#allocation17_spill] sm:$0xff] }
 0x67f   : > { %v3498_v27 = vpop.permute.xlu0 %3497 }
 0x680   : > { %3584 = vst.msk [vmem:[#allocation4 + $0x48] sm:$0xff] %vm8503_vm13, %v3498_v27  ;;  %v4039_v49 = vpop.permute.xlu1 %4038  ;;  %vm8518_vm13 = vmmov %vm8510_vm4 }
 0x681   : > { %4060 = vrot.lane.b32.xlu0 %v8504_v47, %s5107_s17  ;;  %4128 = vst.msk [vmem:[#allocation4 + $0x38] sm:$0xff] %vm4120_vm6, %v4039_v49  ;;  %v5032_v47 = vld [vmem:[#allocation3 + $0x188] sm:$0xff] }
 0x682   : > { %3519 = vrot.lane.b32.xlu1 %v7083_v58, %s5104_s15 }
 0x683   : > { %v3633_v11 = vpop.permute.xlu0 %3632  ;;  %v4159_v10 = vld [vmem:[#allocation4 + $0x30] sm:$0xff] }
 0x684   : > { %3764 = vst.msk [vmem:[#allocation4 + $0x3f] sm:$0xfe] %vm1699_vm2, %v3633_v11  ;;  %4894 = vmatprep.mubr.msk.f32.mxu1 %vm4197_vm8, %v4159_v10  ;;  %v3635_v23 = vpop.permute.xlu1 %3634  ;;  %v8531_v11 = vld [vmem:[#allocation25_spill] sm:$0xff] }
 0x685   : > { %3521 = vrot.lane.b32.xlu0 %v7085_v61, %s5104_s15  ;;  %3765 = vst.msk [vmem:[#allocation4 + $0x47] sm:$0xff] %vm8505_vm1, %v3635_v23 }
 0x686   : > { %4062 = vrot.lane.b32.xlu1 %v8506_v41, %s5107_s17 }
 0x687   : > { %v3637_v18 = vpop.permute.xlu0 %3636 }
 0x688   : > { %3766 = vst.msk [vmem:[#allocation4 + $0x4f] sm:$0x1] %vm1703_vm14, %v3637_v18  ;;  %v3825_v7 = vpop.permute.xlu1 %3824  ;;  %v4160_v45 = vld [vmem:[#allocation4 + $0x38] sm:$0xff] }
 0x689   : > { %3668 = vrot.lane.b32.xlu0 %v7083_v58, %s5105_s16  ;;  %3956 = vst.msk [vmem:[#allocation4 + $0x3e] sm:$0xfc] %vm8507_vm15, %v3825_v7  ;;  %4895 = vmatmul.mubr.msk.f32.gmra.mrb[6].mxu1 %vm4197_vm8, %v4160_v45  ;;  %vm8521_vm15 = vmmov %vm8499_vm11  ;;  %v5033_v45 = vld [vmem:[#allocation3 + $0x190] sm:$0x3] }
 0x68a   : > { %3670 = vrot.lane.b32.xlu1 %v7085_v61, %s5105_s16 }
 0x68b   : > { %v3827_v46 = vpop.permute.xlu0 %3826 }
 0x68c   : > { %3957 = vst.msk [vmem:[#allocation4 + $0x46] sm:$0xff] %vm8508_vm0, %v3827_v46  ;;  %v3829_v62 = vpop.permute.xlu1 %3828 }
 0x68d   : > { %3672 = vrot.lane.b32.xlu0 %v7659_v50, %s5105_s16  ;;  %3958 = vst.msk [vmem:[#allocation4 + $0x4e] sm:$0x3] %vm8509_vm3, %v3829_v62 }
 0x68e   : > { %3860 = vrot.lane.b32.xlu1 %v7083_v58, %s5106_s23 }
 0x68f   : > { %v4041_v3 = vpop.permute.xlu0 %4040 }
 0x690   : > { %4129 = vst.msk [vmem:[#allocation4 + $0x40] sm:$0xff] %vm4120_vm6, %v4041_v3  ;;  %v3500_v4 = vpop.permute.xlu1 %3499 }
 0x691   : > { %3862 = vrot.lane.b32.xlu0 %v7085_v61, %s5106_s23  ;;  %3585 = vst.msk [vmem:[#allocation4 + $0x50] sm:$0xff] %vm8510_vm4, %v3500_v4  ;;  %v2495_v4 = vld [vmem:[#allocation3 + $0x198] sm:$0xff] }
 0x692   : > { %3864 = vrot.lane.b32.xlu1 %v7659_v50, %s5106_s23  ;;  %v8514_v50 = vld [vmem:[#allocation19_spill] sm:$0xff] }
 0x693   : > { %v3502_v63 = vpop.permute.xlu0 %3501 }
 0x694   : > { %3586 = vst.msk [vmem:[#allocation4 + $0x58] sm:$0xff] %vm8511_vm10, %v3502_v63  ;;  %v4043_v29 = vpop.permute.xlu1 %4042  ;;  %vm8522_vm10 = vmmov %vm8510_vm4 }
 0x695   : > { %4064 = vrot.lane.b32.xlu0 %v8512_v22, %s5107_s17  ;;  %4130 = vst.msk [vmem:[#allocation4 + $0x48] sm:$0xff] %vm4120_vm6, %v4043_v29  ;;  %v8534_v29 = vld [vmem:[#allocation26_spill] sm:$0xff]  ;;  %v2496_v22 = vld [vmem:[#allocation3 + $0x1a0] sm:$0xff] }
 0x696   : > { %3523 = vrot.lane.b32.xlu1 %v7103_v24, %s5104_s15 }
 0x697   : > { %v3639_v58 = vpop.permute.xlu0 %3638  ;;  %v4161_v42 = vld [vmem:[#allocation4 + $0x40] sm:$0xff] }
 0x698   : > { %3767 = vst.msk [vmem:[#allocation4 + $0x4f] sm:$0xfe] %vm1699_vm2, %v3639_v58  ;;  %4897 = vmatprep.mubr.msk.f32.mxu1 %vm4197_vm8, %v4161_v42  ;;  %v3641_v61 = vpop.permute.xlu1 %3640 }
 0x699   : > { %3525 = vrot.lane.b32.xlu0 %v7105_v36, %s5104_s15  ;;  %3768 = vst.msk [vmem:[#allocation4 + $0x57] sm:$0xff] %vm8513_vm5, %v3641_v61  ;;  %vm8524_vm5 = vmmov %vm8505_vm1 }
 0x69a   : > { %4066 = vrot.lane.b32.xlu1 %v8514_v50, %s5107_s17  ;;  %v8536_v50 = vld [vmem:[#allocation27_spill] sm:$0xff] }
 0x69b   : > { %v3643_v39 = vpop.permute.xlu0 %3642 }
 0x69c   : > { %3769 = vst.msk [vmem:[#allocation4 + $0x5f] sm:$0x1] %vm1703_vm14, %v3643_v39  ;;  %v3831_v53 = vpop.permute.xlu1 %3830  ;;  %v4162_v0 = vld [vmem:[#allocation4 + $0x48] sm:$0xff] }
 0x69d   : > { %3674 = vrot.lane.b32.xlu0 %v7103_v24, %s5105_s16  ;;  %3959 = vst.msk [vmem:[#allocation4 + $0x4e] sm:$0xfc] %vm8499_vm11, %v3831_v53  ;;  %4898 = vmatmul.mubr.msk.f32.gmra.mrb[8].mxu1 %vm4197_vm8, %v4162_v0 }
 0x69e   : > { %3676 = vrot.lane.b32.xlu1 %v7105_v36, %s5105_s16 }
 0x69f   : > { %v3833_v56 = vpop.permute.xlu0 %3832 }
 0x6a0   : > { %3960 = vst.msk [vmem:[#allocation4 + $0x56] sm:$0xff] %vm8515_vm7, %v3833_v56  ;;  %v3835_v25 = vpop.permute.xlu1 %3834  ;;  %vm8526_vm7 = vmmov %vm8508_vm0  ;;  %v2497_v56 = vld [vmem:[#allocation3 + $0x1a8] sm:$0x3] }
 0x6a1   : > { %3678 = vrot.lane.b32.xlu0 %v5028_v5, %s5105_s16  ;;  %3961 = vst.msk [vmem:[#allocation4 + $0x5e] sm:$0x3] %vm8516_vm9, %v3835_v25  ;;  %vm8527_vm9 = vmmov %vm8509_vm3 }
 0x6a2   : > { %3866 = vrot.lane.b32.xlu1 %v7103_v24, %s5106_s23 }
 0x6a3   : > { %v4045_v54 = vpop.permute.xlu0 %4044 }
 0x6a4   : > { %4131 = vst.msk [vmem:[#allocation4 + $0x50] sm:$0xff] %vm4120_vm6, %v4045_v54  ;;  %v3504_v6 = vpop.permute.xlu1 %3503 }
 0x6a5   : > { %3868 = vrot.lane.b32.xlu0 %v7105_v36, %s5106_s23  ;;  %3587 = vst.msk [vmem:[#allocation4 + $0x60] sm:$0xff] %vm8517_vm12, %v3504_v6  ;;  %vm8528_vm12 = vmmov %vm8510_vm4 }
 0x6a6   : > { %3870 = vrot.lane.b32.xlu1 %v5028_v5, %s5106_s23 }
 0x6a7   : > { %v3506_v60 = vpop.permute.xlu0 %3505 }
 0x6a8   : > { %3588 = vst.msk [vmem:[#allocation4 + $0x68] sm:$0xff] %vm8518_vm13, %v3506_v60  ;;  %v4047_v40 = vpop.permute.xlu1 %4046  ;;  %vm8529_vm13 = vmmov %vm8510_vm4 }
 0x6a9   : > { %4068 = vrot.lane.b32.xlu0 %v8519_v28, %s5107_s17  ;;  %4132 = vst.msk [vmem:[#allocation4 + $0x58] sm:$0xff] %vm4120_vm6, %v4047_v40  ;;  %v8541_v28 = vld [vmem:[#allocation28_spill] sm:$0xff] }
 0x6aa   : > { %3527 = vrot.lane.b32.xlu1 %v7121_v17, %s5104_s15 }
 0x6ab   : > { %v3645_v24 = vpop.permute.xlu0 %3644  ;;  %v4163_v31 = vld [vmem:[#allocation4 + $0x50] sm:$0xff] }
 0x6ac   : > { %3770 = vst.msk [vmem:[#allocation4 + $0x5f] sm:$0xfe] %vm1699_vm2, %v3645_v24  ;;  %4900 = vmatprep.mubr.msk.f32.mxu1 %vm4197_vm8, %v4163_v31  ;;  %v3647_v36 = vpop.permute.xlu1 %3646  ;;  %v8542_v24 = vld [vmem:[#allocation29_spill] sm:$0xff] }
 0x6ad   : > { %3529 = vrot.lane.b32.xlu0 %v7123_v55, %s5104_s15  ;;  %3771 = vst.msk [vmem:[#allocation4 + $0x67] sm:$0xff] %vm8505_vm1, %v3647_v36 }
 0x6ae   : > { %4070 = vrot.lane.b32.xlu1 %v8520_v52, %s5107_s17 }
 0x6af   : > { %v3649_v48 = vpop.permute.xlu0 %3648 }
 0x6b0   : > { %3772 = vst.msk [vmem:[#allocation4 + $0x6f] sm:$0x1] %vm1703_vm14, %v3649_v48  ;;  %v3837_v21 = vpop.permute.xlu1 %3836  ;;  %v4164_v14 = vld [vmem:[#allocation4 + $0x58] sm:$0xff] }
 0x6b1   : > { %3680 = vrot.lane.b32.xlu0 %v7121_v17, %s5105_s16  ;;  %3962 = vst.msk [vmem:[#allocation4 + $0x5e] sm:$0xfc] %vm8521_vm15, %v3837_v21  ;;  %4901 = vmatmul.mubr.msk.f32.gmra.mrb[10].mxu1 %vm4197_vm8, %v4164_v14  ;;  %vm8532_vm15 = vmmov %vm8499_vm11 }
 0x6b2   : > { %3682 = vrot.lane.b32.xlu1 %v7123_v55, %s5105_s16 }
 0x6b3   : > { %v3839_v37 = vpop.permute.xlu0 %3838 }
 0x6b4   : > { %3963 = vst.msk [vmem:[#allocation4 + $0x66] sm:$0xff] %vm8508_vm0, %v3839_v37  ;;  %v3841_v8 = vpop.permute.xlu1 %3840 }
 0x6b5   : > { %3684 = vrot.lane.b32.xlu0 %v5029_v38, %s5105_s16  ;;  %3964 = vst.msk [vmem:[#allocation4 + $0x6e] sm:$0x3] %vm8509_vm3, %v3841_v8 }
 0x6b6   : > { %3872 = vrot.lane.b32.xlu1 %v7121_v17, %s5106_s23 }
 0x6b7   : > { %v4049_v44 = vpop.permute.xlu0 %4048 }
 0x6b8   : > { %4133 = vst.msk [vmem:[#allocation4 + $0x60] sm:$0xff] %vm4120_vm6, %v4049_v44  ;;  %v3508_v9 = vpop.permute.xlu1 %3507 }
 0x6b9   : > { %3874 = vrot.lane.b32.xlu0 %v7123_v55, %s5106_s23  ;;  %3589 = vst.msk [vmem:[#allocation4 + $0x70] sm:$0xff] %vm8510_vm4, %v3508_v9 }
 0x6ba   : > { %3876 = vrot.lane.b32.xlu1 %v5029_v38, %s5106_s23 }
 0x6bb   : > { %v3510_v30 = vpop.permute.xlu0 %3509 }
 0x6bc   : > { %3590 = vst.msk [vmem:[#allocation4 + $0x78] sm:$0xff] %vm8522_vm10, %v3510_v30  ;;  %v4051_v20 = vpop.permute.xlu1 %4050  ;;  %vm8533_vm10 = vmmov %vm8510_vm4 }
 0x6bd   : > { %4072 = vrot.lane.b32.xlu0 %v8523_v35, %s5107_s17  ;;  %4134 = vst.msk [vmem:[#allocation4 + $0x68] sm:$0xff] %vm4120_vm6, %v4051_v20 }
 0x6be   : > { %3531 = vrot.lane.b32.xlu1 %v7137_v19, %s5104_s15 }
 0x6bf   : > { %v3651_v17 = vpop.permute.xlu0 %3650  ;;  %v4165_v33 = vld [vmem:[#allocation4 + $0x60] sm:$0xff] }
 0x6c0   : > { %3773 = vst.msk [vmem:[#allocation4 + $0x6f] sm:$0xfe] %vm1699_vm2, %v3651_v17  ;;  %4903 = vmatprep.mubr.msk.f32.mxu1 %vm4197_vm8, %v4165_v33  ;;  %v3653_v55 = vpop.permute.xlu1 %3652 }
 0x6c1   : > { %3533 = vrot.lane.b32.xlu0 %v7139_v51, %s5104_s15  ;;  %3774 = vst.msk [vmem:[#allocation4 + $0x77] sm:$0xff] %vm8524_vm5, %v3653_v55  ;;  %vm8535_vm5 = vmmov %vm8505_vm1 }
 0x6c2   : > { %4074 = vrot.lane.b32.xlu1 %v8525_v34, %s5107_s17 }
 0x6c3   : > { %v3655_v26 = vpop.permute.xlu0 %3654 }
 0x6c4   : > { %3775 = vst.msk [vmem:[#allocation4 + $0x7f] sm:$0x1] %vm1703_vm14, %v3655_v26  ;;  %v3843_v59 = vpop.permute.xlu1 %3842  ;;  %v4166_v15 = vld [vmem:[#allocation4 + $0x68] sm:$0xff] }
 0x6c5   : > { %3686 = vrot.lane.b32.xlu0 %v7137_v19, %s5105_s16  ;;  %3965 = vst.msk [vmem:[#allocation4 + $0x6e] sm:$0xfc] %vm8499_vm11, %v3843_v59  ;;  %4904 = vmatmul.mubr.msk.f32.gmra.mrb[12].mxu1 %vm4197_vm8, %v4166_v15 }
 0x6c6   : > { %3688 = vrot.lane.b32.xlu1 %v7139_v51, %s5105_s16 }
 0x6c7   : > { %v3845_v43 = vpop.permute.xlu0 %3844 }
 0x6c8   : > { %3966 = vst.msk [vmem:[#allocation4 + $0x76] sm:$0xff] %vm8526_vm7, %v3845_v43  ;;  %v3847_v12 = vpop.permute.xlu1 %3846  ;;  %vm8537_vm7 = vmmov %vm8508_vm0 }
 0x6c9   : > { %3690 = vrot.lane.b32.xlu0 %v5030_v32, %s5105_s16  ;;  %3967 = vst.msk [vmem:[#allocation4 + $0x7e] sm:$0x3] %vm8527_vm9, %v3847_v12  ;;  %vm8538_vm9 = vmmov %vm8509_vm3 }
 0x6ca   : > { %3878 = vrot.lane.b32.xlu1 %v7137_v19, %s5106_s23  ;;  %v5031_v19 = vld [vmem:[#allocation3 + $0x180] sm:$0xff] }
 0x6cb   : > { %v4053_v16 = vpop.permute.xlu0 %4052 }
 0x6cc   : > { %4135 = vst.msk [vmem:[#allocation4 + $0x70] sm:$0xff] %vm4120_vm6, %v4053_v16  ;;  %v3512_v13 = vpop.permute.xlu1 %3511 }
 0x6cd   : > { %3880 = vrot.lane.b32.xlu0 %v7139_v51, %s5106_s23  ;;  %3591 = vst.msk [vmem:[#allocation4 + $0x80] sm:$0xff] %vm8528_vm12, %v3512_v13  ;;  %vm8539_vm12 = vmmov %vm8510_vm4 }
 0x6ce   : > { %3882 = vrot.lane.b32.xlu1 %v5030_v32, %s5106_s23 }
 0x6cf   : > { %v3514_v57 = vpop.permute.xlu0 %3513 }
 0x6d0   : > { %3592 = vst.msk [vmem:[#allocation4 + $0x88] sm:$0xff] %vm8529_vm13, %v3514_v57  ;;  %v4055_v1 = vpop.permute.xlu1 %4054  ;;  %vm8540_vm13 = vmmov %vm8510_vm4 }
 0x6d1   : > { %4076 = vrot.lane.b32.xlu0 %v8530_v2, %s5107_s17  ;;  %4136 = vst.msk [vmem:[#allocation4 + $0x78] sm:$0xff] %vm4120_vm6, %v4055_v1  ;;  %v8220_v1 = vld [vmem:[%s8350_s4] ss:$0 sm:$0xff] }
 0x6d2   : > { %3535 = vrot.lane.b32.xlu1 %v5031_v19, %s5104_s15 }
 0x6d3   : > { %v3657_v27 = vpop.permute.xlu0 %3656  ;;  %v4167_v49 = vld [vmem:[#allocation4 + $0x70] sm:$0xff] }
 0x6d4   : > { %3776 = vst.msk [vmem:[#allocation4 + $0x7f] sm:$0xfe] %vm1699_vm2, %v3657_v27  ;;  %4906 = vmatprep.mubr.msk.f32.mxu1 %vm4197_vm8, %v4167_v49  ;;  %v3659_v51 = vpop.permute.xlu1 %3658 }
 0x6d5   : > { %3537 = vrot.lane.b32.xlu0 %v5032_v47, %s5104_s15  ;;  %3777 = vst.msk [vmem:[#allocation4 + $0x87] sm:$0xff] %vm8505_vm1, %v3659_v51 }
 0x6d6   : > { %4078 = vrot.lane.b32.xlu1 %v8531_v11, %s5107_s17 }
 0x6d7   : > { %v3661_v10 = vpop.permute.xlu0 %3660 }
 0x6d8   : > { %3778 = vst.msk [vmem:[#allocation4 + $0x8f] sm:$0x1] %vm1703_vm14, %v3661_v10  ;;  %v3849_v23 = vpop.permute.xlu1 %3848  ;;  %v4168_v41 = vld [vmem:[#allocation4 + $0x78] sm:$0xff] }
 0x6d9   : > { %3692 = vrot.lane.b32.xlu0 %v5031_v19, %s5105_s16  ;;  %3968 = vst.msk [vmem:[#allocation4 + $0x7e] sm:$0xfc] %vm8532_vm15, %v3849_v23  ;;  %4907 = vmatmul.mubr.msk.f32.gmra.mrb[14].mxu1 %vm4197_vm8, %v4168_v41  ;;  %vm8543_vm15 = vmmov %vm8499_vm11 }
 0x6da   : > { %3694 = vrot.lane.b32.xlu1 %v5032_v47, %s5105_s16 }
 0x6db   : > { %v3851_v18 = vpop.permute.xlu0 %3850 }
 0x6dc   : > { %3969 = vst.msk [vmem:[#allocation4 + $0x86] sm:$0xff] %vm8508_vm0, %v3851_v18  ;;  %v3853_v7 = vpop.permute.xlu1 %3852 }
 0x6dd   : > { %3696 = vrot.lane.b32.xlu0 %v5033_v45, %s5105_s16  ;;  %3970 = vst.msk [vmem:[#allocation4 + $0x8e] sm:$0x3] %vm8509_vm3, %v3853_v7 }
 0x6de   : > { %3884 = vrot.lane.b32.xlu1 %v5031_v19, %s5106_s23 }
 0x6df   : > { %v4057_v46 = vpop.permute.xlu0 %4056 }
 0x6e0   : > { %4137 = vst.msk [vmem:[#allocation4 + $0x80] sm:$0xff] %vm4120_vm6, %v4057_v46  ;;  %v3516_v62 = vpop.permute.xlu1 %3515 }
 0x6e1   : > { %3886 = vrot.lane.b32.xlu0 %v5032_v47, %s5106_s23  ;;  %3593 = vst.msk [vmem:[#allocation4 + $0x90] sm:$0xff] %vm8510_vm4, %v3516_v62 }
 0x6e2   : > { %3888 = vrot.lane.b32.xlu1 %v5033_v45, %s5106_s23 }
 0x6e3   : > { %v3518_v3 = vpop.permute.xlu0 %3517 }
 0x6e4   : > { %3594 = vst.msk [vmem:[#allocation4 + $0x98] sm:$0xff] %vm8533_vm10, %v3518_v3  ;;  %v4059_v63 = vpop.permute.xlu1 %4058  ;;  %vm8544_vm10 = vmmov %vm8510_vm4 }
 0x6e5   : > { %4080 = vrot.lane.b32.xlu0 %v8534_v29, %s5107_s17  ;;  %4138 = vst.msk [vmem:[#allocation4 + $0x88] sm:$0xff] %vm4120_vm6, %v4059_v63 }
 0x6e6   : > { %3539 = vrot.lane.b32.xlu1 %v2495_v4, %s5104_s15 }
 0x6e7   : > { %v3663_v58 = vpop.permute.xlu0 %3662  ;;  %v4169_v42 = vld [vmem:[#allocation4 + $0x80] sm:$0xff] }
 0x6e8   : > { %3779 = vst.msk [vmem:[#allocation4 + $0x8f] sm:$0xfe] %vm1699_vm2, %v3663_v58  ;;  %4909 = vmatprep.mubr.msk.f32.mxu1 %vm4197_vm8, %v4169_v42  ;;  %v3665_v61 = vpop.permute.xlu1 %3664 }
 0x6e9   : > { %3541 = vrot.lane.b32.xlu0 %v2496_v22, %s5104_s15  ;;  %3780 = vst.msk [vmem:[#allocation4 + $0x97] sm:$0xff] %vm8535_vm5, %v3665_v61  ;;  %vm8545_vm5 = vmmov %vm8505_vm1 }
 0x6ea   : > { %4082 = vrot.lane.b32.xlu1 %v8536_v50, %s5107_s17 }
 0x6eb   : > { %v3667_v39 = vpop.permute.xlu0 %3666 }
 0x6ec   : > { %3781 = vst.msk [vmem:[#allocation4 + $0x9f] sm:$0x1] %vm1703_vm14, %v3667_v39  ;;  %v3855_v53 = vpop.permute.xlu1 %3854  ;;  %v4170_v0 = vld [vmem:[#allocation4 + $0x88] sm:$0xff] }
 0x6ed   : > { %3698 = vrot.lane.b32.xlu0 %v2495_v4, %s5105_s16  ;;  %3971 = vst.msk [vmem:[#allocation4 + $0x8e] sm:$0xfc] %vm8499_vm11, %v3855_v53  ;;  %4910 = vmatmul.mubr.msk.f32.gmra.mrb[16].mxu1 %vm4197_vm8, %v4170_v0 }
 0x6ee   : > { %3700 = vrot.lane.b32.xlu1 %v2496_v22, %s5105_s16 }
 0x6ef   : > { %v3857_v25 = vpop.permute.xlu0 %3856 }
 0x6f0   : > { %3972 = vst.msk [vmem:[#allocation4 + $0x96] sm:$0xff] %vm8537_vm7, %v3857_v25  ;;  %v3859_v5 = vpop.permute.xlu1 %3858  ;;  %vm8546_vm7 = vmmov %vm8508_vm0 }
 0x6f1   : > { %3702 = vrot.lane.b32.xlu0 %v2497_v56, %s5105_s16  ;;  %3973 = vst.msk [vmem:[#allocation4 + $0x9e] sm:$0x3] %vm8538_vm9, %v3859_v5  ;;  %vm8547_vm9 = vmmov %vm8509_vm3 }
 0x6f2   : > { %3890 = vrot.lane.b32.xlu1 %v2495_v4, %s5106_s23 }
 0x6f3   : > { %v4061_v54 = vpop.permute.xlu0 %4060 }
 0x6f4   : > { %4139 = vst.msk [vmem:[#allocation4 + $0x90] sm:$0xff] %vm4120_vm6, %v4061_v54  ;;  %v3520_v6 = vpop.permute.xlu1 %3519 }
 0x6f5   : > { %3892 = vrot.lane.b32.xlu0 %v2496_v22, %s5106_s23  ;;  %3595 = vst.msk [vmem:[#allocation4 + $0xa0] sm:$0xff] %vm8539_vm12, %v3520_v6  ;;  %vm8548_vm12 = vmmov %vm8510_vm4 }
 0x6f6   : > { %3894 = vrot.lane.b32.xlu1 %v2497_v56, %s5106_s23  ;;  %s215_s23 = sand.u32 1, %s5088_s19  }
 0x6f7   : > { %v3522_v60 = vpop.permute.xlu0 %3521  ;;  %s4666_s25 = sshll.u32 %s215_s23, 3  ;;  %s4589_s30 = scalar_lea.sflag [#allocation6], %s215_s23 }
 0x6f8   : > { %3596 = vst.msk [vmem:[#allocation4 + $0xa8] sm:$0xff] %vm8540_vm13, %v3522_v60  ;;  %v4063_v40 = vpop.permute.xlu1 %4062  ;;  %vm8549_vm13 = vmmov %vm8510_vm4  ;;  %s217_s10 = scalar_lea.vmem [#allocation5], %s4666_s25 }
 0x6f9   : > { %4084 = vrot.lane.b32.xlu0 %v8541_v28, %s5107_s17  ;;  %4140 = vst.msk [vmem:[#allocation4 + $0x98] sm:$0xff] %vm4120_vm6, %v4063_v40  ;;  %s4603_s11 = sshll.u32 %s217_s10, 4  ;;  %s8306_s11 = int_to_ptr.vmem [resolvable:$true] %s4603_s11 }
 0x6fa   : > { %4086 = vrot.lane.b32.xlu1 %v8542_v24, %s5107_s17  ;;  %s5034_s6 = scalar_lea.vmem %s8306_s11, 128  ;;  %p5041_p0 = scmp.lt.s32.totalorder %s8306_s11, %s5039_s7 }
 0x6fb   : > { %v3669_v31 = vpop.permute.xlu0 %3668  ;;  %v4171_v36 = vld [vmem:[#allocation4 + $0x90] sm:$0xff]  ;;  %p5035_p11 = scmp.ne.s32.totalorder %s8306_s11, %s5034_s6  ;;  %p5042_p1 = scmp.lt.s32.totalorder %s5040_s8, %s5034_s6 }
 0x6fc   : > { %3782 = vst.msk [vmem:[#allocation4 + $0x9f] sm:$0xfe] %vm1699_vm2, %v3669_v31  ;;  %4912 = vmatprep.mubr.msk.f32.mxu1 %vm4197_vm8, %v4171_v36  ;;  %v3671_v52 = vpop.permute.xlu1 %3670 }
 0x6fd   : > { %3783 = vst.msk [vmem:[#allocation4 + $0xa7] sm:$0xff] %vm8505_vm1, %v3671_v52  ;;  %p5036_p12 = pnand %p5035_p11, %p5177_p5  ;;  %p5043_p2 = por %p5042_p1, %p5041_p0 }
 0x6ff   : > { %v3673_v48 = vpop.permute.xlu0 %3672  ;;  %p5037_p13 = pneg %p5036_p12 }
 0x700   : > { %3784 = vst.msk [vmem:[#allocation4 + $0xaf] sm:$0x1] %vm1703_vm14, %v3673_v48  ;;  %v3861_v21 = vpop.permute.xlu1 %3860  ;;  %v4172_v14 = vld [vmem:[#allocation4 + $0x98] sm:$0xff] }
 0x701   : > { %3974 = vst.msk [vmem:[#allocation4 + $0x9e] sm:$0xfc] %vm8543_vm15, %v3861_v21  ;;  %4913 = vmatmul.mubr.msk.f32.gmra.mrb[18].mxu1 %vm4197_vm8, %v4172_v14  ;;  %vm8550_vm15 = vmmov %vm8499_vm11  ;;  %p5044_p3 = pnand %p5043_p2, %p5037_p13 }
 0x703   : > { %v3863_v37 = vpop.permute.xlu0 %3862 }
 0x704   : > { %3975 = vst.msk [vmem:[#allocation4 + $0xa6] sm:$0xff] %vm8508_vm0, %v3863_v37  ;;  %v3865_v8 = vpop.permute.xlu1 %3864 }
 0x705   : > { %3976 = vst.msk [vmem:[#allocation4 + $0xae] sm:$0x3] %vm8509_vm3, %v3865_v8 }
 0x707   : > { %v4065_v38 = vpop.permute.xlu0 %4064 }
 0x708   : > { %4141 = vst.msk [vmem:[#allocation4 + $0xa0] sm:$0xff] %vm4120_vm6, %v4065_v38  ;;  %v3524_v44 = vpop.permute.xlu1 %3523 }
 0x709   : > { %3597 = vst.msk [vmem:[#allocation4 + $0xb0] sm:$0xff] %vm8510_vm4, %v3524_v44 }
 0x70b   : > { %v3526_v9 = vpop.permute.xlu0 %3525 }
 0x70c   : > { %3598 = vst.msk [vmem:[#allocation4 + $0xb8] sm:$0xff] %vm8544_vm10, %v3526_v9  ;;  %v4067_v30 = vpop.permute.xlu1 %4066  ;;  %vm8551_vm10 = vmmov %vm8510_vm4 }
 0x70d   : > { %4142 = vst.msk [vmem:[#allocation4 + $0xa8] sm:$0xff] %vm4120_vm6, %v4067_v30 }
 0x70f   : > { %v3675_v20 = vpop.permute.xlu0 %3674  ;;  %v4173_v35 = vld [vmem:[#allocation4 + $0xa0] sm:$0xff] }
 0x710   : > { %3785 = vst.msk [vmem:[#allocation4 + $0xaf] sm:$0xfe] %vm1699_vm2, %v3675_v20  ;;  %4915 = vmatprep.mubr.msk.f32.mxu1 %vm4197_vm8, %v4173_v35  ;;  %v3677_v17 = vpop.permute.xlu1 %3676 }
 0x711   : > { %3786 = vst.msk [vmem:[#allocation4 + $0xb7] sm:$0xff] %vm8545_vm5, %v3677_v17  ;;  %vm8552_vm5 = vmmov %vm8505_vm1 }
 0x713   : > { %v3679_v33 = vpop.permute.xlu0 %3678 }
 0x714   : > { %3787 = vst.msk [vmem:[#allocation4 + $0xbf] sm:$0x1] %vm1703_vm14, %v3679_v33  ;;  %v3867_v55 = vpop.permute.xlu1 %3866  ;;  %v4174_v34 = vld [vmem:[#allocation4 + $0xa8] sm:$0xff] }
 0x715   : > { %3977 = vst.msk [vmem:[#allocation4 + $0xae] sm:$0xfc] %vm8499_vm11, %v3867_v55  ;;  %4916 = vmatmul.mubr.msk.f32.gmra.mrb[20].mxu1 %vm4197_vm8, %v4174_v34 }
 0x717   : > { %v3869_v26 = vpop.permute.xlu0 %3868 }
 0x718   : > { %3978 = vst.msk [vmem:[#allocation4 + $0xb6] sm:$0xff] %vm8546_vm7, %v3869_v26  ;;  %v3871_v59 = vpop.permute.xlu1 %3870  ;;  %vm8553_vm7 = vmmov %vm8508_vm0 }
 0x719   : > { %3979 = vst.msk [vmem:[#allocation4 + $0xbe] sm:$0x3] %vm8547_vm9, %v3871_v59  ;;  %vm8554_vm9 = vmmov %vm8509_vm3 }
 0x71b   : > { %v4069_v15 = vpop.permute.xlu0 %4068 }
 0x71c   : > { %4143 = vst.msk [vmem:[#allocation4 + $0xb0] sm:$0xff] %vm4120_vm6, %v4069_v15  ;;  %v3528_v43 = vpop.permute.xlu1 %3527 }
 0x71d   : > { %3599 = vst.msk [vmem:[#allocation4 + $0xc0] sm:$0xff] %vm8548_vm12, %v3528_v43  ;;  %vm8555_vm12 = vmmov %vm8510_vm4 }
 0x71f   : > { %v3530_v12 = vpop.permute.xlu0 %3529 }
 0x720   : > { %3600 = vst.msk [vmem:[#allocation4 + $0xc8] sm:$0xff] %vm8549_vm13, %v3530_v12  ;;  %v4071_v32 = vpop.permute.xlu1 %4070  ;;  %vm8556_vm13 = vmmov %vm8510_vm4 }
 0x721   : > { %4144 = vst.msk [vmem:[#allocation4 + $0xb8] sm:$0xff] %vm4120_vm6, %v4071_v32 }
 0x723   : > { %v3681_v16 = vpop.permute.xlu0 %3680  ;;  %v4175_v13 = vld [vmem:[#allocation4 + $0xb0] sm:$0xff] }
 0x724   : > { %3788 = vst.msk [vmem:[#allocation4 + $0xbf] sm:$0xfe] %vm1699_vm2, %v3681_v16  ;;  %4918 = vmatprep.mubr.msk.f32.mxu1 %vm4197_vm8, %v4175_v13  ;;  %v3683_v57 = vpop.permute.xlu1 %3682 }
 0x725   : > { %3789 = vst.msk [vmem:[#allocation4 + $0xc7] sm:$0xff] %vm8505_vm1, %v3683_v57 }
 0x727   : > { %v4887_v2 = vpop.f32.mrb[0].mxu1  ;;  %v3685_v19 = vpop.permute.xlu0 %3684 }
 0x728   : > { %3790 = vst.msk [vmem:[#allocation4 + $0xcf] sm:$0x1] %vm1703_vm14, %v3685_v19  ;;  %v4360_v27 = vpop.f32.mrb[1].mxu1  ;;  %v3873_v51 = vpop.permute.xlu1 %3872  ;;  %v4176_v47 = vld [vmem:[#allocation4 + $0xb8] sm:$0xff]  ;;  %v4366_v10 = vadd.f32 %v4887_v2, %v8220_v1 }
 0x729   : > { %v4361_v49 = vadd.f32 %v8220_v1, %v4360_v27  ;;  %3980 = vst.msk [vmem:[#allocation4 + $0xbe] sm:$0xfc] %vm8550_vm15, %v3873_v51  ;;  %4919 = vmatmul.mubr.msk.f32.gmra.mrb[22].mxu1 %vm4197_vm8, %v4176_v47  ;;  %vm8557_vm15 = vmmov %vm8499_vm11 }
 0x72b   : > { %4519 = vxpose.xlu0.b32.start [1/16] (narrow) %v4361_v49, 8  ;;  %v3875_v11 = vpop.permute.xlu0 %3874 }
 0x72c   : > { %3981 = vst.msk [vmem:[#allocation4 + $0xc6] sm:$0xff] %vm8508_vm0, %v3875_v11  ;;  %v3877_v23 = vpop.permute.xlu1 %3876 }
 0x72d   : > { %3982 = vst.msk [vmem:[#allocation4 + $0xce] sm:$0x3] %vm8509_vm3, %v3877_v23 }
 0x72f   : > { %4520 = vxpose.xlu0.b32.cont [2/16] (narrow) %v4366_v10, 8  ;;  %v4073_v41 = vpop.permute.xlu0 %4072 }
 0x730   : > { %4145 = vst.msk [vmem:[#allocation4 + $0xc0] sm:$0xff] %vm4120_vm6, %v4073_v41  ;;  %v3532_v18 = vpop.permute.xlu1 %3531 }
 0x731   : > { %3601 = vst.msk [vmem:[#allocation4 + $0xd0] sm:$0xff] %vm8510_vm4, %v3532_v18 }
 0x733   : > { %v3534_v7 = vpop.permute.xlu0 %3533 }
 0x734   : > { %3602 = vst.msk [vmem:[#allocation4 + $0xd8] sm:$0xff] %vm8551_vm10, %v3534_v7  ;;  %v4075_v45 = vpop.permute.xlu1 %4074  ;;  %vm8558_vm10 = vmmov %vm8510_vm4 }
 0x735   : > { %4146 = vst.msk [vmem:[#allocation4 + $0xc8] sm:$0xff] %vm4120_vm6, %v4075_v45 }
 0x737   : > { %v4890_v46 = vpop.f32.mrb[2].mxu1  ;;  %v3687_v62 = vpop.permute.xlu0 %3686  ;;  %v4177_v3 = vld [vmem:[#allocation4 + $0xc0] sm:$0xff] }
 0x738   : > { %3791 = vst.msk [vmem:[#allocation4 + $0xcf] sm:$0xfe] %vm1699_vm2, %v3687_v62  ;;  %v4370_v4 = vpop.f32.mrb[3].mxu1  ;;  %4921 = vmatprep.mubr.msk.f32.mxu1 %vm4197_vm8, %v4177_v3  ;;  %v3689_v29 = vpop.permute.xlu1 %3688  ;;  %v4376_v58 = vadd.f32 %v4890_v46, %v8220_v1 }
 0x739   : > { %v4371_v63 = vadd.f32 %v8220_v1, %v4370_v4  ;;  %3792 = vst.msk [vmem:[#allocation4 + $0xd7] sm:$0xff] %vm8552_vm5, %v3689_v29  ;;  %vm8559_vm5 = vmmov %vm8505_vm1 }
 0x73b   : > { %4521 = vxpose.xlu0.b32.cont [3/16] (narrow) %v4371_v63, 8  ;;  %v3691_v22 = vpop.permute.xlu0 %3690 }
 0x73c   : > { %3793 = vst.msk [vmem:[#allocation4 + $0xdf] sm:$0x1] %vm1703_vm14, %v3691_v22  ;;  %v3879_v42 = vpop.permute.xlu1 %3878  ;;  %v4178_v61 = vld [vmem:[#allocation4 + $0xc8] sm:$0xff] }
 0x73d   : > { %3983 = vst.msk [vmem:[#allocation4 + $0xce] sm:$0xfc] %vm8499_vm11, %v3879_v42  ;;  %4922 = vmatmul.mubr.msk.f32.gmra.mrb[24].mxu1 %vm4197_vm8, %v4178_v61 }
 0x73f   : > { %4522 = vxpose.xlu0.b32.cont [4/16] (narrow) %v4376_v58, 8  ;;  %v3881_v50 = vpop.permute.xlu0 %3880 }
 0x740   : > { %3984 = vst.msk [vmem:[#allocation4 + $0xd6] sm:$0xff] %vm8553_vm7, %v3881_v50  ;;  %v3883_v39 = vpop.permute.xlu1 %3882  ;;  %vm8561_vm7 = vmmov %vm8509_vm3 }
 0x741   : > { %3985 = vst.msk [vmem:[#allocation4 + $0xde] sm:$0x3] %vm8554_vm9, %v3883_v39 }
 0x743   : > { %v4077_v53 = vpop.permute.xlu0 %4076 }
 0x744   : > { %4147 = vst.msk [vmem:[#allocation4 + $0xd0] sm:$0xff] %vm4120_vm6, %v4077_v53  ;;  %v3536_v0 = vpop.permute.xlu1 %3535 }
 0x745   : > { %3603 = vst.msk [vmem:[#allocation4 + $0xe0] sm:$0xff] %vm8555_vm12, %v3536_v0 }
 0x747   : > { %v3538_v56 = vpop.permute.xlu0 %3537 }
 0x748   : > { %3604 = vst.msk [vmem:[#allocation4 + $0xe8] sm:$0xff] %vm8556_vm13, %v3538_v56  ;;  %v4079_v25 = vpop.permute.xlu1 %4078  ;;  %v4893_v5 = vpop.f32.mrb[4].mxu1 }
 0x749   : > { %4148 = vst.msk [vmem:[#allocation4 + $0xd8] sm:$0xff] %vm4120_vm6, %v4079_v25  ;;  %v4380_v54 = vpop.f32.mrb[5].mxu1  ;;  %v4386_v24 = vadd.f32 %v4893_v5, %v8220_v1 }
 0x74a   : > { %v4381_v6 = vadd.f32 %v8220_v1, %v4380_v54 }
 0x74b   : > { %v3693_v60 = vpop.permute.xlu0 %3692  ;;  %v4179_v40 = vld [vmem:[#allocation4 + $0xd0] sm:$0xff] }
 0x74c   : > { %3794 = vst.msk [vmem:[#allocation4 + $0xdf] sm:$0xfe] %vm1699_vm2, %v3693_v60  ;;  %4924 = vmatprep.mubr.msk.f32.mxu1 %vm4197_vm8, %v4179_v40  ;;  %v3695_v28 = vpop.permute.xlu1 %3694  ;;  %4523 = vxpose.xlu0.b32.cont [5/16] (narrow) %v4381_v6, 8 }
 0x74d   : > { %3795 = vst.msk [vmem:[#allocation4 + $0xe7] sm:$0xff] %vm8505_vm1, %v3695_v28 }
 0x74f   : > { %v3697_v31 = vpop.permute.xlu0 %3696 }
 0x750   : > { %3796 = vst.msk [vmem:[#allocation4 + $0xef] sm:$0x1] %vm1703_vm14, %v3697_v31  ;;  %v3885_v36 = vpop.permute.xlu1 %3884  ;;  %4524 = vxpose.xlu0.b32.cont [6/16] (narrow) %v4386_v24, 8  ;;  %v4180_v52 = vld [vmem:[#allocation4 + $0xd8] sm:$0xff] }
 0x751   : > { %3986 = vst.msk [vmem:[#allocation4 + $0xde] sm:$0xfc] %vm8557_vm15, %v3885_v36  ;;  %4925 = vmatmul.mubr.msk.f32.gmra.mrb[26].mxu1 %vm4197_vm8, %v4180_v52 }
 0x753   : > { %v3887_v48 = vpop.permute.xlu0 %3886 }
 0x754   : > { %3987 = vst.msk [vmem:[#allocation4 + $0xe6] sm:$0xff] %vm8508_vm0, %v3887_v48  ;;  %v3889_v21 = vpop.permute.xlu1 %3888 }
 0x755   : > { %3988 = vst.msk [vmem:[#allocation4 + $0xee] sm:$0x3] %vm8509_vm3, %v3889_v21 }
 0x757   : > { %v4081_v14 = vpop.permute.xlu0 %4080 }
 0x758   : > { %4149 = vst.msk [vmem:[#allocation4 + $0xe0] sm:$0xff] %vm4120_vm6, %v4081_v14  ;;  %v3540_v37 = vpop.permute.xlu1 %3539 }
 0x759   : > { %3605 = vst.msk [vmem:[#allocation4 + $0xf0] sm:$0xff] %vm8510_vm4, %v3540_v37 }
 0x75b   : > { %v3542_v8 = vpop.permute.xlu0 %3541 }
 0x75c   : > { %3606 = vst.msk [vmem:[#allocation4 + $0xf8] sm:$0xff] %vm8558_vm10, %v3542_v8  ;;  %v4083_v38 = vpop.permute.xlu1 %4082  ;;  %v4896_v44 = vpop.f32.mrb[6].mxu1 }
 0x75d   : > { %4150 = vst.msk [vmem:[#allocation4 + $0xe8] sm:$0xff] %vm4120_vm6, %v4083_v38  ;;  %v4390_v9 = vpop.f32.mrb[7].mxu1  ;;  %v4396_v33 = vadd.f32 %v4896_v44, %v8220_v1 }
 0x75e   : > { %v4391_v30 = vadd.f32 %v8220_v1, %v4390_v9 }
 0x75f   : > { %v3699_v20 = vpop.permute.xlu0 %3698  ;;  %v4181_v35 = vld [vmem:[#allocation4 + $0xe0] sm:$0xff] }
 0x760   : > { %3797 = vst.msk [vmem:[#allocation4 + $0xef] sm:$0xfe] %vm1699_vm2, %v3699_v20  ;;  %4927 = vmatprep.mubr.msk.f32.mxu1 %vm4197_vm8, %v4181_v35  ;;  %v3701_v17 = vpop.permute.xlu1 %3700  ;;  %4525 = vxpose.xlu0.b32.cont [7/16] (narrow) %v4391_v30, 8  ;;  %vm8560_vm2 = vmmov %vm8508_vm0 }
 0x761   : > { %3798 = vst.msk [vmem:[#allocation4 + $0xf7] sm:$0xff] %vm8559_vm5, %v3701_v17 }
 0x763   : > { %v3703_v55 = vpop.permute.xlu0 %3702 }
 0x764   : > { %3799 = vst.msk [vmem:[#allocation4 + $0xff] sm:$0x1] %vm1703_vm14, %v3703_v55  ;;  %v3891_v34 = vpop.permute.xlu1 %3890  ;;  %4526 = vxpose.xlu0.b32.cont [8/16] (narrow) %v4396_v33, 8  ;;  %v4182_v26 = vld [vmem:[#allocation4 + $0xe8] sm:$0xff] }
 0x765   : > { %3989 = vst.msk [vmem:[#allocation4 + $0xee] sm:$0xfc] %vm8499_vm11, %v3891_v34  ;;  %4928 = vmatmul.mubr.msk.f32.gmra.mrb[28].mxu1 %vm4197_vm8, %v4182_v26 }
 0x767   : > { %v3893_v59 = vpop.permute.xlu0 %3892 }
 0x768   : > { %3990 = vst.msk [vmem:[#allocation4 + $0xf6] sm:$0xff] %vm8560_vm2, %v3893_v59  ;;  %v3895_v15 = vpop.permute.xlu1 %3894 }
 0x769   : > { %3991 = vst.msk [vmem:[#allocation4 + $0xfe] sm:$0x3] %vm8561_vm7, %v3895_v15 }
 0x76b   : > { %v4085_v43 = vpop.permute.xlu0 %4084 }
 0x76c   : > { %4151 = vst.msk [vmem:[#allocation4 + $0xf0] sm:$0xff] %vm4120_vm6, %v4085_v43  ;;  %v4087_v12 = vpop.permute.xlu1 %4086 }
 0x76d   : > { %4152 = vst.msk [vmem:[#allocation4 + $0xf8] sm:$0xff] %vm4120_vm6, %v4087_v12 }
 0x770   : > { %v4899_v32 = vpop.f32.mrb[8].mxu1 }
 0x771   : > { %v4400_v16 = vpop.f32.mrb[9].mxu1  ;;  %v4406_v19 = vadd.f32 %v4899_v32, %v8220_v1 }
 0x772   : > { %v4401_v13 = vadd.f32 %v8220_v1, %v4400_v16 }
 0x773   : > { %v4183_v57 = vld [vmem:[#allocation4 + $0xf0] sm:$0xff] }
 0x774   : > { %4930 = vmatprep.mubr.msk.f32.mxu1 %vm4197_vm8, %v4183_v57  ;;  %4527 = vxpose.xlu0.b32.cont [9/16] (narrow) %v4401_v13, 8  ;;  %v4184_v2 = vld [vmem:[#allocation4 + $0xf8] sm:$0xff] }
 0x775   : > { %4931 = vmatmul.mubr.msk.f32.gmra.mrb[30].mxu1 %vm4197_vm8, %v4184_v2 }
 0x778   : > { %4528 = vxpose.xlu0.b32.cont [10/16] (narrow) %v4406_v19, 8 }
 0x784   : > { %v4902_v27 = vpop.f32.mrb[10].mxu1 }
 0x785   : > { %v4410_v49 = vpop.f32.mrb[11].mxu1  ;;  %v4416_v47 = vadd.f32 %v4902_v27, %v8220_v1 }
 0x786   : > { %v4411_v51 = vadd.f32 %v8220_v1, %v4410_v49 }
 0x788   : > { %4529 = vxpose.xlu0.b32.cont [11/16] (narrow) %v4411_v51, 8 }
 0x78c   : > { %4530 = vxpose.xlu0.b32.cont [12/16] (narrow) %v4416_v47, 8 }
 0x798   : > { %v4905_v11 = vpop.f32.mrb[12].mxu1 }
 0x799   : > { %v4420_v10 = vpop.f32.mrb[13].mxu1  ;;  %v4426_v41 = vadd.f32 %v4905_v11, %v8220_v1 }
 0x79a   : > { %v4421_v23 = vadd.f32 %v8220_v1, %v4420_v10 }
 0x79c   : > { %4531 = vxpose.xlu0.b32.cont [13/16] (narrow) %v4421_v23, 8 }
 0x7a0   : > { %4532 = vxpose.xlu0.b32.cont [14/16] (narrow) %v4426_v41, 8 }
 0x7ac   : > { %v4908_v18 = vpop.f32.mrb[14].mxu1 }
 0x7ad   : > { %v4430_v7 = vpop.f32.mrb[15].mxu1  ;;  %v4436_v46 = vadd.f32 %v4908_v18, %v8220_v1 }
 0x7ae   : > { %v4431_v45 = vadd.f32 %v8220_v1, %v4430_v7 }
 0x7b0   : > { %4533 = vxpose.xlu0.b32.cont [15/16] (narrow) %v4431_v45, 8 }
 0x7b4   : > { %4534 = vxpose.xlu0.b32.end [16/16] (narrow) %v4436_v46, 8 }
 0x7c0   : > { %v4911_v62 = vpop.f32.mrb[16].mxu1 }
 0x7c1   : > { %v4440_v3 = vpop.f32.mrb[17].mxu1  ;;  %v4446_v63 = vadd.f32 %v4911_v62, %v8220_v1 }
 0x7c2   : > { %v4441_v4 = vadd.f32 %v8220_v1, %v4440_v3 }
 0x7c4   : > { %4551 = vxpose.xlu1.b32.start [1/16] (narrow) %v4441_v4, 8 }
 0x7c8   : > { %4552 = vxpose.xlu1.b32.cont [2/16] (narrow) %v4446_v63, 8 }
 0x7d4   : > { %v4914_v29 = vpop.f32.mrb[18].mxu1 }
 0x7d5   : > { %v4450_v22 = vpop.f32.mrb[19].mxu1  ;;  %v4456_v42 = vadd.f32 %v4914_v29, %v8220_v1 }
 0x7d6   : > { %v4451_v58 = vadd.f32 %v8220_v1, %v4450_v22 }
 0x7d8   : > { %4553 = vxpose.xlu1.b32.cont [3/16] (narrow) %v4451_v58, 8 }
 0x7dc   : > { %4554 = vxpose.xlu1.b32.cont [4/16] (narrow) %v4456_v42, 8 }
 0x7e8   : > { %v4917_v61 = vpop.f32.mrb[20].mxu1 }
 0x7e9   : > { %v4460_v50 = vpop.f32.mrb[21].mxu1  ;;  %v4466_v53 = vadd.f32 %v4917_v61, %v8220_v1 }
 0x7ea   : > { %v4461_v39 = vadd.f32 %v8220_v1, %v4460_v50 }
 0x7ec   : > { %4555 = vxpose.xlu1.b32.cont [5/16] (narrow) %v4461_v39, 8 }
 0x7f0   : > { %4556 = vxpose.xlu1.b32.cont [6/16] (narrow) %v4466_v53, 8 }
 0x7f8   : > { %v4535_v9 = vpop.trf.xlu0 }
 0x7fc   : > { %v4920_v0 = vpop.f32.mrb[22].mxu1 }
 0x7fd   : > { %v4470_v56 = vpop.f32.mrb[23].mxu1  ;;  %v4476_v5 = vadd.f32 %v4920_v0, %v8220_v1 }
 0x7fe   : > { %v4471_v25 = vadd.f32 %v8220_v1, %v4470_v56 }
 0x800   : > { %4557 = vxpose.xlu1.b32.cont [7/16] (narrow) %v4471_v25, 8 }
 0x804   : > { %4558 = vxpose.xlu1.b32.cont [8/16] (narrow) %v4476_v5, 8 }
 0x810   : > { %v4923_v54 = vpop.f32.mrb[24].mxu1 }
 0x811   : > { %v4480_v6 = vpop.f32.mrb[25].mxu1  ;;  %v4486_v40 = vadd.f32 %v4923_v54, %v8220_v1 }
 0x812   : > { %v4481_v60 = vadd.f32 %v8220_v1, %v4480_v6 }
 0x814   : > { %4559 = vxpose.xlu1.b32.cont [9/16] (narrow) %v4481_v60, 8 }
 0x818   : > { %4560 = vxpose.xlu1.b32.cont [10/16] (narrow) %v4486_v40, 8 }
 0x824   : > { %v4926_v28 = vpop.f32.mrb[26].mxu1 }
 0x825   : > { %v4490_v24 = vpop.f32.mrb[27].mxu1  ;;  %v4496_v36 = vadd.f32 %v4926_v28, %v8220_v1 }
 0x826   : > { %v4491_v31 = vadd.f32 %v8220_v1, %v4490_v24 }
 0x828   : > { %4561 = vxpose.xlu1.b32.cont [11/16] (narrow) %v4491_v31, 8 }
 0x82c   : > { %4562 = vxpose.xlu1.b32.cont [12/16] (narrow) %v4496_v36, 8 }
 0x838   : > { %v4929_v52 = vpop.f32.mrb[28].mxu1 }
 0x839   : > { %v4500_v48 = vpop.f32.mrb[29].mxu1  ;;  %v4506_v14 = vadd.f32 %v4929_v52, %v8220_v1 }
 0x83a   : > { %v4501_v21 = vadd.f32 %v8220_v1, %v4500_v48 }
 0x83c   : > { %4563 = vxpose.xlu1.b32.cont [13/16] (narrow) %v4501_v21, 8 }
 0x840   : > { %4564 = vxpose.xlu1.b32.cont [14/16] (narrow) %v4506_v14, 8 }
 0x848   : > { %v4932_v37 = vpop.f32.mrb[30].mxu1 }
 0x849   : > { %v4510_v8 = vpop.f32.mrb[31].mxu1  ;;  %v4516_v44 = vadd.f32 %v4932_v37, %v8220_v1 }
 0x84a   : > { %v4511_v38 = vadd.f32 %v8220_v1, %v4510_v8 }
 0x84c   : > { %4565 = vxpose.xlu1.b32.cont [15/16] (narrow) %v4511_v38, 8 }
 0x850   : > { %4566 = vxpose.xlu1.b32.end [16/16] (narrow) %v4516_v44, 8 }
 0x894   : > { %v4567_v30 = vpop.trf.xlu1 }
 0x895   : > { %v4585_v20 = vcombine.low %v4535_v9, %v4567_v30 }
 0x897   : > { %4587 = vst [vmem:[%s217_s10] sm:$0xff] %v4585_v20 }
 0x898   : > { %5047 = shalt.err (!%p5044_p3)
}
 0x899   : > { %s5048_s9 = scalar_lea.hbm %s8304_s14, 128  ;;  %s5052_s16 = scalar_lea.hbm %s8351_s5, 256 }
 0x89a   : > { %p5049_p4 = scmp.ne.s32.totalorder %s8304_s14, %s5048_s9  ;;  %p5053_p9 = scmp.lt.u32.totalorder %s8304_s14, %s8351_s5 }
 0x89b   : > { %p5054_p10 = scmp.lt.u32.totalorder %s5052_s16, %s5048_s9  ;;  %p5056_p12 = scmp.lt.u32.totalorder %s5048_s9, %s8304_s14 }
 0x89c   : > { %p5050_p7 = pnand %p5049_p4, %p5177_p5 }
 0x89d   : > { %p5055_p11 = por %p5054_p10, %p5053_p9 }
 0x89e   : > { %p5051_p8 = pneg %p5050_p7 }
 0x89f   : > { %p5057_p13 = por %p5056_p12, %p5055_p11 }
 0x8a1   : > { %p5058_p0 = pnand %p5057_p13, %p5051_p8 }
 0x8a3   : > { %5061 = shalt.err (!%p5058_p0)
}
 0x8a4   : > { %4949 = dma.vmem_to_hbm [thread:$0]  (%p5177_p5), %s8306_s11, 128, %s8304_s14, %s4589_s30  }
 0x8a5 PF: > { %p4955_p1 = scmp.ge.s32.totalorder %s5096_s21, 2  ;;  %s4615_s26 = sand.u32 1, %s5084_s18  }
 0x8a6   : > { %s4616_s10 = scalar_lea.sflag [#allocation6], %s4615_s26 }
 0x8a7   : > { %p4952_p2 = pnand %p4955_p1, %p5181_p6 }
 0x8a9   : > { %5079 = dma.done.wait (!%p4952_p2), %s4616_s10, 128  }
 0x8aa   : > { %5081 = vsyncadd (!%p4952_p2), %s4616_s10, 4294967168  ;;  %p15_p3 = scmp.ge.s32.totalorder %s5164_s24, 4   ;;  %s8562_s18 = smov %s5088_s19 }
 0x8ab   : > { %s8563_s19 = smov %s5092_s20  ;;  %s8564_s20 = smov %s5175_s27 }
 0x8ac   : > { %s8565_s21 = smov %s5164_s24  ;;  %17 = sbr.rel (!%p15_p3) target bundleno = 3 (0x3), region = 79 }
 0x8b3   :  { %4621 = vsyncpa [#allocation6], 1 }
 0x8b4   :  { %4623 = vsyncpa [#allocation6 + $0x1], 1 }

</bundles_post_ra>
